<compile_context>
chip_gen: v7x
topology: tpu7x:2x2x1
jax: 0.10.0
libtpu: 0.0.40
codegen_flags: <defaults>
</compile_context>

<pallas_src>
import functools
import math

import jax
import jax.numpy as jnp
from jax import lax
from jax.experimental import pallas as pl
from jax.experimental.pallas import tpu as pltpu


# Row indices of the packed per-layer "small param" stack (a (13, D) block per layer).
_NQ_A, _NQ_B, _NK_A, _NK_B, _NV_A, _NV_B, _N2_A, _N2_B, _BQ, _BK, _BV, _BO, _B2 = range(13)


# ----------------------------- in-kernel helpers (traced inside the kernel) -----------------------------

def _norm(x, alpha, bias, eps):
    """torch Norm: alpha*(x-mean)/(std+eps)+bias with UNBIASED std (divide by D-1).
    The divide is an EUP approx reciprocal so the VALU stays free."""
    d = x.shape[-1]
    mean = jnp.mean(x, axis=-1, keepdims=True)
    c = x - mean
    var = jnp.sum(c * c, axis=-1, keepdims=True) * (1.0 / (d - 1))
    inv = pl.reciprocal(jnp.sqrt(var) + eps, approx=True)
    return alpha * (c * inv) + bias


def _matmul(x, w_ref):
    """(rows, ·) @ (·, ·): bf16 operands on the MXU, f32 accumulation."""
    return jnp.dot(x.astype(jnp.bfloat16), w_ref[...], preferred_element_type=jnp.float32)


def _token_attention(qp, kp, vp, o_scr, d_k, h):
    """Per-token attention of the reference MHA, vectorized over the row tile.

    qp/kp/vp: (rows, D) projected activations (softmax scale already folded into qp).
      scores[t, i, j] = sum_g qp[t, g*d_k+i] * kp[t, g*d_k+j]    -> softmax over j
      concat[t, g*d_k+i] = sum_j p[t, i, j] * vp[t, g*d_k+j]
    The concatenated PV result is assembled into the VMEM scratch `o_scr` (rows, D) with cheap
    single-lane stores; the caller does the Wo projection as ONE MXU matmul on it.
    """
    k_groups = [kp[:, g * d_k:(g + 1) * d_k] for g in range(h)]
    v_groups = [vp[:, g * d_k:(g + 1) * d_k] for g in range(h)]
    for i in range(d_k):
        # scores of query-slot i against all d_k key-slots: (rows, d_k)
        s = qp[:, i:i + 1] * k_groups[0]
        for g in range(1, h):
            c = g * d_k + i
            s = s + qp[:, c:c + 1] * k_groups[g]
        s = s - jnp.max(s, axis=-1, keepdims=True)
        p = jnp.exp(s)
        p = p * pl.reciprocal(jnp.sum(p, axis=-1, keepdims=True), approx=True)
        for g in range(h):
            c = g * d_k + i
            o_scr[:, c:c + 1] = jnp.sum(p * v_groups[g], axis=-1, keepdims=True)
    return o_scr[...]


# ----------------------------------------------- kernel -----------------------------------------------

def transformer_kernel(q_ref, k_ref, v_ref, small_ref, wq_ref, wk_ref, wv_ref, wo_ref,
                       w1_ref, b1_ref, w2_ref, fin_ref, w_out_ref, b_out_ref,
                       o_ref, x_scr, attn_scr, *, d_k, h, eps):
    l = pl.program_id(1)                       # layer axis (innermost, "arbitrary")

    @pl.when(l == 0)
    def _():
        x_scr[...] = v_ref[...]                # residual stream starts at v

    small = small_ref[...]                     # (13, D) packed norm params / biases (f32)

    def row(i):
        return small[i:i + 1, :]

    x = x_scr[...]

    # ---- attention block (dropout_1 == identity) ----
    qn = _norm(q_ref[...], row(_NQ_A), row(_NQ_B), eps)
    kn = _norm(k_ref[...], row(_NK_A), row(_NK_B), eps)
    vn = _norm(x, row(_NV_A), row(_NV_B), eps)
    qp = _matmul(qn, wq_ref) + row(_BQ)        # 1/sqrt(d_k) already folded into wq / bq
    kp = _matmul(kn, wk_ref) + row(_BK)
    vp = _matmul(vn, wv_ref) + row(_BV)
    o_cat = _token_attention(qp, kp, vp, attn_scr, d_k, h)      # (rows, D)
    x = x + _matmul(o_cat, wo_ref) + row(_BO)                   # output projection on the MXU

    # ---- feed-forward block (dropout_2 == identity) ----
    x2 = _norm(x, row(_N2_A), row(_N2_B), eps)
    hid = jnp.maximum(_matmul(x2, w1_ref) + b1_ref[...], 0.0)
    x = x + _matmul(hid, w2_ref) + row(_B2)

    x_scr[...] = x                             # carry residual to the next layer grid step

    @pl.when(l == pl.num_programs(1) - 1)
    def _():
        xf = _norm(x, fin_ref[0:1, :], fin_ref[1:2, :], eps)    # encoder final Norm
        o_ref[...] = (_matmul(xf, w_out_ref) + b_out_ref[...]).astype(o_ref.dtype)


# ---------------------------------------------- wrapper -----------------------------------------------

def _pack_params(params, d_k):
    """Layer-stack params (weights in bf16, softmax scale folded into wq/bq); pack all tiny
    (1, D) norm/bias vectors into one (L, 13, D) array to minimize refs / DMA descriptors."""
    scale = 1.0 / math.sqrt(d_k)
    small, wq, wk, wv, wo, w1, b1, w2 = [], [], [], [], [], [], [], []
    for lp in params["layers"]:
        small.append(jnp.concatenate([
            lp["nq_a"], lp["nq_b"], lp["nk_a"], lp["nk_b"],
            lp["nv_a"], lp["nv_b"], lp["n2_a"], lp["n2_b"],
            lp["bq"] * scale, lp["bk"], lp["bv"], lp["bo"], lp["b2"]], axis=0))
        wq.append((lp["wq"] * scale).astype(jnp.bfloat16))
        wk.append(lp["wk"].astype(jnp.bfloat16))
        wv.append(lp["wv"].astype(jnp.bfloat16))
        wo.append(lp["wo"].astype(jnp.bfloat16))
        w1.append(lp["w1"].astype(jnp.bfloat16))
        b1.append(lp["b1"])
        w2.append(lp["w2"].astype(jnp.bfloat16))
    return (jnp.stack(small), jnp.stack(wq), jnp.stack(wk), jnp.stack(wv), jnp.stack(wo),
            jnp.stack(w1), jnp.stack(b1), jnp.stack(w2))


def _vmem_limit_bytes():
    """Explicit VMEM budget: ~100 MiB on v5e/v6e (128 MiB physical), <= ~56 MiB on v7x
    (64 MiB physical); conservative fallback if the hardware query is unavailable."""
    try:
        phys = pltpu.get_tpu_info().vmem_capacity_bytes
        return int(min(100 * 1024 * 1024, phys - 8 * 1024 * 1024))
    except Exception:
        return 48 * 1024 * 1024


def transformer_forward(q, k, v, params, *, heads, eps=1e-6, row_block=None):
    B, S, D = q.shape
    assert D % heads == 0
    d_k = D // heads
    T = B * S
    n_layers = len(params["layers"])
    d_ff = params["layers"][0]["w1"].shape[1]
    out_dim = params["w_out"].shape[1]
    out_pad = ((out_dim + 127) // 128) * 128          # lane-dense head output (2401 -> 2432)

    if row_block is None:                             # prefer big tiles but keep >= 2 grid steps
        row_block = T
        for cand in (512, 256, 128, 64, 32, 16, 8):
            if T % cand == 0 and T // cand >= 2:
                row_block = cand
                break
    assert T % row_block == 0

    # All ops are per-token: flatten (B, S, D) -> (B*S, D) and tile rows across the grid.
    qf = q.reshape(T, D).astype(jnp.float32)
    kf = k.reshape(T, D).astype(jnp.float32)
    vf = v.reshape(T, D).astype(jnp.float32)

    small_s, wq_s, wk_s, wv_s, wo_s, w1_s, b1_s, w2_s = _pack_params(params, d_k)
    fin = jnp.concatenate([params["nf_a"], params["nf_b"]], axis=0)             # (2, D)
    w_out_p = jnp.zeros((D, out_pad), jnp.float32).at[:, :out_dim].set(
        params["w_out"]).astype(jnp.bfloat16)
    b_out_p = jnp.zeros((1, out_pad), jnp.float32).at[:, :out_dim].set(params["b_out"])

    act_spec = pl.BlockSpec((row_block, D), lambda t, l: (t, 0))

    def per_layer(*dims):                              # layer-streamed (double-buffered) weights
        return pl.BlockSpec((None,) + dims, lambda t, l: (l, 0, 0))

    in_specs = [
        act_spec, act_spec, act_spec,                  # q, k, v row tiles (constant across l)
        per_layer(13, D),                              # packed norm params + biases
        per_layer(D, D), per_layer(D, D), per_layer(D, D), per_layer(D, D),     # wq wk wv wo
        per_layer(D, d_ff), per_layer(1, d_ff), per_layer(d_ff, D),             # w1 b1 w2
        pl.BlockSpec((2, D), lambda t, l: (0, 0)),        # final norm params
        pl.BlockSpec((D, out_pad), lambda t, l: (0, 0)),  # head weight
        pl.BlockSpec((1, out_pad), lambda t, l: (0, 0)),  # head bias
    ]
    out_spec = pl.BlockSpec((row_block, out_pad), lambda t, l: (t, 0))

    kernel = functools.partial(transformer_kernel, d_k=d_k, h=heads, eps=eps)
    out = pl.pallas_call(
        kernel,
        out_shape=jax.ShapeDtypeStruct((T, out_pad), jnp.float32),
        grid_spec=pltpu.PrefetchScalarGridSpec(
            num_scalar_prefetch=0,
            grid=(T // row_block, n_layers),
            in_specs=in_specs,
            out_specs=out_spec,
            scratch_shapes=[pltpu.VMEM((row_block, D), jnp.float32),   # residual carry
                            pltpu.VMEM((row_block, D), jnp.float32)],  # PV concat tile
        ),
        compiler_params=pltpu.CompilerParams(
            dimension_semantics=("parallel", "arbitrary"),
            vmem_limit_bytes=_vmem_limit_bytes(),
        ),
    )(qf, kf, vf, small_s, wq_s, wk_s, wv_s, wo_s, w1_s, b1_s, w2_s, fin, w_out_p, b_out_p)
    return out[:, :out_dim].reshape(B, S, out_dim)


# ----------------------------------- deterministic parameter init ------------------------------------

def init_params(key, d_model, n_layers, d_ff=2048, out_dim=49 * 49):
    def norm_p(kk):
        k1, k2 = jax.random.split(kk)
        return (1.0 + 0.1 * jax.random.normal(k1, (1, d_model), jnp.float32),
                0.1 * jax.random.normal(k2, (1, d_model), jnp.float32))

    def lin(kk, fin, fout):
        k1, k2 = jax.random.split(kk)
        return (0.05 * jax.random.normal(k1, (fin, fout), jnp.float32),
                0.05 * jax.random.normal(k2, (1, fout), jnp.float32))

    lkeys = jax.random.split(key, n_layers + 2)
    layers = []
    for l in range(n_layers):
        sub = jax.random.split(lkeys[l], 10)
        lp = {}
        lp["nq_a"], lp["nq_b"] = norm_p(sub[0])
        lp["nk_a"], lp["nk_b"] = norm_p(sub[1])
        lp["nv_a"], lp["nv_b"] = norm_p(sub[2])
        lp["n2_a"], lp["n2_b"] = norm_p(sub[3])
        lp["wq"], lp["bq"] = lin(sub[4], d_model, d_model)
        lp["wk"], lp["bk"] = lin(sub[5], d_model, d_model)
        lp["wv"], lp["bv"] = lin(sub[6], d_model, d_model)
        lp["wo"], lp["bo"] = lin(sub[7], d_model, d_model)
        lp["w1"], lp["b1"] = lin(sub[8], d_model, d_ff)
        lp["w2"], lp["b2"] = lin(sub[9], d_ff, d_model)
        layers.append(lp)
    nf_a, nf_b = norm_p(lkeys[n_layers])
    w_out, b_out = lin(lkeys[n_layers + 1], d_model, out_dim)
    return {"layers": layers, "nf_a": nf_a, "nf_b": nf_b, "w_out": w_out, "b_out": b_out}


# ------------------------------------- pure-JAX reference check --------------------------------------

def reference(q, k, v, params, *, heads, eps=1e-6):
    """Faithful f32 (HIGHEST precision) re-implementation of the PyTorch forward."""
    B, S, D = q.shape
    d_k = D // heads
    T = B * S
    hi = lax.Precision.HIGHEST

    def norm(x, a, b):
        mean = x.mean(-1, keepdims=True)
        c = x - mean
        var = (c * c).sum(-1, keepdims=True) / (D - 1)          # unbiased (torch .std default)
        return a * c / (jnp.sqrt(var) + eps) + b

    def linear(x, w, b):
        return jnp.dot(x, w, precision=hi) + b

    def mha(qn, kn, vn, lp):
        Q = linear(qn, lp["wq"], lp["bq"]).reshape(T, heads, d_k).transpose(0, 2, 1)  # (T, d_k, h)
        K = linear(kn, lp["wk"], lp["bk"]).reshape(T, heads, d_k).transpose(0, 2, 1)
        V = linear(vn, lp["wv"], lp["bv"]).reshape(T, heads, d_k).transpose(0, 2, 1)
        s = jnp.einsum("tih,tjh->tij", Q, K, precision=hi) / math.sqrt(d_k)
        p = jax.nn.softmax(s, axis=-1)
        o = jnp.einsum("tij,tjh->tih", p, V, precision=hi)
        concat = o.transpose(0, 2, 1).reshape(T, D)
        return linear(concat, lp["wo"], lp["bo"])

    qf, kf, x = q.reshape(T, D), k.reshape(T, D), v.reshape(T, D)
    for lp in params["layers"]:
        qn = norm(qf, lp["nq_a"], lp["nq_b"])
        kn = norm(kf, lp["nk_a"], lp["nk_b"])
        vn = norm(x, lp["nv_a"], lp["nv_b"])
        x = x + mha(qn, kn, vn, lp)
        x2 = norm(x, lp["n2_a"], lp["n2_b"])
        hid = jnp.maximum(linear(x2, lp["w1"], lp["b1"]), 0.0)
        x = x + linear(hid, lp["w2"], lp["b2"])
    x = norm(x, params["nf_a"], params["nf_b"])
    out = linear(x, params["w_out"], params["b_out"])
    return out.reshape(B, S, -1)


# ------------------------------------------------ main -----------------------------------------------

if __name__ == "__main__":
    B, S, D, heads, n_layers = 2, 8, 32, 4, 2     # d_k = 8, d_ff = 2048, head out = 49*49
    key = jax.random.PRNGKey(0)
    kq, kk, kv, kp = jax.random.split(key, 4)
    q = jax.random.normal(kq, (B, S, D), jnp.float32)
    k = jax.random.normal(kk, (B, S, D), jnp.float32)
    v = jax.random.normal(kv, (B, S, D), jnp.float32)
    params = init_params(kp, D, n_layers)

    out = transformer_forward(q, k, v, params, heads=heads, row_block=8)   # grid (2 row tiles, 2 layers)
    out = jax.block_until_ready(out)

    ref = reference(q, k, v, params, heads=heads)
    assert out.shape == (B, S, 49 * 49)
    max_err = float(jnp.max(jnp.abs(out - ref)))
    if not bool(jnp.allclose(out, ref, atol=5e-2, rtol=5e-2)):
        raise AssertionError(f"Pallas output mismatch vs reference; max abs diff = {max_err}")
    print("KERNEL_OK")
</pallas_src>

<mosaic_0001>
module attributes {stable_mosaic.version = 11 : i64} {
  func.func @transformer_kernel(%arg0: i32, %arg1: i32, %arg2: memref<8x32xf32, #tpu.memory_space<vmem>>, %arg3: memref<8x32xf32, #tpu.memory_space<vmem>>, %arg4: memref<8x32xf32, #tpu.memory_space<vmem>>, %arg5: memref<1x13x32xf32, #tpu.memory_space<vmem>>, %arg6: memref<1x32x32xbf16, #tpu.memory_space<vmem>>, %arg7: memref<1x32x32xbf16, #tpu.memory_space<vmem>>, %arg8: memref<1x32x32xbf16, #tpu.memory_space<vmem>>, %arg9: memref<1x32x32xbf16, #tpu.memory_space<vmem>>, %arg10: memref<1x32x2048xbf16, #tpu.memory_space<vmem>>, %arg11: memref<1x1x2048xf32, #tpu.memory_space<vmem>>, %arg12: memref<1x2048x32xbf16, #tpu.memory_space<vmem>>, %arg13: memref<2x32xf32, #tpu.memory_space<vmem>>, %arg14: memref<32x2432xbf16, #tpu.memory_space<vmem>>, %arg15: memref<1x2432xf32, #tpu.memory_space<vmem>>, %arg16: memref<8x2432xf32, #tpu.memory_space<vmem>>, %arg17: memref<8x32xf32, #tpu.memory_space<vmem>>, %arg18: memref<8x32xf32, #tpu.memory_space<vmem>>) attributes {dimension_semantics = [#tpu.dimension_semantics<parallel>, #tpu.dimension_semantics<arbitrary>], iteration_bounds = array<i64: 2, 2>, scalar_prefetch = 0 : i64, scratch_operands = 2 : i64, tpu.core_type = #tpu.core_type<tc>, window_params = [{transform_indices = @transform_0, window_bounds = array<i64: 8, 32>}, {transform_indices = @transform_1, window_bounds = array<i64: 8, 32>}, {transform_indices = @transform_2, window_bounds = array<i64: 8, 32>}, {transform_indices = @transform_3, window_bounds = array<i64: 1, 13, 32>}, {transform_indices = @transform_4, window_bounds = array<i64: 1, 32, 32>}, {transform_indices = @transform_5, window_bounds = array<i64: 1, 32, 32>}, {transform_indices = @transform_6, window_bounds = array<i64: 1, 32, 32>}, {transform_indices = @transform_7, window_bounds = array<i64: 1, 32, 32>}, {transform_indices = @transform_8, window_bounds = array<i64: 1, 32, 2048>}, {transform_indices = @transform_9, window_bounds = array<i64: 1, 1, 2048>}, {transform_indices = @transform_10, window_bounds = array<i64: 1, 2048, 32>}, {pipeline_mode = #tpu.pipeline_mode<synchronous>, transform_indices = @transform_11, window_bounds = array<i64: 2, 32>}, {pipeline_mode = #tpu.pipeline_mode<synchronous>, transform_indices = @transform_12, window_bounds = array<i64: 32, 2432>}, {pipeline_mode = #tpu.pipeline_mode<synchronous>, transform_indices = @transform_13, window_bounds = array<i64: 1, 2432>}, {transform_indices = @transform_14, window_bounds = array<i64: 8, 2432>}]} {
    %c0_i32 = arith.constant 0 : i32
    %0 = arith.cmpi eq, %arg1, %c0_i32 : i32
    %1 = arith.extui %0 : i1 to i32
    %c0_i32_0 = arith.constant 0 : i32
    %2 = arith.cmpi ne, %1, %c0_i32_0 : i32
    scf.if %2 {
      %c0_142 = arith.constant 0 : index
      %c0_143 = arith.constant 0 : index
      %488 = vector.load %arg4[%c0_142, %c0_143] : memref<8x32xf32, #tpu.memory_space<vmem>>, vector<8x32xf32>
      %c0_144 = arith.constant 0 : index
      %c0_145 = arith.constant 0 : index
      %489 = vector.load %arg17[%c0_144, %c0_145] : memref<8x32xf32, #tpu.memory_space<vmem>>, vector<8x32xf32>
      tpu.vector_store %arg17[%c0_144, %c0_145], %488 {strides = array<i32>} : memref<8x32xf32, #tpu.memory_space<vmem>>, vector<8x32xf32>,
    } else {
    }
    %c0 = arith.constant 0 : index
    %c0_1 = arith.constant 0 : index
    %c0_2 = arith.constant 0 : index
    %3 = vector.load %arg5[%c0, %c0_1, %c0_2] : memref<1x13x32xf32, #tpu.memory_space<vmem>>, vector<1x13x32xf32>
    %4 = vector.shape_cast %3 : vector<1x13x32xf32> to vector<13x32xf32>
    %c0_3 = arith.constant 0 : index
    %c0_4 = arith.constant 0 : index
    %5 = vector.load %arg17[%c0_3, %c0_4] : memref<8x32xf32, #tpu.memory_space<vmem>>, vector<8x32xf32>
    %c0_5 = arith.constant 0 : index
    %c0_6 = arith.constant 0 : index
    %6 = vector.load %arg2[%c0_5, %c0_6] : memref<8x32xf32, #tpu.memory_space<vmem>>, vector<8x32xf32>
    %7 = vector.extract_strided_slice %4 {offsets = [0, 0], sizes = [1, 32], strides = [1, 1]} : vector<13x32xf32> to vector<1x32xf32>
    %8 = vector.extract_strided_slice %4 {offsets = [1, 0], sizes = [1, 32], strides = [1, 1]} : vector<13x32xf32> to vector<1x32xf32>
    %cst = arith.constant dense<0.000000e+00> : vector<8xf32>
    %9 = vector.multi_reduction <add>, %6, %cst [1] : vector<8x32xf32> to vector<8xf32>
    %10 = vector.shape_cast %9 : vector<8xf32> to vector<8x1xf32>
    %cst_7 = arith.constant 3.200000e+01 : f32
    %11 = vector.broadcast %cst_7 : f32 to vector<8x1xf32>
    %12 = arith.divf %10, %11 : vector<8x1xf32>
    %13 = vector.broadcast %12 : vector<8x1xf32> to vector<8x32xf32>
    %14 = arith.subf %6, %13 : vector<8x32xf32>
    %15 = arith.mulf %14, %14 : vector<8x32xf32>
    %cst_8 = arith.constant dense<0.000000e+00> : vector<8xf32>
    %16 = vector.multi_reduction <add>, %15, %cst_8 [1] : vector<8x32xf32> to vector<8xf32>
    %17 = vector.shape_cast %16 : vector<8xf32> to vector<8x1xf32>
    %cst_9 = arith.constant 0.0322580636 : f32
    %18 = vector.broadcast %cst_9 : f32 to vector<8x1xf32>
    %19 = arith.mulf %17, %18 : vector<8x1xf32>
    %20 = math.sqrt %19 : vector<8x1xf32>
    %cst_10 = arith.constant 9.99999997E-7 : f32
    %21 = vector.broadcast %cst_10 : f32 to vector<8x1xf32>
    %22 = arith.addf %20, %21 : vector<8x1xf32>
    %23 = tpu.reciprocal %22 {approx = true} : vector<8x1xf32> -> vector<8x1xf32>
    %24 = vector.broadcast %23 : vector<8x1xf32> to vector<8x32xf32>
    %25 = arith.mulf %14, %24 : vector<8x32xf32>
    %26 = vector.broadcast %7 : vector<1x32xf32> to vector<8x32xf32>
    %27 = arith.mulf %26, %25 : vector<8x32xf32>
    %28 = vector.broadcast %8 : vector<1x32xf32> to vector<8x32xf32>
    %29 = arith.addf %27, %28 : vector<8x32xf32>
    %c0_11 = arith.constant 0 : index
    %c0_12 = arith.constant 0 : index
    %30 = vector.load %arg3[%c0_11, %c0_12] : memref<8x32xf32, #tpu.memory_space<vmem>>, vector<8x32xf32>
    %31 = vector.extract_strided_slice %4 {offsets = [2, 0], sizes = [1, 32], strides = [1, 1]} : vector<13x32xf32> to vector<1x32xf32>
    %32 = vector.extract_strided_slice %4 {offsets = [3, 0], sizes = [1, 32], strides = [1, 1]} : vector<13x32xf32> to vector<1x32xf32>
    %cst_13 = arith.constant dense<0.000000e+00> : vector<8xf32>
    %33 = vector.multi_reduction <add>, %30, %cst_13 [1] : vector<8x32xf32> to vector<8xf32>
    %34 = vector.shape_cast %33 : vector<8xf32> to vector<8x1xf32>
    %cst_14 = arith.constant 3.200000e+01 : f32
    %35 = vector.broadcast %cst_14 : f32 to vector<8x1xf32>
    %36 = arith.divf %34, %35 : vector<8x1xf32>
    %37 = vector.broadcast %36 : vector<8x1xf32> to vector<8x32xf32>
    %38 = arith.subf %30, %37 : vector<8x32xf32>
    %39 = arith.mulf %38, %38 : vector<8x32xf32>
    %cst_15 = arith.constant dense<0.000000e+00> : vector<8xf32>
    %40 = vector.multi_reduction <add>, %39, %cst_15 [1] : vector<8x32xf32> to vector<8xf32>
    %41 = vector.shape_cast %40 : vector<8xf32> to vector<8x1xf32>
    %cst_16 = arith.constant 0.0322580636 : f32
    %42 = vector.broadcast %cst_16 : f32 to vector<8x1xf32>
    %43 = arith.mulf %41, %42 : vector<8x1xf32>
    %44 = math.sqrt %43 : vector<8x1xf32>
    %cst_17 = arith.constant 9.99999997E-7 : f32
    %45 = vector.broadcast %cst_17 : f32 to vector<8x1xf32>
    %46 = arith.addf %44, %45 : vector<8x1xf32>
    %47 = tpu.reciprocal %46 {approx = true} : vector<8x1xf32> -> vector<8x1xf32>
    %48 = vector.broadcast %47 : vector<8x1xf32> to vector<8x32xf32>
    %49 = arith.mulf %38, %48 : vector<8x32xf32>
    %50 = vector.broadcast %31 : vector<1x32xf32> to vector<8x32xf32>
    %51 = arith.mulf %50, %49 : vector<8x32xf32>
    %52 = vector.broadcast %32 : vector<1x32xf32> to vector<8x32xf32>
    %53 = arith.addf %51, %52 : vector<8x32xf32>
    %54 = vector.extract_strided_slice %4 {offsets = [4, 0], sizes = [1, 32], strides = [1, 1]} : vector<13x32xf32> to vector<1x32xf32>
    %55 = vector.extract_strided_slice %4 {offsets = [5, 0], sizes = [1, 32], strides = [1, 1]} : vector<13x32xf32> to vector<1x32xf32>
    %cst_18 = arith.constant dense<0.000000e+00> : vector<8xf32>
    %56 = vector.multi_reduction <add>, %5, %cst_18 [1] : vector<8x32xf32> to vector<8xf32>
    %57 = vector.shape_cast %56 : vector<8xf32> to vector<8x1xf32>
    %cst_19 = arith.constant 3.200000e+01 : f32
    %58 = vector.broadcast %cst_19 : f32 to vector<8x1xf32>
    %59 = arith.divf %57, %58 : vector<8x1xf32>
    %60 = vector.broadcast %59 : vector<8x1xf32> to vector<8x32xf32>
    %61 = arith.subf %5, %60 : vector<8x32xf32>
    %62 = arith.mulf %61, %61 : vector<8x32xf32>
    %cst_20 = arith.constant dense<0.000000e+00> : vector<8xf32>
    %63 = vector.multi_reduction <add>, %62, %cst_20 [1] : vector<8x32xf32> to vector<8xf32>
    %64 = vector.shape_cast %63 : vector<8xf32> to vector<8x1xf32>
    %cst_21 = arith.constant 0.0322580636 : f32
    %65 = vector.broadcast %cst_21 : f32 to vector<8x1xf32>
    %66 = arith.mulf %64, %65 : vector<8x1xf32>
    %67 = math.sqrt %66 : vector<8x1xf32>
    %cst_22 = arith.constant 9.99999997E-7 : f32
    %68 = vector.broadcast %cst_22 : f32 to vector<8x1xf32>
    %69 = arith.addf %67, %68 : vector<8x1xf32>
    %70 = tpu.reciprocal %69 {approx = true} : vector<8x1xf32> -> vector<8x1xf32>
    %71 = vector.broadcast %70 : vector<8x1xf32> to vector<8x32xf32>
    %72 = arith.mulf %61, %71 : vector<8x32xf32>
    %73 = vector.broadcast %54 : vector<1x32xf32> to vector<8x32xf32>
    %74 = arith.mulf %73, %72 : vector<8x32xf32>
    %75 = vector.broadcast %55 : vector<1x32xf32> to vector<8x32xf32>
    %76 = arith.addf %74, %75 : vector<8x32xf32>
    %77 = arith.truncf %29 : vector<8x32xf32> to vector<8x32xbf16>
    %c0_23 = arith.constant 0 : index
    %c0_24 = arith.constant 0 : index
    %c0_25 = arith.constant 0 : index
    %78 = vector.load %arg6[%c0_23, %c0_24, %c0_25] : memref<1x32x32xbf16, #tpu.memory_space<vmem>>, vector<1x32x32xbf16>
    %79 = vector.shape_cast %78 : vector<1x32x32xbf16> to vector<32x32xbf16>
    %cst_26 = arith.constant dense<0.000000e+00> : vector<8x32xf32>
    %80 = tpu.matmul %77, %79, %cst_26 {dimension_numbers = #tpu.dot_dimension_numbers<[1], [0], [0], [1], [0, 0, 1, 1], [], []>} : vector<8x32xbf16>, vector<32x32xbf16>, vector<8x32xf32> -> vector<8x32xf32>
    %81 = vector.extract_strided_slice %4 {offsets = [8, 0], sizes = [1, 32], strides = [1, 1]} : vector<13x32xf32> to vector<1x32xf32>
    %82 = vector.broadcast %81 : vector<1x32xf32> to vector<8x32xf32>
    %83 = arith.addf %80, %82 : vector<8x32xf32>
    %84 = arith.truncf %53 : vector<8x32xf32> to vector<8x32xbf16>
    %c0_27 = arith.constant 0 : index
    %c0_28 = arith.constant 0 : index
    %c0_29 = arith.constant 0 : index
    %85 = vector.load %arg7[%c0_27, %c0_28, %c0_29] : memref<1x32x32xbf16, #tpu.memory_space<vmem>>, vector<1x32x32xbf16>
    %86 = vector.shape_cast %85 : vector<1x32x32xbf16> to vector<32x32xbf16>
    %cst_30 = arith.constant dense<0.000000e+00> : vector<8x32xf32>
    %87 = tpu.matmul %84, %86, %cst_30 {dimension_numbers = #tpu.dot_dimension_numbers<[1], [0], [0], [1], [0, 0, 1, 1], [], []>} : vector<8x32xbf16>, vector<32x32xbf16>, vector<8x32xf32> -> vector<8x32xf32>
    %88 = vector.extract_strided_slice %4 {offsets = [9, 0], sizes = [1, 32], strides = [1, 1]} : vector<13x32xf32> to vector<1x32xf32>
    %89 = vector.broadcast %88 : vector<1x32xf32> to vector<8x32xf32>
    %90 = arith.addf %87, %89 : vector<8x32xf32>
    %91 = arith.truncf %76 : vector<8x32xf32> to vector<8x32xbf16>
    %c0_31 = arith.constant 0 : index
    %c0_32 = arith.constant 0 : index
    %c0_33 = arith.constant 0 : index
    %92 = vector.load %arg8[%c0_31, %c0_32, %c0_33] : memref<1x32x32xbf16, #tpu.memory_space<vmem>>, vector<1x32x32xbf16>
    %93 = vector.shape_cast %92 : vector<1x32x32xbf16> to vector<32x32xbf16>
    %cst_34 = arith.constant dense<0.000000e+00> : vector<8x32xf32>
    %94 = tpu.matmul %91, %93, %cst_34 {dimension_numbers = #tpu.dot_dimension_numbers<[1], [0], [0], [1], [0, 0, 1, 1], [], []>} : vector<8x32xbf16>, vector<32x32xbf16>, vector<8x32xf32> -> vector<8x32xf32>
    %95 = vector.extract_strided_slice %4 {offsets = [10, 0], sizes = [1, 32], strides = [1, 1]} : vector<13x32xf32> to vector<1x32xf32>
    %96 = vector.broadcast %95 : vector<1x32xf32> to vector<8x32xf32>
    %97 = arith.addf %94, %96 : vector<8x32xf32>
    %98 = vector.extract_strided_slice %90 {offsets = [0, 0], sizes = [8, 8], strides = [1, 1]} : vector<8x32xf32> to vector<8x8xf32>
    %99 = vector.extract_strided_slice %90 {offsets = [0, 8], sizes = [8, 8], strides = [1, 1]} : vector<8x32xf32> to vector<8x8xf32>
    %100 = vector.extract_strided_slice %90 {offsets = [0, 16], sizes = [8, 8], strides = [1, 1]} : vector<8x32xf32> to vector<8x8xf32>
    %101 = vector.extract_strided_slice %90 {offsets = [0, 24], sizes = [8, 8], strides = [1, 1]} : vector<8x32xf32> to vector<8x8xf32>
    %102 = vector.extract_strided_slice %97 {offsets = [0, 0], sizes = [8, 8], strides = [1, 1]} : vector<8x32xf32> to vector<8x8xf32>
    %103 = vector.extract_strided_slice %97 {offsets = [0, 8], sizes = [8, 8], strides = [1, 1]} : vector<8x32xf32> to vector<8x8xf32>
    %104 = vector.extract_strided_slice %97 {offsets = [0, 16], sizes = [8, 8], strides = [1, 1]} : vector<8x32xf32> to vector<8x8xf32>
    %105 = vector.extract_strided_slice %97 {offsets = [0, 24], sizes = [8, 8], strides = [1, 1]} : vector<8x32xf32> to vector<8x8xf32>
    %106 = vector.extract_strided_slice %83 {offsets = [0, 0], sizes = [8, 1], strides = [1, 1]} : vector<8x32xf32> to vector<8x1xf32>
    %107 = vector.broadcast %106 : vector<8x1xf32> to vector<8x8xf32>
    %108 = arith.mulf %107, %98 : vector<8x8xf32>
    %109 = vector.extract_strided_slice %83 {offsets = [0, 8], sizes = [8, 1], strides = [1, 1]} : vector<8x32xf32> to vector<8x1xf32>
    %110 = vector.broadcast %109 : vector<8x1xf32> to vector<8x8xf32>
    %111 = arith.mulf %110, %99 : vector<8x8xf32>
    %112 = arith.addf %108, %111 : vector<8x8xf32>
    %113 = vector.extract_strided_slice %83 {offsets = [0, 16], sizes = [8, 1], strides = [1, 1]} : vector<8x32xf32> to vector<8x1xf32>
    %114 = vector.broadcast %113 : vector<8x1xf32> to vector<8x8xf32>
    %115 = arith.mulf %114, %100 : vector<8x8xf32>
    %116 = arith.addf %112, %115 : vector<8x8xf32>
    %117 = vector.extract_strided_slice %83 {offsets = [0, 24], sizes = [8, 1], strides = [1, 1]} : vector<8x32xf32> to vector<8x1xf32>
    %118 = vector.broadcast %117 : vector<8x1xf32> to vector<8x8xf32>
    %119 = arith.mulf %118, %101 : vector<8x8xf32>
    %120 = arith.addf %116, %119 : vector<8x8xf32>
    %cst_35 = arith.constant dense<0xFF800000> : vector<8xf32>
    %121 = vector.multi_reduction <maximumf>, %120, %cst_35 [1] : vector<8x8xf32> to vector<8xf32>
    %122 = vector.shape_cast %121 : vector<8xf32> to vector<8x1xf32>
    %123 = vector.broadcast %122 : vector<8x1xf32> to vector<8x8xf32>
    %124 = arith.subf %120, %123 : vector<8x8xf32>
    %125 = math.exp %124 : vector<8x8xf32>
    %cst_36 = arith.constant dense<0.000000e+00> : vector<8xf32>
    %126 = vector.multi_reduction <add>, %125, %cst_36 [1] : vector<8x8xf32> to vector<8xf32>
    %127 = vector.shape_cast %126 : vector<8xf32> to vector<8x1xf32>
    %128 = tpu.reciprocal %127 {approx = true} : vector<8x1xf32> -> vector<8x1xf32>
    %129 = vector.broadcast %128 : vector<8x1xf32> to vector<8x8xf32>
    %130 = arith.mulf %125, %129 : vector<8x8xf32>
    %131 = arith.mulf %130, %102 : vector<8x8xf32>
    %cst_37 = arith.constant dense<0.000000e+00> : vector<8xf32>
    %132 = vector.multi_reduction <add>, %131, %cst_37 [1] : vector<8x8xf32> to vector<8xf32>
    %133 = vector.shape_cast %132 : vector<8xf32> to vector<8x1xf32>
    %c0_38 = arith.constant 0 : index
    %c0_39 = arith.constant 0 : index
    %134 = vector.load %arg18[%c0_38, %c0_39] : memref<8x32xf32, #tpu.memory_space<vmem>>, vector<8x1xf32>
    tpu.vector_store %arg18[%c0_38, %c0_39], %133 {strides = array<i32>} : memref<8x32xf32, #tpu.memory_space<vmem>>, vector<8x1xf32>,
    %135 = arith.mulf %130, %103 : vector<8x8xf32>
    %cst_40 = arith.constant dense<0.000000e+00> : vector<8xf32>
    %136 = vector.multi_reduction <add>, %135, %cst_40 [1] : vector<8x8xf32> to vector<8xf32>
    %137 = vector.shape_cast %136 : vector<8xf32> to vector<8x1xf32>
    %c0_41 = arith.constant 0 : index
    %c8 = arith.constant 8 : index
    %138 = vector.load %arg18[%c0_41, %c8] : memref<8x32xf32, #tpu.memory_space<vmem>>, vector<8x1xf32>
    tpu.vector_store %arg18[%c0_41, %c8], %137 {strides = array<i32>} : memref<8x32xf32, #tpu.memory_space<vmem>>, vector<8x1xf32>,
    %139 = arith.mulf %130, %104 : vector<8x8xf32>
    %cst_42 = arith.constant dense<0.000000e+00> : vector<8xf32>
    %140 = vector.multi_reduction <add>, %139, %cst_42 [1] : vector<8x8xf32> to vector<8xf32>
    %141 = vector.shape_cast %140 : vector<8xf32> to vector<8x1xf32>
    %c0_43 = arith.constant 0 : index
    %c16 = arith.constant 16 : index
    %142 = vector.load %arg18[%c0_43, %c16] : memref<8x32xf32, #tpu.memory_space<vmem>>, vector<8x1xf32>
    tpu.vector_store %arg18[%c0_43, %c16], %141 {strides = array<i32>} : memref<8x32xf32, #tpu.memory_space<vmem>>, vector<8x1xf32>,
    %143 = arith.mulf %130, %105 : vector<8x8xf32>
    %cst_44 = arith.constant dense<0.000000e+00> : vector<8xf32>
    %144 = vector.multi_reduction <add>, %143, %cst_44 [1] : vector<8x8xf32> to vector<8xf32>
    %145 = vector.shape_cast %144 : vector<8xf32> to vector<8x1xf32>
    %c0_45 = arith.constant 0 : index
    %c24 = arith.constant 24 : index
    %146 = vector.load %arg18[%c0_45, %c24] : memref<8x32xf32, #tpu.memory_space<vmem>>, vector<8x1xf32>
    tpu.vector_store %arg18[%c0_45, %c24], %145 {strides = array<i32>} : memref<8x32xf32, #tpu.memory_space<vmem>>, vector<8x1xf32>,
    %147 = vector.extract_strided_slice %83 {offsets = [0, 1], sizes = [8, 1], strides = [1, 1]} : vector<8x32xf32> to vector<8x1xf32>
    %148 = vector.broadcast %147 : vector<8x1xf32> to vector<8x8xf32>
    %149 = arith.mulf %148, %98 : vector<8x8xf32>
    %150 = vector.extract_strided_slice %83 {offsets = [0, 9], sizes = [8, 1], strides = [1, 1]} : vector<8x32xf32> to vector<8x1xf32>
    %151 = vector.broadcast %150 : vector<8x1xf32> to vector<8x8xf32>
    %152 = arith.mulf %151, %99 : vector<8x8xf32>
    %153 = arith.addf %149, %152 : vector<8x8xf32>
    %154 = vector.extract_strided_slice %83 {offsets = [0, 17], sizes = [8, 1], strides = [1, 1]} : vector<8x32xf32> to vector<8x1xf32>
    %155 = vector.broadcast %154 : vector<8x1xf32> to vector<8x8xf32>
    %156 = arith.mulf %155, %100 : vector<8x8xf32>
    %157 = arith.addf %153, %156 : vector<8x8xf32>
    %158 = vector.extract_strided_slice %83 {offsets = [0, 25], sizes = [8, 1], strides = [1, 1]} : vector<8x32xf32> to vector<8x1xf32>
    %159 = vector.broadcast %158 : vector<8x1xf32> to vector<8x8xf32>
    %160 = arith.mulf %159, %101 : vector<8x8xf32>
    %161 = arith.addf %157, %160 : vector<8x8xf32>
    %cst_46 = arith.constant dense<0xFF800000> : vector<8xf32>
    %162 = vector.multi_reduction <maximumf>, %161, %cst_46 [1] : vector<8x8xf32> to vector<8xf32>
    %163 = vector.shape_cast %162 : vector<8xf32> to vector<8x1xf32>
    %164 = vector.broadcast %163 : vector<8x1xf32> to vector<8x8xf32>
    %165 = arith.subf %161, %164 : vector<8x8xf32>
    %166 = math.exp %165 : vector<8x8xf32>
    %cst_47 = arith.constant dense<0.000000e+00> : vector<8xf32>
    %167 = vector.multi_reduction <add>, %166, %cst_47 [1] : vector<8x8xf32> to vector<8xf32>
    %168 = vector.shape_cast %167 : vector<8xf32> to vector<8x1xf32>
    %169 = tpu.reciprocal %168 {approx = true} : vector<8x1xf32> -> vector<8x1xf32>
    %170 = vector.broadcast %169 : vector<8x1xf32> to vector<8x8xf32>
    %171 = arith.mulf %166, %170 : vector<8x8xf32>
    %172 = arith.mulf %171, %102 : vector<8x8xf32>
    %cst_48 = arith.constant dense<0.000000e+00> : vector<8xf32>
    %173 = vector.multi_reduction <add>, %172, %cst_48 [1] : vector<8x8xf32> to vector<8xf32>
    %174 = vector.shape_cast %173 : vector<8xf32> to vector<8x1xf32>
    %c0_49 = arith.constant 0 : index
    %c1 = arith.constant 1 : index
    %175 = vector.load %arg18[%c0_49, %c1] : memref<8x32xf32, #tpu.memory_space<vmem>>, vector<8x1xf32>
    tpu.vector_store %arg18[%c0_49, %c1], %174 {strides = array<i32>} : memref<8x32xf32, #tpu.memory_space<vmem>>, vector<8x1xf32>,
    %176 = arith.mulf %171, %103 : vector<8x8xf32>
    %cst_50 = arith.constant dense<0.000000e+00> : vector<8xf32>
    %177 = vector.multi_reduction <add>, %176, %cst_50 [1] : vector<8x8xf32> to vector<8xf32>
    %178 = vector.shape_cast %177 : vector<8xf32> to vector<8x1xf32>
    %c0_51 = arith.constant 0 : index
    %c9 = arith.constant 9 : index
    %179 = vector.load %arg18[%c0_51, %c9] : memref<8x32xf32, #tpu.memory_space<vmem>>, vector<8x1xf32>
    tpu.vector_store %arg18[%c0_51, %c9], %178 {strides = array<i32>} : memref<8x32xf32, #tpu.memory_space<vmem>>, vector<8x1xf32>,
    %180 = arith.mulf %171, %104 : vector<8x8xf32>
    %cst_52 = arith.constant dense<0.000000e+00> : vector<8xf32>
    %181 = vector.multi_reduction <add>, %180, %cst_52 [1] : vector<8x8xf32> to vector<8xf32>
    %182 = vector.shape_cast %181 : vector<8xf32> to vector<8x1xf32>
    %c0_53 = arith.constant 0 : index
    %c17 = arith.constant 17 : index
    %183 = vector.load %arg18[%c0_53, %c17] : memref<8x32xf32, #tpu.memory_space<vmem>>, vector<8x1xf32>
    tpu.vector_store %arg18[%c0_53, %c17], %182 {strides = array<i32>} : memref<8x32xf32, #tpu.memory_space<vmem>>, vector<8x1xf32>,
    %184 = arith.mulf %171, %105 : vector<8x8xf32>
    %cst_54 = arith.constant dense<0.000000e+00> : vector<8xf32>
    %185 = vector.multi_reduction <add>, %184, %cst_54 [1] : vector<8x8xf32> to vector<8xf32>
    %186 = vector.shape_cast %185 : vector<8xf32> to vector<8x1xf32>
    %c0_55 = arith.constant 0 : index
    %c25 = arith.constant 25 : index
    %187 = vector.load %arg18[%c0_55, %c25] : memref<8x32xf32, #tpu.memory_space<vmem>>, vector<8x1xf32>
    tpu.vector_store %arg18[%c0_55, %c25], %186 {strides = array<i32>} : memref<8x32xf32, #tpu.memory_space<vmem>>, vector<8x1xf32>,
    %188 = vector.extract_strided_slice %83 {offsets = [0, 2], sizes = [8, 1], strides = [1, 1]} : vector<8x32xf32> to vector<8x1xf32>
    %189 = vector.broadcast %188 : vector<8x1xf32> to vector<8x8xf32>
    %190 = arith.mulf %189, %98 : vector<8x8xf32>
    %191 = vector.extract_strided_slice %83 {offsets = [0, 10], sizes = [8, 1], strides = [1, 1]} : vector<8x32xf32> to vector<8x1xf32>
    %192 = vector.broadcast %191 : vector<8x1xf32> to vector<8x8xf32>
    %193 = arith.mulf %192, %99 : vector<8x8xf32>
    %194 = arith.addf %190, %193 : vector<8x8xf32>
    %195 = vector.extract_strided_slice %83 {offsets = [0, 18], sizes = [8, 1], strides = [1, 1]} : vector<8x32xf32> to vector<8x1xf32>
    %196 = vector.broadcast %195 : vector<8x1xf32> to vector<8x8xf32>
    %197 = arith.mulf %196, %100 : vector<8x8xf32>
    %198 = arith.addf %194, %197 : vector<8x8xf32>
    %199 = vector.extract_strided_slice %83 {offsets = [0, 26], sizes = [8, 1], strides = [1, 1]} : vector<8x32xf32> to vector<8x1xf32>
    %200 = vector.broadcast %199 : vector<8x1xf32> to vector<8x8xf32>
    %201 = arith.mulf %200, %101 : vector<8x8xf32>
    %202 = arith.addf %198, %201 : vector<8x8xf32>
    %cst_56 = arith.constant dense<0xFF800000> : vector<8xf32>
    %203 = vector.multi_reduction <maximumf>, %202, %cst_56 [1] : vector<8x8xf32> to vector<8xf32>
    %204 = vector.shape_cast %203 : vector<8xf32> to vector<8x1xf32>
    %205 = vector.broadcast %204 : vector<8x1xf32> to vector<8x8xf32>
    %206 = arith.subf %202, %205 : vector<8x8xf32>
    %207 = math.exp %206 : vector<8x8xf32>
    %cst_57 = arith.constant dense<0.000000e+00> : vector<8xf32>
    %208 = vector.multi_reduction <add>, %207, %cst_57 [1] : vector<8x8xf32> to vector<8xf32>
    %209 = vector.shape_cast %208 : vector<8xf32> to vector<8x1xf32>
    %210 = tpu.reciprocal %209 {approx = true} : vector<8x1xf32> -> vector<8x1xf32>
    %211 = vector.broadcast %210 : vector<8x1xf32> to vector<8x8xf32>
    %212 = arith.mulf %207, %211 : vector<8x8xf32>
    %213 = arith.mulf %212, %102 : vector<8x8xf32>
    %cst_58 = arith.constant dense<0.000000e+00> : vector<8xf32>
    %214 = vector.multi_reduction <add>, %213, %cst_58 [1] : vector<8x8xf32> to vector<8xf32>
    %215 = vector.shape_cast %214 : vector<8xf32> to vector<8x1xf32>
    %c0_59 = arith.constant 0 : index
    %c2 = arith.constant 2 : index
    %216 = vector.load %arg18[%c0_59, %c2] : memref<8x32xf32, #tpu.memory_space<vmem>>, vector<8x1xf32>
    tpu.vector_store %arg18[%c0_59, %c2], %215 {strides = array<i32>} : memref<8x32xf32, #tpu.memory_space<vmem>>, vector<8x1xf32>,
    %217 = arith.mulf %212, %103 : vector<8x8xf32>
    %cst_60 = arith.constant dense<0.000000e+00> : vector<8xf32>
    %218 = vector.multi_reduction <add>, %217, %cst_60 [1] : vector<8x8xf32> to vector<8xf32>
    %219 = vector.shape_cast %218 : vector<8xf32> to vector<8x1xf32>
    %c0_61 = arith.constant 0 : index
    %c10 = arith.constant 10 : index
    %220 = vector.load %arg18[%c0_61, %c10] : memref<8x32xf32, #tpu.memory_space<vmem>>, vector<8x1xf32>
    tpu.vector_store %arg18[%c0_61, %c10], %219 {strides = array<i32>} : memref<8x32xf32, #tpu.memory_space<vmem>>, vector<8x1xf32>,
    %221 = arith.mulf %212, %104 : vector<8x8xf32>
    %cst_62 = arith.constant dense<0.000000e+00> : vector<8xf32>
    %222 = vector.multi_reduction <add>, %221, %cst_62 [1] : vector<8x8xf32> to vector<8xf32>
    %223 = vector.shape_cast %222 : vector<8xf32> to vector<8x1xf32>
    %c0_63 = arith.constant 0 : index
    %c18 = arith.constant 18 : index
    %224 = vector.load %arg18[%c0_63, %c18] : memref<8x32xf32, #tpu.memory_space<vmem>>, vector<8x1xf32>
    tpu.vector_store %arg18[%c0_63, %c18], %223 {strides = array<i32>} : memref<8x32xf32, #tpu.memory_space<vmem>>, vector<8x1xf32>,
    %225 = arith.mulf %212, %105 : vector<8x8xf32>
    %cst_64 = arith.constant dense<0.000000e+00> : vector<8xf32>
    %226 = vector.multi_reduction <add>, %225, %cst_64 [1] : vector<8x8xf32> to vector<8xf32>
    %227 = vector.shape_cast %226 : vector<8xf32> to vector<8x1xf32>
    %c0_65 = arith.constant 0 : index
    %c26 = arith.constant 26 : index
    %228 = vector.load %arg18[%c0_65, %c26] : memref<8x32xf32, #tpu.memory_space<vmem>>, vector<8x1xf32>
    tpu.vector_store %arg18[%c0_65, %c26], %227 {strides = array<i32>} : memref<8x32xf32, #tpu.memory_space<vmem>>, vector<8x1xf32>,
    %229 = vector.extract_strided_slice %83 {offsets = [0, 3], sizes = [8, 1], strides = [1, 1]} : vector<8x32xf32> to vector<8x1xf32>
    %230 = vector.broadcast %229 : vector<8x1xf32> to vector<8x8xf32>
    %231 = arith.mulf %230, %98 : vector<8x8xf32>
    %232 = vector.extract_strided_slice %83 {offsets = [0, 11], sizes = [8, 1], strides = [1, 1]} : vector<8x32xf32> to vector<8x1xf32>
    %233 = vector.broadcast %232 : vector<8x1xf32> to vector<8x8xf32>
    %234 = arith.mulf %233, %99 : vector<8x8xf32>
    %235 = arith.addf %231, %234 : vector<8x8xf32>
    %236 = vector.extract_strided_slice %83 {offsets = [0, 19], sizes = [8, 1], strides = [1, 1]} : vector<8x32xf32> to vector<8x1xf32>
    %237 = vector.broadcast %236 : vector<8x1xf32> to vector<8x8xf32>
    %238 = arith.mulf %237, %100 : vector<8x8xf32>
    %239 = arith.addf %235, %238 : vector<8x8xf32>
    %240 = vector.extract_strided_slice %83 {offsets = [0, 27], sizes = [8, 1], strides = [1, 1]} : vector<8x32xf32> to vector<8x1xf32>
    %241 = vector.broadcast %240 : vector<8x1xf32> to vector<8x8xf32>
    %242 = arith.mulf %241, %101 : vector<8x8xf32>
    %243 = arith.addf %239, %242 : vector<8x8xf32>
    %cst_66 = arith.constant dense<0xFF800000> : vector<8xf32>
    %244 = vector.multi_reduction <maximumf>, %243, %cst_66 [1] : vector<8x8xf32> to vector<8xf32>
    %245 = vector.shape_cast %244 : vector<8xf32> to vector<8x1xf32>
    %246 = vector.broadcast %245 : vector<8x1xf32> to vector<8x8xf32>
    %247 = arith.subf %243, %246 : vector<8x8xf32>
    %248 = math.exp %247 : vector<8x8xf32>
    %cst_67 = arith.constant dense<0.000000e+00> : vector<8xf32>
    %249 = vector.multi_reduction <add>, %248, %cst_67 [1] : vector<8x8xf32> to vector<8xf32>
    %250 = vector.shape_cast %249 : vector<8xf32> to vector<8x1xf32>
    %251 = tpu.reciprocal %250 {approx = true} : vector<8x1xf32> -> vector<8x1xf32>
    %252 = vector.broadcast %251 : vector<8x1xf32> to vector<8x8xf32>
    %253 = arith.mulf %248, %252 : vector<8x8xf32>
    %254 = arith.mulf %253, %102 : vector<8x8xf32>
    %cst_68 = arith.constant dense<0.000000e+00> : vector<8xf32>
    %255 = vector.multi_reduction <add>, %254, %cst_68 [1] : vector<8x8xf32> to vector<8xf32>
    %256 = vector.shape_cast %255 : vector<8xf32> to vector<8x1xf32>
    %c0_69 = arith.constant 0 : index
    %c3 = arith.constant 3 : index
    %257 = vector.load %arg18[%c0_69, %c3] : memref<8x32xf32, #tpu.memory_space<vmem>>, vector<8x1xf32>
    tpu.vector_store %arg18[%c0_69, %c3], %256 {strides = array<i32>} : memref<8x32xf32, #tpu.memory_space<vmem>>, vector<8x1xf32>,
    %258 = arith.mulf %253, %103 : vector<8x8xf32>
    %cst_70 = arith.constant dense<0.000000e+00> : vector<8xf32>
    %259 = vector.multi_reduction <add>, %258, %cst_70 [1] : vector<8x8xf32> to vector<8xf32>
    %260 = vector.shape_cast %259 : vector<8xf32> to vector<8x1xf32>
    %c0_71 = arith.constant 0 : index
    %c11 = arith.constant 11 : index
    %261 = vector.load %arg18[%c0_71, %c11] : memref<8x32xf32, #tpu.memory_space<vmem>>, vector<8x1xf32>
    tpu.vector_store %arg18[%c0_71, %c11], %260 {strides = array<i32>} : memref<8x32xf32, #tpu.memory_space<vmem>>, vector<8x1xf32>,
    %262 = arith.mulf %253, %104 : vector<8x8xf32>
    %cst_72 = arith.constant dense<0.000000e+00> : vector<8xf32>
    %263 = vector.multi_reduction <add>, %262, %cst_72 [1] : vector<8x8xf32> to vector<8xf32>
    %264 = vector.shape_cast %263 : vector<8xf32> to vector<8x1xf32>
    %c0_73 = arith.constant 0 : index
    %c19 = arith.constant 19 : index
    %265 = vector.load %arg18[%c0_73, %c19] : memref<8x32xf32, #tpu.memory_space<vmem>>, vector<8x1xf32>
    tpu.vector_store %arg18[%c0_73, %c19], %264 {strides = array<i32>} : memref<8x32xf32, #tpu.memory_space<vmem>>, vector<8x1xf32>,
    %266 = arith.mulf %253, %105 : vector<8x8xf32>
    %cst_74 = arith.constant dense<0.000000e+00> : vector<8xf32>
    %267 = vector.multi_reduction <add>, %266, %cst_74 [1] : vector<8x8xf32> to vector<8xf32>
    %268 = vector.shape_cast %267 : vector<8xf32> to vector<8x1xf32>
    %c0_75 = arith.constant 0 : index
    %c27 = arith.constant 27 : index
    %269 = vector.load %arg18[%c0_75, %c27] : memref<8x32xf32, #tpu.memory_space<vmem>>, vector<8x1xf32>
    tpu.vector_store %arg18[%c0_75, %c27], %268 {strides = array<i32>} : memref<8x32xf32, #tpu.memory_space<vmem>>, vector<8x1xf32>,
    %270 = vector.extract_strided_slice %83 {offsets = [0, 4], sizes = [8, 1], strides = [1, 1]} : vector<8x32xf32> to vector<8x1xf32>
    %271 = vector.broadcast %270 : vector<8x1xf32> to vector<8x8xf32>
    %272 = arith.mulf %271, %98 : vector<8x8xf32>
    %273 = vector.extract_strided_slice %83 {offsets = [0, 12], sizes = [8, 1], strides = [1, 1]} : vector<8x32xf32> to vector<8x1xf32>
    %274 = vector.broadcast %273 : vector<8x1xf32> to vector<8x8xf32>
    %275 = arith.mulf %274, %99 : vector<8x8xf32>
    %276 = arith.addf %272, %275 : vector<8x8xf32>
    %277 = vector.extract_strided_slice %83 {offsets = [0, 20], sizes = [8, 1], strides = [1, 1]} : vector<8x32xf32> to vector<8x1xf32>
    %278 = vector.broadcast %277 : vector<8x1xf32> to vector<8x8xf32>
    %279 = arith.mulf %278, %100 : vector<8x8xf32>
    %280 = arith.addf %276, %279 : vector<8x8xf32>
    %281 = vector.extract_strided_slice %83 {offsets = [0, 28], sizes = [8, 1], strides = [1, 1]} : vector<8x32xf32> to vector<8x1xf32>
    %282 = vector.broadcast %281 : vector<8x1xf32> to vector<8x8xf32>
    %283 = arith.mulf %282, %101 : vector<8x8xf32>
    %284 = arith.addf %280, %283 : vector<8x8xf32>
    %cst_76 = arith.constant dense<0xFF800000> : vector<8xf32>
    %285 = vector.multi_reduction <maximumf>, %284, %cst_76 [1] : vector<8x8xf32> to vector<8xf32>
    %286 = vector.shape_cast %285 : vector<8xf32> to vector<8x1xf32>
    %287 = vector.broadcast %286 : vector<8x1xf32> to vector<8x8xf32>
    %288 = arith.subf %284, %287 : vector<8x8xf32>
    %289 = math.exp %288 : vector<8x8xf32>
    %cst_77 = arith.constant dense<0.000000e+00> : vector<8xf32>
    %290 = vector.multi_reduction <add>, %289, %cst_77 [1] : vector<8x8xf32> to vector<8xf32>
    %291 = vector.shape_cast %290 : vector<8xf32> to vector<8x1xf32>
    %292 = tpu.reciprocal %291 {approx = true} : vector<8x1xf32> -> vector<8x1xf32>
    %293 = vector.broadcast %292 : vector<8x1xf32> to vector<8x8xf32>
    %294 = arith.mulf %289, %293 : vector<8x8xf32>
    %295 = arith.mulf %294, %102 : vector<8x8xf32>
    %cst_78 = arith.constant dense<0.000000e+00> : vector<8xf32>
    %296 = vector.multi_reduction <add>, %295, %cst_78 [1] : vector<8x8xf32> to vector<8xf32>
    %297 = vector.shape_cast %296 : vector<8xf32> to vector<8x1xf32>
    %c0_79 = arith.constant 0 : index
    %c4 = arith.constant 4 : index
    %298 = vector.load %arg18[%c0_79, %c4] : memref<8x32xf32, #tpu.memory_space<vmem>>, vector<8x1xf32>
    tpu.vector_store %arg18[%c0_79, %c4], %297 {strides = array<i32>} : memref<8x32xf32, #tpu.memory_space<vmem>>, vector<8x1xf32>,
    %299 = arith.mulf %294, %103 : vector<8x8xf32>
    %cst_80 = arith.constant dense<0.000000e+00> : vector<8xf32>
    %300 = vector.multi_reduction <add>, %299, %cst_80 [1] : vector<8x8xf32> to vector<8xf32>
    %301 = vector.shape_cast %300 : vector<8xf32> to vector<8x1xf32>
    %c0_81 = arith.constant 0 : index
    %c12 = arith.constant 12 : index
    %302 = vector.load %arg18[%c0_81, %c12] : memref<8x32xf32, #tpu.memory_space<vmem>>, vector<8x1xf32>
    tpu.vector_store %arg18[%c0_81, %c12], %301 {strides = array<i32>} : memref<8x32xf32, #tpu.memory_space<vmem>>, vector<8x1xf32>,
    %303 = arith.mulf %294, %104 : vector<8x8xf32>
    %cst_82 = arith.constant dense<0.000000e+00> : vector<8xf32>
    %304 = vector.multi_reduction <add>, %303, %cst_82 [1] : vector<8x8xf32> to vector<8xf32>
    %305 = vector.shape_cast %304 : vector<8xf32> to vector<8x1xf32>
    %c0_83 = arith.constant 0 : index
    %c20 = arith.constant 20 : index
    %306 = vector.load %arg18[%c0_83, %c20] : memref<8x32xf32, #tpu.memory_space<vmem>>, vector<8x1xf32>
    tpu.vector_store %arg18[%c0_83, %c20], %305 {strides = array<i32>} : memref<8x32xf32, #tpu.memory_space<vmem>>, vector<8x1xf32>,
    %307 = arith.mulf %294, %105 : vector<8x8xf32>
    %cst_84 = arith.constant dense<0.000000e+00> : vector<8xf32>
    %308 = vector.multi_reduction <add>, %307, %cst_84 [1] : vector<8x8xf32> to vector<8xf32>
    %309 = vector.shape_cast %308 : vector<8xf32> to vector<8x1xf32>
    %c0_85 = arith.constant 0 : index
    %c28 = arith.constant 28 : index
    %310 = vector.load %arg18[%c0_85, %c28] : memref<8x32xf32, #tpu.memory_space<vmem>>, vector<8x1xf32>
    tpu.vector_store %arg18[%c0_85, %c28], %309 {strides = array<i32>} : memref<8x32xf32, #tpu.memory_space<vmem>>, vector<8x1xf32>,
    %311 = vector.extract_strided_slice %83 {offsets = [0, 5], sizes = [8, 1], strides = [1, 1]} : vector<8x32xf32> to vector<8x1xf32>
    %312 = vector.broadcast %311 : vector<8x1xf32> to vector<8x8xf32>
    %313 = arith.mulf %312, %98 : vector<8x8xf32>
    %314 = vector.extract_strided_slice %83 {offsets = [0, 13], sizes = [8, 1], strides = [1, 1]} : vector<8x32xf32> to vector<8x1xf32>
    %315 = vector.broadcast %314 : vector<8x1xf32> to vector<8x8xf32>
    %316 = arith.mulf %315, %99 : vector<8x8xf32>
    %317 = arith.addf %313, %316 : vector<8x8xf32>
    %318 = vector.extract_strided_slice %83 {offsets = [0, 21], sizes = [8, 1], strides = [1, 1]} : vector<8x32xf32> to vector<8x1xf32>
    %319 = vector.broadcast %318 : vector<8x1xf32> to vector<8x8xf32>
    %320 = arith.mulf %319, %100 : vector<8x8xf32>
    %321 = arith.addf %317, %320 : vector<8x8xf32>
    %322 = vector.extract_strided_slice %83 {offsets = [0, 29], sizes = [8, 1], strides = [1, 1]} : vector<8x32xf32> to vector<8x1xf32>
    %323 = vector.broadcast %322 : vector<8x1xf32> to vector<8x8xf32>
    %324 = arith.mulf %323, %101 : vector<8x8xf32>
    %325 = arith.addf %321, %324 : vector<8x8xf32>
    %cst_86 = arith.constant dense<0xFF800000> : vector<8xf32>
    %326 = vector.multi_reduction <maximumf>, %325, %cst_86 [1] : vector<8x8xf32> to vector<8xf32>
    %327 = vector.shape_cast %326 : vector<8xf32> to vector<8x1xf32>
    %328 = vector.broadcast %327 : vector<8x1xf32> to vector<8x8xf32>
    %329 = arith.subf %325, %328 : vector<8x8xf32>
    %330 = math.exp %329 : vector<8x8xf32>
    %cst_87 = arith.constant dense<0.000000e+00> : vector<8xf32>
    %331 = vector.multi_reduction <add>, %330, %cst_87 [1] : vector<8x8xf32> to vector<8xf32>
    %332 = vector.shape_cast %331 : vector<8xf32> to vector<8x1xf32>
    %333 = tpu.reciprocal %332 {approx = true} : vector<8x1xf32> -> vector<8x1xf32>
    %334 = vector.broadcast %333 : vector<8x1xf32> to vector<8x8xf32>
    %335 = arith.mulf %330, %334 : vector<8x8xf32>
    %336 = arith.mulf %335, %102 : vector<8x8xf32>
    %cst_88 = arith.constant dense<0.000000e+00> : vector<8xf32>
    %337 = vector.multi_reduction <add>, %336, %cst_88 [1] : vector<8x8xf32> to vector<8xf32>
    %338 = vector.shape_cast %337 : vector<8xf32> to vector<8x1xf32>
    %c0_89 = arith.constant 0 : index
    %c5 = arith.constant 5 : index
    %339 = vector.load %arg18[%c0_89, %c5] : memref<8x32xf32, #tpu.memory_space<vmem>>, vector<8x1xf32>
    tpu.vector_store %arg18[%c0_89, %c5], %338 {strides = array<i32>} : memref<8x32xf32, #tpu.memory_space<vmem>>, vector<8x1xf32>,
    %340 = arith.mulf %335, %103 : vector<8x8xf32>
    %cst_90 = arith.constant dense<0.000000e+00> : vector<8xf32>
    %341 = vector.multi_reduction <add>, %340, %cst_90 [1] : vector<8x8xf32> to vector<8xf32>
    %342 = vector.shape_cast %341 : vector<8xf32> to vector<8x1xf32>
    %c0_91 = arith.constant 0 : index
    %c13 = arith.constant 13 : index
    %343 = vector.load %arg18[%c0_91, %c13] : memref<8x32xf32, #tpu.memory_space<vmem>>, vector<8x1xf32>
    tpu.vector_store %arg18[%c0_91, %c13], %342 {strides = array<i32>} : memref<8x32xf32, #tpu.memory_space<vmem>>, vector<8x1xf32>,
    %344 = arith.mulf %335, %104 : vector<8x8xf32>
    %cst_92 = arith.constant dense<0.000000e+00> : vector<8xf32>
    %345 = vector.multi_reduction <add>, %344, %cst_92 [1] : vector<8x8xf32> to vector<8xf32>
    %346 = vector.shape_cast %345 : vector<8xf32> to vector<8x1xf32>
    %c0_93 = arith.constant 0 : index
    %c21 = arith.constant 21 : index
    %347 = vector.load %arg18[%c0_93, %c21] : memref<8x32xf32, #tpu.memory_space<vmem>>, vector<8x1xf32>
    tpu.vector_store %arg18[%c0_93, %c21], %346 {strides = array<i32>} : memref<8x32xf32, #tpu.memory_space<vmem>>, vector<8x1xf32>,
    %348 = arith.mulf %335, %105 : vector<8x8xf32>
    %cst_94 = arith.constant dense<0.000000e+00> : vector<8xf32>
    %349 = vector.multi_reduction <add>, %348, %cst_94 [1] : vector<8x8xf32> to vector<8xf32>
    %350 = vector.shape_cast %349 : vector<8xf32> to vector<8x1xf32>
    %c0_95 = arith.constant 0 : index
    %c29 = arith.constant 29 : index
    %351 = vector.load %arg18[%c0_95, %c29] : memref<8x32xf32, #tpu.memory_space<vmem>>, vector<8x1xf32>
    tpu.vector_store %arg18[%c0_95, %c29], %350 {strides = array<i32>} : memref<8x32xf32, #tpu.memory_space<vmem>>, vector<8x1xf32>,
    %352 = vector.extract_strided_slice %83 {offsets = [0, 6], sizes = [8, 1], strides = [1, 1]} : vector<8x32xf32> to vector<8x1xf32>
    %353 = vector.broadcast %352 : vector<8x1xf32> to vector<8x8xf32>
    %354 = arith.mulf %353, %98 : vector<8x8xf32>
    %355 = vector.extract_strided_slice %83 {offsets = [0, 14], sizes = [8, 1], strides = [1, 1]} : vector<8x32xf32> to vector<8x1xf32>
    %356 = vector.broadcast %355 : vector<8x1xf32> to vector<8x8xf32>
    %357 = arith.mulf %356, %99 : vector<8x8xf32>
    %358 = arith.addf %354, %357 : vector<8x8xf32>
    %359 = vector.extract_strided_slice %83 {offsets = [0, 22], sizes = [8, 1], strides = [1, 1]} : vector<8x32xf32> to vector<8x1xf32>
    %360 = vector.broadcast %359 : vector<8x1xf32> to vector<8x8xf32>
    %361 = arith.mulf %360, %100 : vector<8x8xf32>
    %362 = arith.addf %358, %361 : vector<8x8xf32>
    %363 = vector.extract_strided_slice %83 {offsets = [0, 30], sizes = [8, 1], strides = [1, 1]} : vector<8x32xf32> to vector<8x1xf32>
    %364 = vector.broadcast %363 : vector<8x1xf32> to vector<8x8xf32>
    %365 = arith.mulf %364, %101 : vector<8x8xf32>
    %366 = arith.addf %362, %365 : vector<8x8xf32>
    %cst_96 = arith.constant dense<0xFF800000> : vector<8xf32>
    %367 = vector.multi_reduction <maximumf>, %366, %cst_96 [1] : vector<8x8xf32> to vector<8xf32>
    %368 = vector.shape_cast %367 : vector<8xf32> to vector<8x1xf32>
    %369 = vector.broadcast %368 : vector<8x1xf32> to vector<8x8xf32>
    %370 = arith.subf %366, %369 : vector<8x8xf32>
    %371 = math.exp %370 : vector<8x8xf32>
    %cst_97 = arith.constant dense<0.000000e+00> : vector<8xf32>
    %372 = vector.multi_reduction <add>, %371, %cst_97 [1] : vector<8x8xf32> to vector<8xf32>
    %373 = vector.shape_cast %372 : vector<8xf32> to vector<8x1xf32>
    %374 = tpu.reciprocal %373 {approx = true} : vector<8x1xf32> -> vector<8x1xf32>
    %375 = vector.broadcast %374 : vector<8x1xf32> to vector<8x8xf32>
    %376 = arith.mulf %371, %375 : vector<8x8xf32>
    %377 = arith.mulf %376, %102 : vector<8x8xf32>
    %cst_98 = arith.constant dense<0.000000e+00> : vector<8xf32>
    %378 = vector.multi_reduction <add>, %377, %cst_98 [1] : vector<8x8xf32> to vector<8xf32>
    %379 = vector.shape_cast %378 : vector<8xf32> to vector<8x1xf32>
    %c0_99 = arith.constant 0 : index
    %c6 = arith.constant 6 : index
    %380 = vector.load %arg18[%c0_99, %c6] : memref<8x32xf32, #tpu.memory_space<vmem>>, vector<8x1xf32>
    tpu.vector_store %arg18[%c0_99, %c6], %379 {strides = array<i32>} : memref<8x32xf32, #tpu.memory_space<vmem>>, vector<8x1xf32>,
    %381 = arith.mulf %376, %103 : vector<8x8xf32>
    %cst_100 = arith.constant dense<0.000000e+00> : vector<8xf32>
    %382 = vector.multi_reduction <add>, %381, %cst_100 [1] : vector<8x8xf32> to vector<8xf32>
    %383 = vector.shape_cast %382 : vector<8xf32> to vector<8x1xf32>
    %c0_101 = arith.constant 0 : index
    %c14 = arith.constant 14 : index
    %384 = vector.load %arg18[%c0_101, %c14] : memref<8x32xf32, #tpu.memory_space<vmem>>, vector<8x1xf32>
    tpu.vector_store %arg18[%c0_101, %c14], %383 {strides = array<i32>} : memref<8x32xf32, #tpu.memory_space<vmem>>, vector<8x1xf32>,
    %385 = arith.mulf %376, %104 : vector<8x8xf32>
    %cst_102 = arith.constant dense<0.000000e+00> : vector<8xf32>
    %386 = vector.multi_reduction <add>, %385, %cst_102 [1] : vector<8x8xf32> to vector<8xf32>
    %387 = vector.shape_cast %386 : vector<8xf32> to vector<8x1xf32>
    %c0_103 = arith.constant 0 : index
    %c22 = arith.constant 22 : index
    %388 = vector.load %arg18[%c0_103, %c22] : memref<8x32xf32, #tpu.memory_space<vmem>>, vector<8x1xf32>
    tpu.vector_store %arg18[%c0_103, %c22], %387 {strides = array<i32>} : memref<8x32xf32, #tpu.memory_space<vmem>>, vector<8x1xf32>,
    %389 = arith.mulf %376, %105 : vector<8x8xf32>
    %cst_104 = arith.constant dense<0.000000e+00> : vector<8xf32>
    %390 = vector.multi_reduction <add>, %389, %cst_104 [1] : vector<8x8xf32> to vector<8xf32>
    %391 = vector.shape_cast %390 : vector<8xf32> to vector<8x1xf32>
    %c0_105 = arith.constant 0 : index
    %c30 = arith.constant 30 : index
    %392 = vector.load %arg18[%c0_105, %c30] : memref<8x32xf32, #tpu.memory_space<vmem>>, vector<8x1xf32>
    tpu.vector_store %arg18[%c0_105, %c30], %391 {strides = array<i32>} : memref<8x32xf32, #tpu.memory_space<vmem>>, vector<8x1xf32>,
    %393 = vector.extract_strided_slice %83 {offsets = [0, 7], sizes = [8, 1], strides = [1, 1]} : vector<8x32xf32> to vector<8x1xf32>
    %394 = vector.broadcast %393 : vector<8x1xf32> to vector<8x8xf32>
    %395 = arith.mulf %394, %98 : vector<8x8xf32>
    %396 = vector.extract_strided_slice %83 {offsets = [0, 15], sizes = [8, 1], strides = [1, 1]} : vector<8x32xf32> to vector<8x1xf32>
    %397 = vector.broadcast %396 : vector<8x1xf32> to vector<8x8xf32>
    %398 = arith.mulf %397, %99 : vector<8x8xf32>
    %399 = arith.addf %395, %398 : vector<8x8xf32>
    %400 = vector.extract_strided_slice %83 {offsets = [0, 23], sizes = [8, 1], strides = [1, 1]} : vector<8x32xf32> to vector<8x1xf32>
    %401 = vector.broadcast %400 : vector<8x1xf32> to vector<8x8xf32>
    %402 = arith.mulf %401, %100 : vector<8x8xf32>
    %403 = arith.addf %399, %402 : vector<8x8xf32>
    %404 = vector.extract_strided_slice %83 {offsets = [0, 31], sizes = [8, 1], strides = [1, 1]} : vector<8x32xf32> to vector<8x1xf32>
    %405 = vector.broadcast %404 : vector<8x1xf32> to vector<8x8xf32>
    %406 = arith.mulf %405, %101 : vector<8x8xf32>
    %407 = arith.addf %403, %406 : vector<8x8xf32>
    %cst_106 = arith.constant dense<0xFF800000> : vector<8xf32>
    %408 = vector.multi_reduction <maximumf>, %407, %cst_106 [1] : vector<8x8xf32> to vector<8xf32>
    %409 = vector.shape_cast %408 : vector<8xf32> to vector<8x1xf32>
    %410 = vector.broadcast %409 : vector<8x1xf32> to vector<8x8xf32>
    %411 = arith.subf %407, %410 : vector<8x8xf32>
    %412 = math.exp %411 : vector<8x8xf32>
    %cst_107 = arith.constant dense<0.000000e+00> : vector<8xf32>
    %413 = vector.multi_reduction <add>, %412, %cst_107 [1] : vector<8x8xf32> to vector<8xf32>
    %414 = vector.shape_cast %413 : vector<8xf32> to vector<8x1xf32>
    %415 = tpu.reciprocal %414 {approx = true} : vector<8x1xf32> -> vector<8x1xf32>
    %416 = vector.broadcast %415 : vector<8x1xf32> to vector<8x8xf32>
    %417 = arith.mulf %412, %416 : vector<8x8xf32>
    %418 = arith.mulf %417, %102 : vector<8x8xf32>
    %cst_108 = arith.constant dense<0.000000e+00> : vector<8xf32>
    %419 = vector.multi_reduction <add>, %418, %cst_108 [1] : vector<8x8xf32> to vector<8xf32>
    %420 = vector.shape_cast %419 : vector<8xf32> to vector<8x1xf32>
    %c0_109 = arith.constant 0 : index
    %c7 = arith.constant 7 : index
    %421 = vector.load %arg18[%c0_109, %c7] : memref<8x32xf32, #tpu.memory_space<vmem>>, vector<8x1xf32>
    tpu.vector_store %arg18[%c0_109, %c7], %420 {strides = array<i32>} : memref<8x32xf32, #tpu.memory_space<vmem>>, vector<8x1xf32>,
    %422 = arith.mulf %417, %103 : vector<8x8xf32>
    %cst_110 = arith.constant dense<0.000000e+00> : vector<8xf32>
    %423 = vector.multi_reduction <add>, %422, %cst_110 [1] : vector<8x8xf32> to vector<8xf32>
    %424 = vector.shape_cast %423 : vector<8xf32> to vector<8x1xf32>
    %c0_111 = arith.constant 0 : index
    %c15 = arith.constant 15 : index
    %425 = vector.load %arg18[%c0_111, %c15] : memref<8x32xf32, #tpu.memory_space<vmem>>, vector<8x1xf32>
    tpu.vector_store %arg18[%c0_111, %c15], %424 {strides = array<i32>} : memref<8x32xf32, #tpu.memory_space<vmem>>, vector<8x1xf32>,
    %426 = arith.mulf %417, %104 : vector<8x8xf32>
    %cst_112 = arith.constant dense<0.000000e+00> : vector<8xf32>
    %427 = vector.multi_reduction <add>, %426, %cst_112 [1] : vector<8x8xf32> to vector<8xf32>
    %428 = vector.shape_cast %427 : vector<8xf32> to vector<8x1xf32>
    %c0_113 = arith.constant 0 : index
    %c23 = arith.constant 23 : index
    %429 = vector.load %arg18[%c0_113, %c23] : memref<8x32xf32, #tpu.memory_space<vmem>>, vector<8x1xf32>
    tpu.vector_store %arg18[%c0_113, %c23], %428 {strides = array<i32>} : memref<8x32xf32, #tpu.memory_space<vmem>>, vector<8x1xf32>,
    %430 = arith.mulf %417, %105 : vector<8x8xf32>
    %cst_114 = arith.constant dense<0.000000e+00> : vector<8xf32>
    %431 = vector.multi_reduction <add>, %430, %cst_114 [1] : vector<8x8xf32> to vector<8xf32>
    %432 = vector.shape_cast %431 : vector<8xf32> to vector<8x1xf32>
    %c0_115 = arith.constant 0 : index
    %c31 = arith.constant 31 : index
    %433 = vector.load %arg18[%c0_115, %c31] : memref<8x32xf32, #tpu.memory_space<vmem>>, vector<8x1xf32>
    tpu.vector_store %arg18[%c0_115, %c31], %432 {strides = array<i32>} : memref<8x32xf32, #tpu.memory_space<vmem>>, vector<8x1xf32>,
    %c0_116 = arith.constant 0 : index
    %c0_117 = arith.constant 0 : index
    %434 = vector.load %arg18[%c0_116, %c0_117] : memref<8x32xf32, #tpu.memory_space<vmem>>, vector<8x32xf32>
    %435 = arith.truncf %434 : vector<8x32xf32> to vector<8x32xbf16>
    %c0_118 = arith.constant 0 : index
    %c0_119 = arith.constant 0 : index
    %c0_120 = arith.constant 0 : index
    %436 = vector.load %arg9[%c0_118, %c0_119, %c0_120] : memref<1x32x32xbf16, #tpu.memory_space<vmem>>, vector<1x32x32xbf16>
    %437 = vector.shape_cast %436 : vector<1x32x32xbf16> to vector<32x32xbf16>
    %cst_121 = arith.constant dense<0.000000e+00> : vector<8x32xf32>
    %438 = tpu.matmul %435, %437, %cst_121 {dimension_numbers = #tpu.dot_dimension_numbers<[1], [0], [0], [1], [0, 0, 1, 1], [], []>} : vector<8x32xbf16>, vector<32x32xbf16>, vector<8x32xf32> -> vector<8x32xf32>
    %439 = arith.addf %5, %438 : vector<8x32xf32>
    %440 = vector.extract_strided_slice %4 {offsets = [11, 0], sizes = [1, 32], strides = [1, 1]} : vector<13x32xf32> to vector<1x32xf32>
    %441 = vector.broadcast %440 : vector<1x32xf32> to vector<8x32xf32>
    %442 = arith.addf %439, %441 : vector<8x32xf32>
    %443 = vector.extract_strided_slice %4 {offsets = [6, 0], sizes = [1, 32], strides = [1, 1]} : vector<13x32xf32> to vector<1x32xf32>
    %444 = vector.extract_strided_slice %4 {offsets = [7, 0], sizes = [1, 32], strides = [1, 1]} : vector<13x32xf32> to vector<1x32xf32>
    %cst_122 = arith.constant dense<0.000000e+00> : vector<8xf32>
    %445 = vector.multi_reduction <add>, %442, %cst_122 [1] : vector<8x32xf32> to vector<8xf32>
    %446 = vector.shape_cast %445 : vector<8xf32> to vector<8x1xf32>
    %cst_123 = arith.constant 3.200000e+01 : f32
    %447 = vector.broadcast %cst_123 : f32 to vector<8x1xf32>
    %448 = arith.divf %446, %447 : vector<8x1xf32>
    %449 = vector.broadcast %448 : vector<8x1xf32> to vector<8x32xf32>
    %450 = arith.subf %442, %449 : vector<8x32xf32>
    %451 = arith.mulf %450, %450 : vector<8x32xf32>
    %cst_124 = arith.constant dense<0.000000e+00> : vector<8xf32>
    %452 = vector.multi_reduction <add>, %451, %cst_124 [1] : vector<8x32xf32> to vector<8xf32>
    %453 = vector.shape_cast %452 : vector<8xf32> to vector<8x1xf32>
    %cst_125 = arith.constant 0.0322580636 : f32
    %454 = vector.broadcast %cst_125 : f32 to vector<8x1xf32>
    %455 = arith.mulf %453, %454 : vector<8x1xf32>
    %456 = math.sqrt %455 : vector<8x1xf32>
    %cst_126 = arith.constant 9.99999997E-7 : f32
    %457 = vector.broadcast %cst_126 : f32 to vector<8x1xf32>
    %458 = arith.addf %456, %457 : vector<8x1xf32>
    %459 = tpu.reciprocal %458 {approx = true} : vector<8x1xf32> -> vector<8x1xf32>
    %460 = vector.broadcast %459 : vector<8x1xf32> to vector<8x32xf32>
    %461 = arith.mulf %450, %460 : vector<8x32xf32>
    %462 = vector.broadcast %443 : vector<1x32xf32> to vector<8x32xf32>
    %463 = arith.mulf %462, %461 : vector<8x32xf32>
    %464 = vector.broadcast %444 : vector<1x32xf32> to vector<8x32xf32>
    %465 = arith.addf %463, %464 : vector<8x32xf32>
    %466 = arith.truncf %465 : vector<8x32xf32> to vector<8x32xbf16>
    %c0_127 = arith.constant 0 : index
    %c0_128 = arith.constant 0 : index
    %c0_129 = arith.constant 0 : index
    %467 = vector.load %arg10[%c0_127, %c0_128, %c0_129] : memref<1x32x2048xbf16, #tpu.memory_space<vmem>>, vector<1x32x2048xbf16>
    %468 = vector.shape_cast %467 : vector<1x32x2048xbf16> to vector<32x2048xbf16>
    %cst_130 = arith.constant dense<0.000000e+00> : vector<8x2048xf32>
    %469 = tpu.matmul %466, %468, %cst_130 {dimension_numbers = #tpu.dot_dimension_numbers<[1], [0], [0], [1], [0, 0, 1, 1], [], []>} : vector<8x32xbf16>, vector<32x2048xbf16>, vector<8x2048xf32> -> vector<8x2048xf32>
    %c0_131 = arith.constant 0 : index
    %c0_132 = arith.constant 0 : index
    %c0_133 = arith.constant 0 : index
    %470 = vector.load %arg11[%c0_131, %c0_132, %c0_133] : memref<1x1x2048xf32, #tpu.memory_space<vmem>>, vector<1x1x2048xf32>
    %471 = vector.shape_cast %470 : vector<1x1x2048xf32> to vector<1x2048xf32>
    %472 = vector.broadcast %471 : vector<1x2048xf32> to vector<8x2048xf32>
    %473 = arith.addf %469, %472 : vector<8x2048xf32>
    %cst_134 = arith.constant 0.000000e+00 : f32
    %474 = vector.broadcast %cst_134 : f32 to vector<8x2048xf32>
    %475 = arith.maximumf %473, %474 : vector<8x2048xf32>
    %476 = arith.truncf %475 : vector<8x2048xf32> to vector<8x2048xbf16>
    %c0_135 = arith.constant 0 : index
    %c0_136 = arith.constant 0 : index
    %c0_137 = arith.constant 0 : index
    %477 = vector.load %arg12[%c0_135, %c0_136, %c0_137] : memref<1x2048x32xbf16, #tpu.memory_space<vmem>>, vector<1x2048x32xbf16>
    %478 = vector.shape_cast %477 : vector<1x2048x32xbf16> to vector<2048x32xbf16>
    %cst_138 = arith.constant dense<0.000000e+00> : vector<8x32xf32>
    %479 = tpu.matmul %476, %478, %cst_138 {dimension_numbers = #tpu.dot_dimension_numbers<[1], [0], [0], [1], [0, 0, 1, 1], [], []>} : vector<8x2048xbf16>, vector<2048x32xbf16>, vector<8x32xf32> -> vector<8x32xf32>
    %480 = arith.addf %442, %479 : vector<8x32xf32>
    %481 = vector.extract_strided_slice %4 {offsets = [12, 0], sizes = [1, 32], strides = [1, 1]} : vector<13x32xf32> to vector<1x32xf32>
    %482 = vector.broadcast %481 : vector<1x32xf32> to vector<8x32xf32>
    %483 = arith.addf %480, %482 : vector<8x32xf32>
    %c0_139 = arith.constant 0 : index
    %c0_140 = arith.constant 0 : index
    %484 = vector.load %arg17[%c0_139, %c0_140] : memref<8x32xf32, #tpu.memory_space<vmem>>, vector<8x32xf32>
    tpu.vector_store %arg17[%c0_139, %c0_140], %483 {strides = array<i32>} : memref<8x32xf32, #tpu.memory_space<vmem>>, vector<8x32xf32>,
    %c1_i32 = arith.constant 1 : i32
    %485 = arith.cmpi eq, %arg1, %c1_i32 : i32
    %486 = arith.extui %485 : i1 to i32
    %c0_i32_141 = arith.constant 0 : i32
    %487 = arith.cmpi ne, %486, %c0_i32_141 : i32
    scf.if %487 {
      %c0_142 = arith.constant 0 : index
      %c0_143 = arith.constant 0 : index
      %488 = vector.load %arg13[%c0_142, %c0_143] : memref<2x32xf32, #tpu.memory_space<vmem>>, vector<1x32xf32>
      %c1_144 = arith.constant 1 : index
      %c0_145 = arith.constant 0 : index
      %489 = vector.load %arg13[%c1_144, %c0_145] : memref<2x32xf32, #tpu.memory_space<vmem>>, vector<1x32xf32>
      %cst_146 = arith.constant dense<0.000000e+00> : vector<8xf32>
      %490 = vector.multi_reduction <add>, %483, %cst_146 [1] : vector<8x32xf32> to vector<8xf32>
      %491 = vector.shape_cast %490 : vector<8xf32> to vector<8x1xf32>
      %cst_147 = arith.constant 3.200000e+01 : f32
      %492 = vector.broadcast %cst_147 : f32 to vector<8x1xf32>
      %493 = arith.divf %491, %492 : vector<8x1xf32>
      %494 = vector.broadcast %493 : vector<8x1xf32> to vector<8x32xf32>
      %495 = arith.subf %483, %494 : vector<8x32xf32>
      %496 = arith.mulf %495, %495 : vector<8x32xf32>
      %cst_148 = arith.constant dense<0.000000e+00> : vector<8xf32>
      %497 = vector.multi_reduction <add>, %496, %cst_148 [1] : vector<8x32xf32> to vector<8xf32>
      %498 = vector.shape_cast %497 : vector<8xf32> to vector<8x1xf32>
      %cst_149 = arith.constant 0.0322580636 : f32
      %499 = vector.broadcast %cst_149 : f32 to vector<8x1xf32>
      %500 = arith.mulf %498, %499 : vector<8x1xf32>
      %501 = math.sqrt %500 : vector<8x1xf32>
      %cst_150 = arith.constant 9.99999997E-7 : f32
      %502 = vector.broadcast %cst_150 : f32 to vector<8x1xf32>
      %503 = arith.addf %501, %502 : vector<8x1xf32>
      %504 = tpu.reciprocal %503 {approx = true} : vector<8x1xf32> -> vector<8x1xf32>
      %505 = vector.broadcast %504 : vector<8x1xf32> to vector<8x32xf32>
      %506 = arith.mulf %495, %505 : vector<8x32xf32>
      %507 = vector.broadcast %488 : vector<1x32xf32> to vector<8x32xf32>
      %508 = arith.mulf %507, %506 : vector<8x32xf32>
      %509 = vector.broadcast %489 : vector<1x32xf32> to vector<8x32xf32>
      %510 = arith.addf %508, %509 : vector<8x32xf32>
      %511 = arith.truncf %510 : vector<8x32xf32> to vector<8x32xbf16>
      %c0_151 = arith.constant 0 : index
      %c0_152 = arith.constant 0 : index
      %512 = vector.load %arg14[%c0_151, %c0_152] : memref<32x2432xbf16, #tpu.memory_space<vmem>>, vector<32x2432xbf16>
      %cst_153 = arith.constant dense<0.000000e+00> : vector<8x2432xf32>
      %513 = tpu.matmul %511, %512, %cst_153 {dimension_numbers = #tpu.dot_dimension_numbers<[1], [0], [0], [1], [0, 0, 1, 1], [], []>} : vector<8x32xbf16>, vector<32x2432xbf16>, vector<8x2432xf32> -> vector<8x2432xf32>
      %c0_154 = arith.constant 0 : index
      %c0_155 = arith.constant 0 : index
      %514 = vector.load %arg15[%c0_154, %c0_155] : memref<1x2432xf32, #tpu.memory_space<vmem>>, vector<1x2432xf32>
      %515 = vector.broadcast %514 : vector<1x2432xf32> to vector<8x2432xf32>
      %516 = arith.addf %513, %515 : vector<8x2432xf32>
      %c0_156 = arith.constant 0 : index
      %c0_157 = arith.constant 0 : index
      %517 = vector.load %arg16[%c0_156, %c0_157] : memref<8x2432xf32, #tpu.memory_space<vmem>>, vector<8x2432xf32>
      tpu.vector_store %arg16[%c0_156, %c0_157], %516 {strides = array<i32>} : memref<8x2432xf32, #tpu.memory_space<vmem>>, vector<8x2432xf32>,
    } else {
    }
    return
  }
  func.func @transform_0(%arg0: i32, %arg1: i32) -> (i32, i32) {
    %c0_i32 = arith.constant 0 : i32
    %c0_i32_0 = arith.constant 0 : i32
    return %arg0, %c0_i32 : i32, i32
  }
  func.func @transform_1(%arg0: i32, %arg1: i32) -> (i32, i32) {
    %c0_i32 = arith.constant 0 : i32
    %c0_i32_0 = arith.constant 0 : i32
    return %arg0, %c0_i32 : i32, i32
  }
  func.func @transform_2(%arg0: i32, %arg1: i32) -> (i32, i32) {
    %c0_i32 = arith.constant 0 : i32
    %c0_i32_0 = arith.constant 0 : i32
    return %arg0, %c0_i32 : i32, i32
  }
  func.func @transform_3(%arg0: i32, %arg1: i32) -> (i32, i32, i32) {
    %c0_i32 = arith.constant 0 : i32
    %c0_i32_0 = arith.constant 0 : i32
    %c0_i32_1 = arith.constant 0 : i32
    return %arg1, %c0_i32, %c0_i32_0 : i32, i32, i32
  }
  func.func @transform_4(%arg0: i32, %arg1: i32) -> (i32, i32, i32) {
    %c0_i32 = arith.constant 0 : i32
    %c0_i32_0 = arith.constant 0 : i32
    %c0_i32_1 = arith.constant 0 : i32
    return %arg1, %c0_i32, %c0_i32_0 : i32, i32, i32
  }
  func.func @transform_5(%arg0: i32, %arg1: i32) -> (i32, i32, i32) {
    %c0_i32 = arith.constant 0 : i32
    %c0_i32_0 = arith.constant 0 : i32
    %c0_i32_1 = arith.constant 0 : i32
    return %arg1, %c0_i32, %c0_i32_0 : i32, i32, i32
  }
  func.func @transform_6(%arg0: i32, %arg1: i32) -> (i32, i32, i32) {
    %c0_i32 = arith.constant 0 : i32
    %c0_i32_0 = arith.constant 0 : i32
    %c0_i32_1 = arith.constant 0 : i32
    return %arg1, %c0_i32, %c0_i32_0 : i32, i32, i32
  }
  func.func @transform_7(%arg0: i32, %arg1: i32) -> (i32, i32, i32) {
    %c0_i32 = arith.constant 0 : i32
    %c0_i32_0 = arith.constant 0 : i32
    %c0_i32_1 = arith.constant 0 : i32
    return %arg1, %c0_i32, %c0_i32_0 : i32, i32, i32
  }
  func.func @transform_8(%arg0: i32, %arg1: i32) -> (i32, i32, i32) {
    %c0_i32 = arith.constant 0 : i32
    %c0_i32_0 = arith.constant 0 : i32
    %c0_i32_1 = arith.constant 0 : i32
    return %arg1, %c0_i32, %c0_i32_0 : i32, i32, i32
  }
  func.func @transform_9(%arg0: i32, %arg1: i32) -> (i32, i32, i32) {
    %c0_i32 = arith.constant 0 : i32
    %c0_i32_0 = arith.constant 0 : i32
    %c0_i32_1 = arith.constant 0 : i32
    return %arg1, %c0_i32, %c0_i32_0 : i32, i32, i32
  }
  func.func @transform_10(%arg0: i32, %arg1: i32) -> (i32, i32, i32) {
    %c0_i32 = arith.constant 0 : i32
    %c0_i32_0 = arith.constant 0 : i32
    %c0_i32_1 = arith.constant 0 : i32
    return %arg1, %c0_i32, %c0_i32_0 : i32, i32, i32
  }
  func.func @transform_11(%arg0: i32, %arg1: i32) -> (i32, i32) {
    %c0_i32 = arith.constant 0 : i32
    %c0_i32_0 = arith.constant 0 : i32
    %c0_i32_1 = arith.constant 0 : i32
    return %c0_i32, %c0_i32_0 : i32, i32
  }
  func.func @transform_12(%arg0: i32, %arg1: i32) -> (i32, i32) {
    %c0_i32 = arith.constant 0 : i32
    %c0_i32_0 = arith.constant 0 : i32
    %c0_i32_1 = arith.constant 0 : i32
    return %c0_i32, %c0_i32_0 : i32, i32
  }
  func.func @transform_13(%arg0: i32, %arg1: i32) -> (i32, i32) {
    %c0_i32 = arith.constant 0 : i32
    %c0_i32_0 = arith.constant 0 : i32
    %c0_i32_1 = arith.constant 0 : i32
    return %c0_i32, %c0_i32_0 : i32, i32
  }
  func.func @transform_14(%arg0: i32, %arg1: i32) -> (i32, i32) {
    %c0_i32 = arith.constant 0 : i32
    %c0_i32_0 = arith.constant 0 : i32
    return %arg0, %c0_i32 : i32, i32
  }
}

</mosaic_0001>

<bundles_post_ra>
// kernel: tpu_custom_call.1
= control target key start
LH: loop header
LB: loop body
LE: loop exit
PB: predicated region body
PF: predicated region fallthrough
CT: control target
= control target key end

     0   :  { %s6704_s0 = inlined_call_operand.vmem [shape: f32[16,32], index: 0, kind: input, shape index: {}]   ;;  %s6705_s1 = inlined_call_operand.vmem [shape: f32[16,32], index: 1, kind: input, shape index: {}]   ;;  %s6706_s2 = inlined_call_operand.vmem [shape: f32[16,32], index: 2, kind: input, shape index: {}]   ;;  %s6707_s3 = inlined_call_operand.vmem [shape: f32[2,13,32], index: 3, kind: input, shape index: {}]   ;;  %s6708_s4 = inlined_call_operand.vmem [shape: bf16[2,32,32], index: 4, kind: input, shape index: {}]   ;;  %s6709_s5 = inlined_call_operand.vmem [shape: bf16[2,32,32], index: 5, kind: input, shape index: {}]   ;;  %s6710_s6 = inlined_call_operand.vmem [shape: bf16[2,32,32], index: 6, kind: input, shape index: {}]   ;;  %s6711_s7 = inlined_call_operand.vmem [shape: bf16[2,32,32], index: 7, kind: input, shape index: {}]   ;;  %s6712_s8 = inlined_call_operand.vmem [shape: bf16[2,32,2048], index: 8, kind: input, shape index: {}]   ;;  %s6713_s9 = inlined_call_operand.vmem [shape: f32[2,1,2048], index: 9, kind: input, shape index: {}]   ;;  %s6714_s10 = inlined_call_operand.vmem [shape: bf16[2,2048,32], index: 10, kind: input, shape index: {}]   ;;  %s6715_s11 = inlined_call_operand.vmem [shape: f32[2,32], index: 11, kind: input, shape index: {}]   ;;  %s6716_s12 = inlined_call_operand.vmem [shape: bf16[32,2432], index: 12, kind: input, shape index: {}]   ;;  %s6717_s13 = inlined_call_operand.vmem [shape: f32[1,2432], index: 13, kind: input, shape index: {}]   ;;  %s6718_s14 = inlined_call_operand.hbm [shape: f32[16,2432], index: 14, kind: output, shape index: {}]  }
   0x1   :  { %6736 = sst [smem:[#allocation19_spill]] %s6704_s0 }
   0x2   :  { %6737 = sst [smem:[#allocation20_spill]] %s6705_s1 }
   0x3   :  { %6738 = sst [smem:[#allocation21_spill]] %s6706_s2 }
   0x4   :  { %6739 = sst [smem:[#allocation22_spill]] %s6707_s3 }
   0x5   :  { %6740 = sst [smem:[#allocation23_spill]] %s6708_s4 }
   0x6   :  { %6741 = sst [smem:[#allocation24_spill]] %s6709_s5 }
   0x7   :  { %6742 = sst [smem:[#allocation25_spill]] %s6715_s11 }
   0x8   :  { %6743 = sst [smem:[#allocation26_spill]] %s6716_s12 }
   0x9   :  { %6744 = sst [smem:[#allocation27_spill]] %s6717_s13 }
   0xa   :  { %6745 = sst [smem:[#allocation28_spill]] %s6718_s14 }
   0xb   :  { %19 = vsyncpa [#allocation5], 0 }
   0xc   :  { %21 = vsyncpa [#allocation5 + $0x1], 0  ;;  %s5731_s29 = smov 0   ;;  %s5733_s30 = smov 0  }
   0xd   :  { %s5735_s15 = smov 0   ;;  %s5737_s16 = smov 0  }
   0xe   :  { %s5739_s17 = smov 0   ;;  %s5741_s18 = smov 0  }
   0xf   :  { %s5743_s19 = smov 0   ;;  %s5745_s20 = smov 0  }
  0x10 LB: > { %6746 = sst [smem:[#allocation7_spill]] %s5585_s29  ;;  %s4629_s21 = sadd.s32 4294967295, %s5613_s20   ;;  %s5613_s20 = sphi %s5745_s20, %s27_s20   ;;  %s5609_s19 = sphi %s5743_s19, %s6784_s19   ;;  %s5605_s18 = sphi %s5741_s18, %s6783_s18   ;;  %s5601_s17 = sphi %s5739_s17, %s6782_s17   ;;  %s5597_s16 = sphi %s5737_s16, %s6781_s16   ;;  %s5593_s15 = sphi %s5735_s15, %s6780_s15   ;;  %s5589_s30 = sphi %s5733_s30, %s6779_s30   ;;  %s5585_s29 = sphi %s5731_s29, %s6778_s29  }
  0x11   : > { %6747 = sst [smem:[#allocation8_spill]] %s5589_s30  ;;  %s4630_s22 = sadd.s32 4294967294, %s5613_s20  }
  0x12   : > { %6748 = sst [smem:[#allocation9_spill]] %s5593_s15  ;;  %s36_s23 = sadd.s32 1, %s5605_s18 }
  0x13   : > { %6749 = sst [smem:[#allocation10_spill]] %s5601_s17  ;;  %p37_p0 = scmp.ge.s32.totalorder %s36_s23, 2 }
  0x14   : > { %6750 = sst [smem:[#allocation11_spill]] %s5605_s18  ;;  %s39_s24 = sadd.s32 1, %s5609_s19 }
  0x15   : > { %6751 = sst [smem:[#allocation12_spill]] %s5609_s19  ;;  %p405_p1 = scmp.ne.s32.totalorder %s5593_s15, %s5589_s30 }
  0x16   : > { %6752 = sst [smem:[#allocation13_spill]] %s5613_s20  ;;  %p406_p2 = scmp.eq.s32.totalorder %s4629_s21, 3 }
  0x17   : > { %s6786_s23 = smov (%p37_p0, %s36_s23), 0  ;;  %s6788_s24 = smov (!%p37_p0, %s39_s24), %s5609_s19 }
  0x18   : > { %6753 = sst [smem:[#allocation14_spill]] %s6786_s23  ;;  %p5780_p3 = por %p406_p2, %p405_p1 }
  0x19   : > { %p411_p4 = scmp.ne.s32.totalorder %s5589_s30, %s5585_s29  ;;  %p41_p5 = scmp.ge.s32.totalorder %s6788_s24, 2 }
  0x1a   : > { %s6754_s25 = scalar_select %p5780_p3, 1, 0 }
  0x1b   : > { %p412_p6 = scmp.eq.s32.totalorder %s4630_s22, 3  ;;  %p4633_p7 = scmp.ge.s32.totalorder %s5613_s20, 1 }
  0x1c   : > { %6755 = sst [smem:[#allocation15_spill]] %s6754_s25  ;;  %p523_p8 = scmp.lt.s32.totalorder %s5613_s20, 5 }
  0x1d   : > { %s6790_s24 = smov (%p41_p5, %s6788_s24), 0  ;;  %p5790_p9 = por %p412_p6, %p411_p4 }
  0x1e   : > { %6756 = sst [smem:[#allocation16_spill]] %s6790_s24  ;;  %p524_p10 = pnand %p4633_p7, %p523_p8 }
  0x1f   : > { %s6757_s26 = scalar_select %p5790_p9, 1, 0 }
  0x20   : > { %s392_s27 = ssub.s32 %s5609_s19, %s6790_s24  ;;  %s395_s28 = sadd.s32 1, %s5593_s15 }
  0x21   : > { %6758 = sst [smem:[#allocation17_spill]] %s6757_s26  ;;  %p393_p11 = scmp.eq.s32.totalorder %s392_s27, 0 }
  0x22   : > { %527 = sbr.rel (%p524_p10) target bundleno = 3141 (0xc45), region = 76  ;;  %s6733_s22 = sand.u32 (!%p524_p10), 1, %s5589_s30  }
  0x23   : > { %s5798_s21 = scalar_select %p393_p11, %s5593_s15, %s395_s28  }
  0x24   : > { %p615_p12 = scmp.lt.s32.totalorder (!%p524_p10), %s5601_s17, 1  ;;  %s5125_s23 = smul.u32 (!%p524_p10), 152, %s6733_s22 }
  0x25   : > { %6759 = sst [smem:[#allocation18_spill]] %s5798_s21  ;;  %p627_p13 = scmp.lt.s32.totalorder (!%p524_p10), %s5597_s16, 1 }
  0x26   : > { %s6760_s0 = sld [smem:[#allocation19_spill]] (!%p524_p10)  ;;  %s6761_s1 = sld [smem:[#allocation20_spill]] (!%p524_p10) }
  0x27   : > { %s6762_s2 = sld [smem:[#allocation21_spill]] (!%p524_p10)  ;;  %s6763_s3 = sld [smem:[#allocation22_spill]] (!%p524_p10) }
  0x28   : > { %s6764_s4 = sld [smem:[#allocation23_spill]] (!%p524_p10)  ;;  %s6765_s5 = sld [smem:[#allocation24_spill]] (!%p524_p10) }
  0x29   : > { %s616_s18 = scalar_select %p615_p12, %s5601_s17, 1 }
  0x2a   : > { %s628_s25 = scalar_select %p627_p13, %s5597_s16, 1 }
  0x2b   : > { %s4634_s26 = sshll.u32 %s616_s18, 3  ;;  %p4652_p0 = scmp.ne.s32.totalorder %s5597_s16, 0 }
  0x2c   : > { %s618_s27 = scalar_lea.vmem %s6760_s0, %s4634_s26  ;;  %s622_s21 = scalar_lea.vmem %s6761_s1, %s4634_s26  ;;  %vm672_vm0 = vcmask (!%p4652_p0), 261120  }
  0x2d   : > { %s626_s14 = scalar_lea.vmem %s6762_s2, %s4634_s26  ;;  %s4887_s13 = sshll.u32 %s628_s25, 4 }
  0x2e   : > { %s4892_s11 = sshll.u32 %s628_s25, 8  ;;  %s5819_s17 = scalar_lea.vmem %s6763_s3, %s4887_s13  ;;  %v671_v0 = vld [vmem:[%s626_s14] sm:$0xff] (!%p4652_p0) }
  0x2f   : > { %s5824_s29 = scalar_lea.vmem %s6764_s4, %s4887_s13  ;;  %s5829_s28 = scalar_lea.vmem %s6765_s5, %s4887_s13  ;;  %673 = vst.msk [vmem:[#allocation2] sm:$0xff] (!%p4652_p0), %vm672_vm0, %v671_v0 }
  0x30   : > { %s5834_s26 = scalar_lea.vmem %s6710_s6, %s4887_s13  ;;  %s5839_s30 = scalar_lea.vmem %s6711_s7, %s4887_s13 }
  0x31   : > { %s5844_s12 = scalar_lea.vmem %s6712_s8, %s4892_s11  ;;  %s5849_s24 = scalar_lea.vmem %s6713_s9, %s4887_s13 }
  0x32   : > { %s4893_s19 = sshll.u32 %s628_s25, 10  ;;  %s5856_s5 = scalar_lea.vmem [#allocation4], %s5125_s23 }
  0x33   : > { %s5854_s20 = scalar_lea.vmem %s6714_s10, %s4893_s19  ;;  %670 = sbr.rel (%p4652_p0) target bundleno = 58 (0x3a), region = 80 }
  0x3a PF: > { %v677_v1 = vld [vmem:[%s618_s27] sm:$0xff]  ;;  %vm678_vm1 = vcmask 261120   ;;  %v5615_v19 = vmov 0.0   ;;  %v5272_v20 = vld [vmem:[%s5824_s29 + $0x8] sm:$0xff]   ;;  %vm5616_vm2 = vmmov 0   ;;  %v700_v38 = vlaneseq  ;;  %s5649_s0 = smov 112  }
  0x3b   : > { %v710_v2 = vld [vmem:[%s622_s21] sm:$0xff]  ;;  %v679_v3 = vsel %vm678_vm1, %v677_v1, 0.0  ;;  %5085 = vmatprep.subr.bf16.mxu0 %v5615_v19  ;;  %5093 = vmatprep.subr.bf16.mxu1 %v5615_v19  ;;  %v5274_v21 = vld [vmem:[%s5829_s28 + $0x8] sm:$0xff]   ;;  %s5650_s1 = smov 120   ;;  %s5651_s2 = smov 104   ;;  %vm999_vm9 = vcmask 64512  }
  0x3c   : > { %v711_v4 = vsel %vm678_vm1, %v710_v2, 0.0  ;;  %680 = vadd.xlane.f32.xlu0 %v679_v3  ;;  %v676_v5 = vld [vmem:[#allocation2] sm:$0xff]  ;;  %5089 = vmatprep.mubr.msk.bf16.mxu0 %vm5616_vm2, %v5615_v19  ;;  %v5891_v43 = vshrl.u32 %v700_v38, 7  ;;  %v5276_v0 = vld [vmem:[%s5834_s26 + $0x8] sm:$0xff]   ;;  %v5624_v38 = vmov 17   ;;  %vm1015_vm10 = vcmask 7168  }
  0x3d   : > { %v741_v6 = vsel %vm678_vm1, %v676_v5, 0.0  ;;  %v5271_v17 = vld [vmem:[%s5824_s29] sm:$0xff]   ;;  %5097 = vmatprep.mubr.msk.bf16.mxu1 %vm5616_vm2, %v5615_v19  ;;  %vm1025_vm11 = vcmask 72768   ;;  %vm1034_vm12 = vcmask 138368   ;;  %vm1043_vm13 = vcmask 203968   ;;  %p4833_p1 = scmp.ne.s32.totalorder %s5597_s16, 1 }
  0x3e   : > { %v5273_v18 = vld [vmem:[%s5829_s28] sm:$0xff]   ;;  %5086 = vmatpush3.bf16.msra.mxu0 %v5271_v17  ;;  %v5894_v45 = vsub.s32 0, %v5891_v43  ;;  %v5898_v47 = vsub.s32 1, %v5891_v43  ;;  %v5902_v49 = vsub.s32 2, %v5891_v43  ;;  %v5907_v53 = vsub.s32 3, %v5891_v43  ;;  %s6766_s11 = sld [smem:[#allocation26_spill]] (!%p4833_p1) }
  0x3f   : > { %5094 = vmatpush3.bf16.msra.mxu1 %v5273_v18  ;;  %5087 = vmatprep.subr.bf16.mxu0 %v5615_v19  ;;  %v674_v46 = vld [vmem:[%s5819_s17] sm:$0xff]  ;;  %vm1095_vm14 = vcmask 15368   ;;  %vm1101_vm15 = vcmask 80968   ;;  %vm1107_vm0 = vcmask 146568  }
  0x40   : > { %712 = vadd.xlane.f32.xlu0 %v711_v4  ;;  %5095 = vmatprep.subr.bf16.mxu1 %v5615_v19  ;;  %v703_v48 = vrot.slane %v674_v46, %v5894_v45  ;;  %v708_v52 = vrot.slane %v674_v46, %v5898_v47  ;;  %v734_v55 = vrot.slane %v674_v46, %v5902_v49  ;;  %v5275_v60 = vld [vmem:[%s5834_s26] sm:$0xff]  }
  0x41   : > { %v739_v59 = vrot.slane %v674_v46, %v5907_v53 }
  0x42   : > { %5088 = vmatpush3.bf16.msra.mxu0 %v5272_v20  ;;  %v5617_v20 = vmov 16  }
  0x43   : > { %5101 = vmatprep.subr.bf16.mxu0 %v5615_v19  ;;  %5096 = vmatpush3.bf16.msra.mxu1 %v5274_v21  ;;  %v5618_v21 = vmov 8  }
  0x44   : > { %742 = vadd.xlane.f32.xlu0 %v741_v6  ;;  %5109 = vmatprep.subr.bf16.mxu1 %v5615_v19 }
  0x45   : > { %5239 = vset.pattern.permute.xlu1 %v5617_v20  ;;  %5238 = vset.pattern.permute.xlu0 %v5618_v21 }
  0xc9   : > { %v681_v7 = vpop.xlane.xlu0 %680 }
  0xca   : > { %v683_v8 = vmul.f32 0.03125, %v681_v7 }
  0xcc   : > { %v5862_v9 = vsub.f32 %v677_v1, %v683_v8 }
  0xcd   : > { %v713_v10 = vpop.xlane.xlu0 %712 }
  0xce   : > { %v714_v11 = vmul.f32 0.03125, %v713_v10  ;;  %v685_v12 = vmul.f32 %v5862_v9, %v5862_v9  ;;  %v5922_v10 = vsub.s32 4, %v5891_v43 }
  0xd0   : > { %v5866_v13 = vsub.f32 %v710_v2, %v714_v11  ;;  %v686_v14 = vsel %vm678_vm1, %v685_v12, 0.0  ;;  %v5925_v11 = vsub.s32 5, %v5891_v43  ;;  %v764_v12 = vrot.slane %v674_v46, %v5922_v10 }
  0xd1   : > { %687 = vadd.xlane.f32.xlu1 %v686_v14  ;;  %v743_v22 = vpop.xlane.xlu0 %742 }
  0xd2   : > { %v716_v15 = vmul.f32 %v5866_v13, %v5866_v13  ;;  %v744_v23 = vmul.f32 0.03125, %v743_v22  ;;  %v5619_v22 = vmov 0  }
  0xd4   : > { %v717_v16 = vsel %vm678_vm1, %v716_v15, 0.0  ;;  %v5886_v24 = vsub.f32 %v676_v5, %v744_v23  ;;  %v769_v15 = vrot.slane %v674_v46, %v5925_v11  ;;  %v5933_v23 = vld [vmem:[%s5819_s17 + $0x8] sm:$0x1f]  ;;  %v5630_v46 = vmov 18  }
  0xd5   : > { %718 = vadd.xlane.f32.xlu1 %v717_v16 }
  0xd6   : > { %v746_v25 = vmul.f32 %v5886_v24, %v5886_v24 }
  0xd8   : > { %v747_v26 = vsel %vm678_vm1, %v746_v25, 0.0  ;;  %v779_v25 = vrot.slane %v5933_v23, %v5894_v45 }
  0xd9   : > { %748 = vadd.xlane.f32.xlu1 %v747_v26 }
 0x15e   : > { %v688_v27 = vpop.xlane.xlu1 %687 }
 0x15f   : > { %v689_v28 = vmul.f32 0.032258064, %v688_v27 }
 0x161   : > { %5407 = vrsqrt.f32 %v689_v28  ;;  %vm692_vm3 = vcmp.eq.f32.partialorder %v689_v28, inf  ;;  %v695_v33 = vand.u32 2147483648, %v689_v28  ;;  %vm694_vm4 = vcmp.eq.f32.partialorder %v689_v28, 0.0 }
 0x162   : > { %v719_v29 = vpop.xlane.xlu1 %718 }
 0x163   : > { %v720_v30 = vmul.f32 0.032258064, %v719_v29 }
 0x165   : > { %5409 = vrsqrt.f32 %v720_v30  ;;  %vm723_vm5 = vcmp.eq.f32.partialorder %v720_v30, inf  ;;  %v726_v37 = vand.u32 2147483648, %v720_v30  ;;  %vm725_vm6 = vcmp.eq.f32.partialorder %v720_v30, 0.0 }
 0x166   : > { %v749_v2 = vpop.xlane.xlu1 %748 }
 0x167   : > { %v750_v3 = vmul.f32 0.032258064, %v749_v2  ;;  %v5643_v2 = vmov 1  }
 0x169   : > { %vm753_vm7 = vcmp.eq.f32.partialorder %v750_v3, inf  ;;  %v756_v5 = vand.u32 2147483648, %v750_v3  ;;  %vm755_vm8 = vcmp.eq.f32.partialorder %v750_v3, 0.0 }
 0x16b   : > { %v5408_v31 = vpop.eup %5407 }
 0x16c   : > { %v691_v32 = vmul.f32 %v5408_v31, %v689_v28 }
 0x16e   : > { %v693_v34 = vsel %vm692_vm3, %v689_v28, %v691_v32  ;;  %vm1165_vm3 = vcmask 23568  }
 0x16f   : > { %v5410_v35 = vpop.eup %5409  ;;  %v696_v36 = vsel %vm694_vm4, %v695_v33, %v693_v34  ;;  %v5620_v34 = vmov 24   ;;  %vm1171_vm4 = vcmask 89168  }
 0x170   : > { %v697_v39 = vadd.f32 1e-06, %v696_v36  ;;  %v722_v40 = vmul.f32 %v5410_v35, %v720_v30  ;;  %v5621_v35 = vmov 11   ;;  %v5622_v36 = vmov 9  }
 0x172   : > { %5411 = vrcp.f32 %v697_v39  ;;  %v724_v41 = vsel %vm723_vm5, %v720_v30, %v722_v40  ;;  %v5625_v39 = vmov 13   ;;  %v5626_v40 = vmov 25  }
 0x173   : > { %v727_v42 = vsel %vm725_vm6, %v726_v37, %v724_v41  ;;  %v5623_v37 = vmov 12   ;;  %v5627_v41 = vmov 14   ;;  %vm1177_vm5 = vcmask 154768  }
 0x174   : > { %v728_v44 = vadd.f32 1e-06, %v727_v42  ;;  %v5628_v42 = vmov 10   ;;  %vm1183_vm6 = vcmask 220368  }
 0x176   : > { %5413 = vrcp.f32 %v728_v44  ;;  %v5629_v44 = vmov 15  }
 0x177   : > { %5415 = vrsqrt.f32 %v750_v3 }
 0x17c   : > { %v5412_v50 = vpop.eup %5411 }
 0x17d   : > { %v699_v51 = vmul.f32 %v5412_v50, %v5862_v9  ;;  %v5632_v50 = vmov 3  }
 0x17f   : > { %v704_v54 = vmul.f32 %v703_v48, %v699_v51  ;;  %v5631_v48 = vmov 26   ;;  %v5633_v51 = vmov 19  }
 0x180   : > { %v5414_v56 = vpop.eup %5413 }
 0x181   : > { %v709_v57 = vadd.f32 %v708_v52, %v704_v54  ;;  %v730_v58 = vmul.f32 %v5414_v56, %v5866_v13  ;;  %v5416_v4 = vpop.eup %5415  ;;  %v5634_v52 = vmov 31   ;;  %v5635_v54 = vmov 27  }
 0x182   : > { %v752_v6 = vmul.f32 %v5416_v4, %v750_v3  ;;  %v5637_v56 = vmov 28   ;;  %v5645_v4 = vmov 4  }
 0x183   : > { %v771_v61 = vpack.c.bf16 %v709_v57, %v709_v57  ;;  %v735_v62 = vmul.f32 %v734_v55, %v730_v58  ;;  %v5636_v55 = vmov 20   ;;  %v5638_v57 = vmov 21  }
 0x184   : > { %v754_v7 = vsel %vm753_vm7, %v750_v3, %v752_v6  ;;  %v5639_v58 = vmov 29   ;;  %v5644_v3 = vmov 2   ;;  %v5647_v6 = vmov 6  }
 0x185   : > { %5090 = vmatmul.mubr.msk.bf16.vlgmr.msra.gmra.mrb[0].mxu0 %vm678_vm1, %v771_v61  ;;  %v740_v63 = vadd.f32 %v739_v59, %v735_v62  ;;  %v757_v8 = vsel %vm755_vm8, %v756_v5, %v754_v7  ;;  %v5640_v61 = vmov 22   ;;  %v5646_v5 = vmov 5  }
 0x186   : > { %5102 = vmatpush3.bf16.msra.mxu0 %v5275_v60  ;;  %5105 = vmatprep.mubr.msk.bf16.mxu0 %vm5616_vm2, %v5615_v19  ;;  %v758_v9 = vadd.f32 1e-06, %v757_v8  ;;  %v5648_v7 = vmov 7   ;;  %v843_v8 = vrot.slane %v5933_v23, %v5898_v47  ;;  %vm1235_vm7 = vcmask 31768  }
 0x187   : > { %v835_v1 = vpack.c.bf16 %v740_v63, %v740_v63  ;;  %5103 = vmatprep.subr.bf16.mxu0 %v5615_v19  ;;  %vm1241_vm8 = vcmask 97368  }
 0x188   : > { %5417 = vrcp.f32 %v758_v9 }
 0x189   : > { %5098 = vmatmul.mubr.msk.bf16.vlgmr.msra.gmra.mrb[0].mxu1 %vm678_vm1, %v835_v1  ;;  %v5642_v1 = vmov 23  }
 0x18a   : > { %5104 = vmatpush3.bf16.msra.mxu0 %v5276_v0  ;;  %5113 = vmatprep.mubr.msk.bf16.mxu1 %vm5616_vm2, %v5615_v19  ;;  %v5641_v0 = vmov 30   ;;  %vm1113_vm2 = vcmask 212168  }
 0x192   : > { %v5418_v13 = vpop.eup %5417 }
 0x193   : > { %v760_v14 = vmul.f32 %v5418_v13, %v5886_v24 }
 0x195   : > { %v765_v16 = vmul.f32 %v764_v12, %v760_v14 }
 0x197   : > { %v770_v17 = vadd.f32 %v769_v15, %v765_v16 }
 0x199   : > { %v899_v18 = vpack.c.bf16 %v770_v17, %v770_v17 }
 0x19b   : > { %5106 = vmatmul.mubr.msk.bf16.vlgmr.msra.gmra.mrb[4].mxu0 %vm678_vm1, %v899_v18 }
 0x19c   : > { %1944 = vmatprep.mubr.bf16.mxu0 %v5619_v22 }
 0x258   : > { %v829_v24 = vpop.f32.mrb[0].mxu0 }
 0x259   : > { %v5937_v26 = vadd.f32 %v829_v24, %v779_v25  ;;  %v5091_v27 = vpop.f32.mrb[1].mxu0 }
 0x25a   : > { %v832_v28 = vpop.f32.mrb[2].mxu0 }
 0x25b   : > { %980 = vperm.xlu1 %5239, %v5937_v26   ;;  %970 = vperm.xlu0 %5238, %v5937_v26   ;;  %v5092_v29 = vpop.f32.mrb[3].mxu0 }
 0x25c   : > { %v5941_v30 = vpop.f32.mrb[0].mxu1 }
 0x25d   : > { %v5099_v31 = vpop.f32.mrb[1].mxu1  ;;  %v5979_v9 = vadd.f32 %v5941_v30, %v843_v8 }
 0x25e   : > { %v896_v32 = vpop.f32.mrb[2].mxu1 }
 0x25f   : > { %v5100_v33 = vpop.f32.mrb[3].mxu1  ;;  %5240 = vset.pattern.permute.xlu1 %v5620_v34  ;;  %5247 = vset.pattern.permute.xlu0 %v5621_v35 }
 0x260   : > { %990 = vperm.xlu1 %5240, %v5937_v26   ;;  %1191 = vperm.xlu0 %5247, %v5937_v26  }
 0x264   : > { %5241 = vset.pattern.permute.xlu1 %v5622_v36  ;;  %5250 = vset.pattern.permute.xlu0 %v5623_v37 }
 0x265   : > { %1051 = vperm.xlu1 %5241, %v5937_v26   ;;  %1261 = vperm.xlu0 %5250, %v5937_v26  }
 0x269   : > { %5242 = vset.pattern.permute.xlu1 %v5624_v38  ;;  %5253 = vset.pattern.permute.xlu0 %v5625_v39 }
 0x26a   : > { %1061 = vperm.xlu1 %5242, %v5937_v26   ;;  %1331 = vperm.xlu0 %5253, %v5937_v26  }
 0x26e   : > { %5243 = vset.pattern.permute.xlu1 %v5626_v40  ;;  %5256 = vset.pattern.permute.xlu0 %v5627_v41  ;;  %v5964_v59 = vpop.f32.mrb[4].mxu0 }
 0x26f   : > { %1071 = vperm.xlu1 %5243, %v5937_v26   ;;  %1401 = vperm.xlu0 %5256, %v5937_v26   ;;  %v5107_v60 = vpop.f32.mrb[5].mxu0 }
 0x270   : > { %v960_v62 = vpop.f32.mrb[6].mxu0 }
 0x271   : > { %v5108_v63 = vpop.f32.mrb[7].mxu0 }
 0x273   : > { %5244 = vset.pattern.permute.xlu1 %v5628_v42  ;;  %5259 = vset.pattern.permute.xlu0 %v5629_v44 }
 0x274   : > { %1121 = vperm.xlu1 %5244, %v5937_v26   ;;  %1471 = vperm.xlu0 %5259, %v5937_v26  }
 0x278   : > { %5245 = vset.pattern.permute.xlu1 %v5630_v46  ;;  %5262 = vset.pattern.permute.xlu0 %v5619_v22 }
 0x279   : > { %1131 = vperm.xlu1 %5245, %v5937_v26   ;;  %965 = vperm.xlu0 %5262, %v5937_v26  }
 0x27d   : > { %5246 = vset.pattern.permute.xlu1 %v5631_v48  ;;  %5265 = vset.pattern.permute.xlu0 %v5632_v50 }
 0x27e   : > { %1141 = vperm.xlu1 %5246, %v5937_v26   ;;  %1186 = vperm.xlu0 %5265, %v5937_v26  }
 0x282   : > { %5248 = vset.pattern.permute.xlu1 %v5633_v51  ;;  %5270 = vset.pattern.permute.xlu0 %v5634_v52 }
 0x283   : > { %1201 = vperm.xlu1 %5248, %v5937_v26  }
 0x287   : > { %5249 = vset.pattern.permute.xlu1 %v5635_v54 }
 0x288   : > { %1211 = vperm.xlu1 %5249, %v5937_v26  }
 0x28c   : > { %5251 = vset.pattern.permute.xlu1 %v5636_v55 }
 0x28d   : > { %1271 = vperm.xlu1 %5251, %v5937_v26  }
 0x291   : > { %5252 = vset.pattern.permute.xlu1 %v5637_v56 }
 0x292   : > { %1281 = vperm.xlu1 %5252, %v5937_v26  }
 0x296   : > { %5254 = vset.pattern.permute.xlu1 %v5638_v57 }
 0x297   : > { %1341 = vperm.xlu1 %5254, %v5937_v26  }
 0x29b   : > { %5255 = vset.pattern.permute.xlu1 %v5639_v58 }
 0x29c   : > { %1351 = vperm.xlu1 %5255, %v5937_v26  }
 0x2a0   : > { %5257 = vset.pattern.permute.xlu1 %v5640_v61 }
 0x2a1   : > { %1411 = vperm.xlu1 %5257, %v5937_v26  }
 0x2a5   : > { %5258 = vset.pattern.permute.xlu1 %v5641_v0 }
 0x2a6   : > { %1421 = vperm.xlu1 %5258, %v5937_v26  }
 0x2aa   : > { %5260 = vset.pattern.permute.xlu1 %v5642_v1 }
 0x2ab   : > { %1481 = vperm.xlu1 %5260, %v5937_v26  }
 0x2af   : > { %5261 = vset.pattern.permute.xlu1 %v5634_v52 }
 0x2b0   : > { %1491 = vperm.xlu1 %5261, %v5937_v26  }
 0x2b4   : > { %5263 = vset.pattern.permute.xlu1 %v5643_v2 }
 0x2b5   : > { %1046 = vperm.xlu1 %5263, %v5937_v26  }
 0x2b9   : > { %5264 = vset.pattern.permute.xlu1 %v5644_v3 }
 0x2ba   : > { %1116 = vperm.xlu1 %5264, %v5937_v26  }
 0x2be   : > { %5266 = vset.pattern.permute.xlu1 %v5645_v4 }
 0x2bf   : > { %1256 = vperm.xlu1 %5266, %v5937_v26  }
 0x2c3   : > { %5267 = vset.pattern.permute.xlu1 %v5646_v5 }
 0x2c4   : > { %1326 = vperm.xlu1 %5267, %v5937_v26  }
 0x2c8   : > { %5268 = vset.pattern.permute.xlu1 %v5647_v6 }
 0x2c9   : > { %1396 = vperm.xlu1 %5268, %v5937_v26  }
 0x2cd   : > { %5269 = vset.pattern.permute.xlu1 %v5648_v7 }
 0x2ce   : > { %1466 = vperm.xlu1 %5269, %v5937_v26  }
 0x2da   : > { %v981_v12 = vpop.permute.xlu1 %980  ;;  %v971_v13 = vpop.permute.xlu0 %970 }
 0x2db   : > { %v983_v14 = vmul.f32 %v981_v12, %v5979_v9  ;;  %v973_v15 = vmul.f32 %v971_v13, %v5979_v9 }
 0x2dd   : > { %985 = vrot.lane.b32.xlu1 %v983_v14, %s5649_s0  ;;  %975 = vrot.lane.b32.xlu0 %v973_v15, %s5650_s1 }
 0x2df   : > { %v991_v16 = vpop.permute.xlu1 %990  ;;  %v1192_v27 = vpop.permute.xlu0 %1191 }
 0x2e0   : > { %v993_v17 = vmul.f32 %v991_v16, %v5979_v9  ;;  %v1194_v31 = vmul.f32 %v1192_v27, %v5979_v9 }
 0x2e2   : > { %995 = vrot.lane.b32.xlu1 %v993_v17, %s5651_s2 }
 0x2e4   : > { %v1052_v18 = vpop.permute.xlu1 %1051  ;;  %v1262_v30 = vpop.permute.xlu0 %1261 }
 0x2e5   : > { %v1054_v20 = vmul.f32 %v1052_v18, %v5979_v9  ;;  %v1264_v34 = vmul.f32 %v1262_v30, %v5979_v9 }
 0x2e7   : > { %1056 = vrot.lane.b32.xlu1 %v1054_v20, %s5650_s1 }
 0x2e9   : > { %v1062_v21 = vpop.permute.xlu1 %1061  ;;  %v1332_v35 = vpop.permute.xlu0 %1331 }
 0x2ea   : > { %v1064_v25 = vmul.f32 %v1062_v21, %v5979_v9  ;;  %v1334_v38 = vmul.f32 %v1332_v35, %v5979_v9 }
 0x2ec   : > { %1066 = vrot.lane.b32.xlu0 %v1064_v25, %s5649_s0 }
 0x2ee   : > { %v1072_v24 = vpop.permute.xlu1 %1071  ;;  %v1402_v54 = vpop.permute.xlu0 %1401 }
 0x2ef   : > { %v1074_v26 = vmul.f32 %v1072_v24, %v5979_v9  ;;  %v1404_v55 = vmul.f32 %v1402_v54, %v5979_v9 }
 0x2f1   : > { %1076 = vrot.lane.b32.xlu0 %v1074_v26, %s5651_s2 }
 0x2f3   : > { %v1122_v28 = vpop.permute.xlu1 %1121  ;;  %v1472_v61 = vpop.permute.xlu0 %1471 }
 0x2f4   : > { %v1124_v29 = vmul.f32 %v1122_v28, %v5979_v9  ;;  %v1474_v62 = vmul.f32 %v1472_v61, %v5979_v9 }
 0x2f6   : > { %1126 = vrot.lane.b32.xlu1 %v1124_v29, %s5650_s1 }
 0x2f8   : > { %v1132_v32 = vpop.permute.xlu1 %1131  ;;  %v966_v12 = vpop.permute.xlu0 %965 }
 0x2f9   : > { %v1134_v33 = vmul.f32 %v1132_v32, %v5979_v9  ;;  %v968_v16 = vmul.f32 %v966_v12, %v5979_v9 }
 0x2fa   : > { %1196 = vrot.lane.b32.xlu1 %v1194_v31, %s5650_s1 }
 0x2fb   : > { %1136 = vrot.lane.b32.xlu0 %v1134_v33, %s5649_s0 }
 0x2fd   : > { %v1142_v36 = vpop.permute.xlu1 %1141  ;;  %v1187_v14 = vpop.permute.xlu0 %1186 }
 0x2fe   : > { %v1144_v37 = vmul.f32 %v1142_v36, %v5979_v9  ;;  %1266 = vrot.lane.b32.xlu1 %v1264_v34, %s5650_s1 }
 0x300   : > { %1146 = vrot.lane.b32.xlu0 %v1144_v37, %s5651_s2 }
 0x302   : > { %v1202_v39 = vpop.permute.xlu1 %1201  ;;  %1336 = vrot.lane.b32.xlu1 %v1334_v38, %s5650_s1 }
 0x303   : > { %v1204_v40 = vmul.f32 %v1202_v39, %v5979_v9 }
 0x305   : > { %1206 = vrot.lane.b32.xlu0 %v1204_v40, %s5649_s0 }
 0x307   : > { %v1212_v41 = vpop.permute.xlu1 %1211 }
 0x308   : > { %v1214_v42 = vmul.f32 %v1212_v41, %v5979_v9 }
 0x30a   : > { %1216 = vrot.lane.b32.xlu0 %v1214_v42, %s5651_s2 }
 0x30c   : > { %v1272_v44 = vpop.permute.xlu1 %1271 }
 0x30d   : > { %v1274_v46 = vmul.f32 %v1272_v44, %v5979_v9 }
 0x30f   : > { %1276 = vrot.lane.b32.xlu0 %v1274_v46, %s5649_s0  ;;  %v1189_v46 = vmul.f32 %v1187_v14, %v5979_v9 }
 0x311   : > { %v1282_v48 = vpop.permute.xlu1 %1281 }
 0x312   : > { %v1284_v50 = vmul.f32 %v1282_v48, %v5979_v9 }
 0x314   : > { %1286 = vrot.lane.b32.xlu0 %v1284_v50, %s5651_s2 }
 0x316   : > { %v1342_v51 = vpop.permute.xlu1 %1341 }
 0x317   : > { %v1344_v52 = vmul.f32 %v1342_v51, %v5979_v9 }
 0x319   : > { %1346 = vrot.lane.b32.xlu0 %v1344_v52, %s5649_s0 }
 0x31b   : > { %v1352_v56 = vpop.permute.xlu1 %1351 }
 0x31c   : > { %v1354_v57 = vmul.f32 %v1352_v56, %v5979_v9 }
 0x31d   : > { %1406 = vrot.lane.b32.xlu0 %v1404_v55, %s5650_s1 }
 0x31e   : > { %1356 = vrot.lane.b32.xlu1 %v1354_v57, %s5651_s2 }
 0x320   : > { %v1412_v58 = vpop.permute.xlu1 %1411 }
 0x321   : > { %v1414_v60 = vmul.f32 %v1412_v58, %v5979_v9 }
 0x323   : > { %1416 = vrot.lane.b32.xlu1 %v1414_v60, %s5649_s0 }
 0x325   : > { %v1422_v63 = vpop.permute.xlu1 %1421 }
 0x326   : > { %v1424_v0 = vmul.f32 %v1422_v63, %v5979_v9 }
 0x327   : > { %1476 = vrot.lane.b32.xlu1 %v1474_v62, %s5650_s1 }
 0x328   : > { %1426 = vrot.lane.b32.xlu0 %v1424_v0, %s5651_s2 }
 0x32a   : > { %v1482_v1 = vpop.permute.xlu1 %1481 }
 0x32b   : > { %v1484_v2 = vmul.f32 %v1482_v1, %v5979_v9 }
 0x32d   : > { %1486 = vrot.lane.b32.xlu0 %v1484_v2, %s5649_s0 }
 0x32f   : > { %v1492_v3 = vpop.permute.xlu1 %1491 }
 0x330   : > { %v1494_v4 = vmul.f32 %v1492_v3, %v5979_v9 }
 0x332   : > { %1496 = vrot.lane.b32.xlu1 %v1494_v4, %s5651_s2 }
 0x334   : > { %v1047_v5 = vpop.permute.xlu1 %1046 }
 0x335   : > { %v1049_v28 = vmul.f32 %v1047_v5, %v5979_v9 }
 0x339   : > { %v1117_v6 = vpop.permute.xlu1 %1116 }
 0x33a   : > { %v1119_v36 = vmul.f32 %v1117_v6, %v5979_v9 }
 0x33e   : > { %v1257_v7 = vpop.permute.xlu1 %1256 }
 0x33f   : > { %v1259_v57 = vmul.f32 %v1257_v7, %v5979_v9 }
 0x343   : > { %v1327_v8 = vpop.permute.xlu1 %1326 }
 0x344   : > { %v1329_v2 = vmul.f32 %v1327_v8, %v5979_v9 }
 0x348   : > { %v1397_v13 = vpop.permute.xlu1 %1396 }
 0x349   : > { %v1399_v7 = vmul.f32 %v1397_v13, %v5979_v9  ;;  %v907_v13 = vrot.slane %v5933_v23, %v5902_v49 }
 0x34d   : > { %v6029_v15 = vpop.permute.xlu1 %1466 }
 0x34e   : > { %v1469_v8 = vmul.f32 %v6029_v15, %v5979_v9 }
 0x34f   : > { %v976_v17 = vpop.permute.xlu0 %975 }
 0x350   : > { %v978_v18 = vadd.f32 %v976_v17, %v968_v16 }
 0x351   : > { %v986_v20 = vpop.permute.xlu1 %985 }
 0x352   : > { %v988_v21 = vadd.f32 %v986_v20, %v978_v18 }
 0x355   : > { %v996_v25 = vpop.permute.xlu1 %995 }
 0x356   : > { %v6032_v24 = vadd.f32 %v996_v25, %v988_v21 }
 0x358   : > { %v1000_v26 = vsel %vm999_vm9, %v6032_v24, -inf }
 0x359   : > { %1001 = vmax.xlane.f32.xlu0 %v1000_v26  ;;  %v1057_v27 = vpop.permute.xlu1 %1056 }
 0x35a   : > { %v1059_v30 = vadd.f32 %v1057_v27, %v1049_v28 }
 0x35e   : > { %v1067_v29 = vpop.permute.xlu0 %1066 }
 0x35f   : > { %v1069_v31 = vadd.f32 %v1067_v29, %v1059_v30 }
 0x363   : > { %v1077_v32 = vpop.permute.xlu0 %1076 }
 0x364   : > { %v6037_v33 = vadd.f32 %v1077_v32, %v1069_v31 }
 0x366   : > { %v1080_v34 = vsel %vm999_vm9, %v6037_v33, -inf }
 0x367   : > { %1081 = vmax.xlane.f32.xlu1 %v1080_v34 }
 0x368   : > { %v1127_v35 = vpop.permute.xlu1 %1126 }
 0x369   : > { %v1129_v38 = vadd.f32 %v1127_v35, %v1119_v36  ;;  %v6060_v35 = vadd.f32 %v5964_v59, %v907_v13 }
 0x36c   : > { %v1197_v44 = vpop.permute.xlu1 %1196 }
 0x36d   : > { %v1137_v37 = vpop.permute.xlu0 %1136  ;;  %v1199_v50 = vadd.f32 %v1197_v44, %v1189_v46 }
 0x36e   : > { %v1139_v39 = vadd.f32 %v1137_v37, %v1129_v38 }
 0x370   : > { %v1267_v56 = vpop.permute.xlu1 %1266 }
 0x371   : > { %v1269_v60 = vadd.f32 %v1267_v56, %v1259_v57 }
 0x372   : > { %v1147_v40 = vpop.permute.xlu0 %1146 }
 0x373   : > { %v6042_v41 = vadd.f32 %v1147_v40, %v1139_v39 }
 0x374   : > { %v1337_v1 = vpop.permute.xlu1 %1336 }
 0x375   : > { %v1150_v42 = vsel %vm999_vm9, %v6042_v41, -inf  ;;  %v1339_v4 = vadd.f32 %v1337_v1, %v1329_v2 }
 0x376   : > { %1151 = vmax.xlane.f32.xlu0 %v1150_v42 }
 0x377   : > { %v1207_v48 = vpop.permute.xlu0 %1206 }
 0x378   : > { %v1209_v51 = vadd.f32 %v1207_v48, %v1199_v50 }
 0x37c   : > { %v1217_v52 = vpop.permute.xlu0 %1216 }
 0x37d   : > { %v1219_v54 = vadd.f32 %v1217_v52, %v1209_v51 }
 0x37f   : > { %v1220_v55 = vsel %vm999_vm9, %v1219_v54, -inf }
 0x380   : > { %1221 = vmax.xlane.f32.xlu0 %v1220_v55 }
 0x381   : > { %v1277_v58 = vpop.permute.xlu0 %1276 }
 0x382   : > { %v1279_v61 = vadd.f32 %v1277_v58, %v1269_v60 }
 0x386   : > { %v1287_v62 = vpop.permute.xlu0 %1286 }
 0x387   : > { %v1289_v63 = vadd.f32 %v1287_v62, %v1279_v61 }
 0x389   : > { %v1290_v0 = vsel %vm999_vm9, %v1289_v63, -inf }
 0x38a   : > { %1291 = vmax.xlane.f32.xlu1 %v1290_v0 }
 0x38b   : > { %v1347_v3 = vpop.permute.xlu0 %1346 }
 0x38c   : > { %v1349_v5 = vadd.f32 %v1347_v3, %v1339_v4 }
 0x38f   : > { %v1407_v16 = vpop.permute.xlu0 %1406 }
 0x390   : > { %v1357_v6 = vpop.permute.xlu1 %1356  ;;  %v1409_v18 = vadd.f32 %v1407_v16, %v1399_v7 }
 0x391   : > { %v1359_v12 = vadd.f32 %v1357_v6, %v1349_v5 }
 0x393   : > { %v1360_v14 = vsel %vm999_vm9, %v1359_v12, -inf }
 0x394   : > { %1361 = vmax.xlane.f32.xlu0 %v1360_v14 }
 0x395   : > { %v1417_v17 = vpop.permute.xlu1 %1416 }
 0x396   : > { %v1419_v20 = vadd.f32 %v1417_v17, %v1409_v18 }
 0x399   : > { %v1477_v27 = vpop.permute.xlu1 %1476 }
 0x39a   : > { %v1427_v21 = vpop.permute.xlu0 %1426  ;;  %v1479_v29 = vadd.f32 %v1477_v27, %v1469_v8 }
 0x39b   : > { %v1429_v25 = vadd.f32 %v1427_v21, %v1419_v20 }
 0x39d   : > { %v1430_v26 = vsel %vm999_vm9, %v1429_v25, -inf }
 0x39e   : > { %1431 = vmax.xlane.f32.xlu1 %v1430_v26 }
 0x39f   : > { %v1487_v28 = vpop.permute.xlu0 %1486 }
 0x3a0   : > { %v1489_v30 = vadd.f32 %v1487_v28, %v1479_v29 }
 0x3a4   : > { %v1497_v31 = vpop.permute.xlu1 %1496 }
 0x3a5   : > { %v1499_v32 = vadd.f32 %v1497_v31, %v1489_v30 }
 0x3a7   : > { %v1500_v34 = vsel %vm999_vm9, %v1499_v32, -inf }
 0x3a8   : > { %1501 = vmax.xlane.f32.xlu0 %v1500_v34 }
 0x3be   : > { %1018 = vrot.lane.b32.xlu0 %v6060_v35, %s5650_s1  ;;  %s6767_s1 = sld [smem:[#allocation25_spill]] (!%p4833_p1) }
 0x3e6   : > { %v1002_v36 = vpop.xlane.xlu0 %1001 }
 0x3e7   : > { %v1003_v9 = vsub.f32 %v6032_v24, %v1002_v36 }
 0x3e9   : > { %v1004_v15 = vmul.f32 1.442695, %v1003_v9 }
 0x3eb   : > { %5419 = vpow2.f32 %v1004_v15 }
 0x3f4   : > { %v1082_v37 = vpop.xlane.xlu1 %1081 }
 0x3f5   : > { %v5420_v38 = vpop.eup %5419  ;;  %v1083_v39 = vsub.f32 %v6037_v33, %v1082_v37 }
 0x3f6   : > { %v1006_v40 = vsel %vm999_vm9, %v5420_v38, 0.0 }
 0x3f7   : > { %v1084_v42 = vmul.f32 1.442695, %v1083_v39  ;;  %1007 = vadd.xlane.f32.xlu1 %v1006_v40 }
 0x3f9   : > { %5421 = vpow2.f32 %v1084_v42 }
 0x403   : > { %v6067_v23 = vpop.eup %5421  ;;  %v1152_v59 = vpop.xlane.xlu0 %1151 }
 0x404   : > { %v1153_v44 = vsub.f32 %v6042_v41, %v1152_v59  ;;  %v1086_v46 = vsel %vm999_vm9, %v6067_v23, 0.0 }
 0x405   : > { %1087 = vadd.xlane.f32.xlu0 %v1086_v46 }
 0x406   : > { %v1154_v24 = vmul.f32 1.442695, %v1153_v44 }
 0x408   : > { %5423 = vpow2.f32 %v1154_v24 }
 0x40d   : > { %v1222_v48 = vpop.xlane.xlu0 %1221 }
 0x40e   : > { %v1223_v50 = vsub.f32 %v1219_v54, %v1222_v48 }
 0x410   : > { %v1224_v51 = vmul.f32 1.442695, %v1223_v50 }
 0x412   : > { %v6072_v33 = vpop.eup %5423  ;;  %5425 = vpow2.f32 %v1224_v51 }
 0x413   : > { %v1156_v52 = vsel %vm999_vm9, %v6072_v33, 0.0 }
 0x414   : > { %1157 = vadd.xlane.f32.xlu1 %v1156_v52 }
 0x417   : > { %v1292_v55 = vpop.xlane.xlu1 %1291 }
 0x418   : > { %v1293_v56 = vsub.f32 %v1289_v63, %v1292_v55 }
 0x41a   : > { %v1294_v57 = vmul.f32 1.442695, %v1293_v56 }
 0x41c   : > { %v6076_v41 = vpop.eup %5425  ;;  %5427 = vpow2.f32 %v1294_v57 }
 0x41d   : > { %v1226_v58 = vsel %vm999_vm9, %v6076_v41, 0.0 }
 0x41e   : > { %1227 = vadd.xlane.f32.xlu0 %v1226_v58 }
 0x421   : > { %v1362_v60 = vpop.xlane.xlu0 %1361 }
 0x422   : > { %v1363_v54 = vsub.f32 %v1359_v12, %v1362_v60 }
 0x424   : > { %v1364_v61 = vmul.f32 1.442695, %v1363_v54 }
 0x426   : > { %v6080_v62 = vpop.eup %5427  ;;  %5429 = vpow2.f32 %v1364_v61 }
 0x427   : > { %v1296_v0 = vsel %vm999_vm9, %v6080_v62, 0.0 }
 0x428   : > { %1297 = vadd.xlane.f32.xlu1 %v1296_v0 }
 0x42b   : > { %v1432_v1 = vpop.xlane.xlu1 %1431 }
 0x42c   : > { %v1433_v63 = vsub.f32 %v1429_v25, %v1432_v1 }
 0x42e   : > { %v1434_v2 = vmul.f32 1.442695, %v1433_v63 }
 0x430   : > { %v6084_v3 = vpop.eup %5429  ;;  %5431 = vpow2.f32 %v1434_v2 }
 0x431   : > { %v1366_v4 = vsel %vm999_vm9, %v6084_v3, 0.0 }
 0x432   : > { %1367 = vadd.xlane.f32.xlu0 %v1366_v4 }
 0x435   : > { %v1502_v5 = vpop.xlane.xlu0 %1501 }
 0x436   : > { %v1503_v6 = vsub.f32 %v1499_v32, %v1502_v5 }
 0x438   : > { %v1504_v12 = vmul.f32 1.442695, %v1503_v6 }
 0x439   : > { %v6100_v25 = vpop.permute.xlu0 %1018 }
 0x43a   : > { %v6088_v14 = vpop.eup %5431  ;;  %5433 = vpow2.f32 %v1504_v12 }
 0x43b   : > { %v1436_v16 = vsel %vm999_vm9, %v6088_v14, 0.0 }
 0x43c   : > { %1437 = vadd.xlane.f32.xlu1 %v1436_v16 }
 0x444   : > { %v6092_v7 = vpop.eup %5433 }
 0x445   : > { %v1506_v17 = vsel %vm999_vm9, %v6092_v7, 0.0 }
 0x446   : > { %1507 = vadd.xlane.f32.xlu1 %v1506_v17 }
 0x448   : > { %1036 = vrot.lane.b32.xlu0 %v6060_v35, %s5651_s2 }
 0x457   : > { %1027 = vrot.lane.b32.xlu1 %v6060_v35, %s5649_s0 }
 0x484   : > { %v1008_v18 = vpop.xlane.xlu1 %1007 }
 0x485   : > { %5435 = vrcp.f32 %v1008_v18 }
 0x48f   : > { %v5436_v20 = vpop.eup %5435 }
 0x490   : > { %v1010_v21 = vmul.f32 %v5436_v20, %v5420_v38 }
 0x492   : > { %v1021_v26 = vmul.f32 %v6100_v25, %v1010_v21  ;;  %v1011_v27 = vmul.f32 %v1010_v21, %v6060_v35  ;;  %v1088_v29 = vpop.xlane.xlu0 %1087 }
 0x493   : > { %5437 = vrcp.f32 %v1088_v29 }
 0x494   : > { %v1022_v8 = vsel %vm999_vm9, %v1021_v26, 0.0  ;;  %v1012_v28 = vsel %vm999_vm9, %v1011_v27, 0.0 }
 0x495   : > { %1023 = vadd.xlane.f32.xlu0 %v1022_v8  ;;  %1013 = vadd.xlane.f32.xlu1 %v1012_v28 }
 0x49d   : > { %v5438_v32 = vpop.eup %5437 }
 0x49e   : > { %v1090_v13 = vmul.f32 %v5438_v32, %v6067_v23 }
 0x4a0   : > { %v1097_v37 = vmul.f32 %v1090_v13, %v6100_v25  ;;  %v1091_v60 = vmul.f32 %v1090_v13, %v6060_v35 }
 0x4a1   : > { %v1158_v30 = vpop.xlane.xlu1 %1157 }
 0x4a2   : > { %5439 = vrcp.f32 %v1158_v30  ;;  %v1098_v42 = vsel %vm999_vm9, %v1097_v37, 0.0  ;;  %v1092_v1 = vsel %vm999_vm9, %v1091_v60, 0.0 }
 0x4ab   : > { %v1228_v31 = vpop.xlane.xlu0 %1227 }
 0x4ac   : > { %5441 = vrcp.f32 %v1228_v31  ;;  %v5440_v38 = vpop.eup %5439 }
 0x4ad   : > { %v1160_v39 = vmul.f32 %v5440_v38, %v6072_v33 }
 0x4af   : > { %v1167_v44 = vmul.f32 %v1160_v39, %v6100_v25 }
 0x4b1   : > { %v1168_v50 = vsel %vm999_vm9, %v1167_v44, 0.0 }
 0x4b5   : > { %v1298_v40 = vpop.xlane.xlu1 %1297 }
 0x4b6   : > { %5443 = vrcp.f32 %v1298_v40  ;;  %v5442_v46 = vpop.eup %5441 }
 0x4b7   : > { %v1230_v48 = vmul.f32 %v5442_v46, %v6076_v41 }
 0x4b9   : > { %v1237_v55 = vmul.f32 %v1230_v48, %v6100_v25 }
 0x4bb   : > { %v1238_v61 = vsel %vm999_vm9, %v1237_v55, 0.0 }
 0x4bf   : > { %v1368_v34 = vpop.xlane.xlu0 %1367 }
 0x4c0   : > { %5445 = vrcp.f32 %v1368_v34  ;;  %v5444_v56 = vpop.eup %5443 }
 0x4c1   : > { %v1300_v41 = vmul.f32 %v5444_v56, %v6080_v62  ;;  %v1161_v62 = vmul.f32 %v1160_v39, %v6060_v35 }
 0x4c3   : > { %v6107_v36 = vpop.permute.xlu0 %1036  ;;  %v1307_v4 = vmul.f32 %v1300_v41, %v6100_v25  ;;  %v1162_v18 = vsel %vm999_vm9, %v1161_v62, 0.0 }
 0x4c4   : > { %v1039_v9 = vmul.f32 %v6107_v36, %v1010_v21  ;;  %v1109_v59 = vmul.f32 %v1090_v13, %v6107_v36  ;;  %v1179_v51 = vmul.f32 %v1160_v39, %v6107_v36  ;;  %v1249_v0 = vmul.f32 %v1230_v48, %v6107_v36 }
 0x4c5   : > { %v1308_v16 = vsel %vm999_vm9, %v1307_v4, 0.0  ;;  %v1319_v17 = vmul.f32 %v1300_v41, %v6107_v36 }
 0x4c6   : > { %v1040_v15 = vsel %vm999_vm9, %v1039_v9, 0.0  ;;  %v1110_v23 = vsel %vm999_vm9, %v1109_v59, 0.0  ;;  %v1180_v52 = vsel %vm999_vm9, %v1179_v51, 0.0  ;;  %v1250_v63 = vsel %vm999_vm9, %v1249_v0, 0.0  ;;  %v5277_v0 = vld [vmem:[%s5839_s30] sm:$0xff]  }
 0x4c7   : > { %1041 = vadd.xlane.f32.xlu1 %v1040_v15  ;;  %v1320_v20 = vsel %vm999_vm9, %v1319_v17, 0.0  ;;  %5110 = vmatpush3.bf16.msra.mxu1 %v5277_v0 }
 0x4c8   : > { %5111 = vmatprep.subr.bf16.mxu1 %v5615_v19 }
 0x4c9   : > { %v1438_v24 = vpop.xlane.xlu1 %1437 }
 0x4ca   : > { %5447 = vrcp.f32 %v1438_v24  ;;  %v5446_v5 = vpop.eup %5445 }
 0x4cb   : > { %1099 = vadd.xlane.f32.xlu1 %v1098_v42  ;;  %v1370_v6 = vmul.f32 %v5446_v5, %v6084_v3  ;;  %v1231_v3 = vmul.f32 %v1230_v48, %v6060_v35 }
 0x4cd   : > { %v1377_v26 = vmul.f32 %v1370_v6, %v6100_v25  ;;  %v1389_v30 = vmul.f32 %v1370_v6, %v6107_v36  ;;  %v1232_v31 = vsel %vm999_vm9, %v1231_v3, 0.0  ;;  %v1371_v46 = vmul.f32 %v1370_v6, %v6060_v35 }
 0x4cf   : > { %1111 = vadd.xlane.f32.xlu1 %v1110_v23  ;;  %v1378_v29 = vsel %vm999_vm9, %v1377_v26, 0.0  ;;  %v1390_v32 = vsel %vm999_vm9, %v1389_v30, 0.0 }
 0x4d3   : > { %v1508_v33 = vpop.xlane.xlu1 %1507  ;;  %1169 = vadd.xlane.f32.xlu1 %v1168_v50 }
 0x4d4   : > { %5449 = vrcp.f32 %v1508_v33  ;;  %v5448_v27 = vpop.eup %5447 }
 0x4d5   : > { %v1440_v8 = vmul.f32 %v5448_v27, %v6088_v14  ;;  %v1301_v14 = vmul.f32 %v1300_v41, %v6060_v35 }
 0x4d7   : > { %v6122_v57 = vpop.permute.xlu1 %1027  ;;  %1181 = vadd.xlane.f32.xlu1 %v1180_v52  ;;  %v1302_v40 = vsel %vm999_vm9, %v1301_v14, 0.0  ;;  %v1441_v33 = vmul.f32 %v1440_v8, %v6060_v35 }
 0x4d8   : > { %v1030_v58 = vmul.f32 %v6122_v57, %v1010_v21  ;;  %v1103_v2 = vmul.f32 %v1090_v13, %v6122_v57  ;;  %v1173_v21 = vmul.f32 %v1160_v39, %v6122_v57  ;;  %v1243_v34 = vmul.f32 %v1230_v48, %v6122_v57 }
 0x4d9   : > { %v1447_v13 = vmul.f32 %v1440_v8, %v6100_v25  ;;  %v1459_v39 = vmul.f32 %v1440_v8, %v6107_v36  ;;  %v1313_v59 = vmul.f32 %v1300_v41, %v6122_v57  ;;  %v1372_v48 = vsel %vm999_vm9, %v1371_v46, 0.0 }
 0x4da   : > { %v1031_v54 = vsel %vm999_vm9, %v1030_v58, 0.0  ;;  %v1104_v12 = vsel %vm999_vm9, %v1103_v2, 0.0  ;;  %v1174_v28 = vsel %vm999_vm9, %v1173_v21, 0.0  ;;  %v1244_v37 = vsel %vm999_vm9, %v1243_v34, 0.0 }
 0x4db   : > { %1032 = vadd.xlane.f32.xlu0 %v1031_v54  ;;  %1239 = vadd.xlane.f32.xlu1 %v1238_v61  ;;  %v1448_v38 = vsel %vm999_vm9, %v1447_v13, 0.0  ;;  %v1460_v42 = vsel %vm999_vm9, %v1459_v39, 0.0  ;;  %v1383_v51 = vmul.f32 %v1370_v6, %v6122_v57  ;;  %v1442_v52 = vsel %vm999_vm9, %v1441_v33, 0.0 }
 0x4de   : > { %v5450_v9 = vpop.eup %5449 }
 0x4df   : > { %1093 = vadd.xlane.f32.xlu0 %v1092_v1  ;;  %1251 = vadd.xlane.f32.xlu1 %v1250_v63  ;;  %v1510_v15 = vmul.f32 %v5450_v9, %v6092_v7  ;;  %v1314_v7 = vsel %vm999_vm9, %v1313_v59, 0.0  ;;  %v5278_v1 = vld [vmem:[%s5839_s30 + $0x8] sm:$0xff]   ;;  %s6768_s30 = sld [smem:[#allocation27_spill]] (!%p4833_p1) }
 0x4e0   : > { %5112 = vmatpush3.bf16.msra.mxu1 %v5278_v1  ;;  %v1649_v1 = vld [vmem:[%s5844_s12 + $0x80] sm:$0xff] }
 0x4e1   : > { %v1517_v23 = vmul.f32 %v1510_v15, %v6100_v25  ;;  %v1529_v24 = vmul.f32 %v1510_v15, %v6107_v36  ;;  %v1384_v25 = vsel %vm999_vm9, %v1383_v51, 0.0  ;;  %v1453_v36 = vmul.f32 %v1440_v8, %v6122_v57 }
 0x4e2   : > { %v1511_v56 = vmul.f32 %v1510_v15, %v6060_v35  ;;  %v1523_v60 = vmul.f32 %v1510_v15, %v6122_v57 }
 0x4e3   : > { %1105 = vadd.xlane.f32.xlu0 %v1104_v12  ;;  %1309 = vadd.xlane.f32.xlu1 %v1308_v16  ;;  %v1518_v44 = vsel %vm999_vm9, %v1517_v23, 0.0  ;;  %v1530_v50 = vsel %vm999_vm9, %v1529_v24, 0.0  ;;  %v1454_v55 = vsel %vm999_vm9, %v1453_v36, 0.0  ;;  %v5456_v23 = vld [vmem:[#allocation2] sm:$0xff] }
 0x4e4   : > { %v1512_v58 = vsel %vm999_vm9, %v1511_v56, 0.0  ;;  %v1524_v41 = vsel %vm999_vm9, %v1523_v60, 0.0  ;;  %vm1247_vm9 = vcmask 162968   ;;  %v1641_v56 = vld [vmem:[%s5844_s12 + $0x40] sm:$0xff] }
 0x4e5   : > { %s6769_s22 = smov (!%p4833_p1), %s6768_s30 }
 0x4e7   : > { %1163 = vadd.xlane.f32.xlu0 %v1162_v18  ;;  %1321 = vadd.xlane.f32.xlu1 %v1320_v20 }
 0x4eb   : > { %1175 = vadd.xlane.f32.xlu0 %v1174_v28  ;;  %1379 = vadd.xlane.f32.xlu1 %v1378_v29 }
 0x4ef   : > { %1233 = vadd.xlane.f32.xlu0 %v1232_v31  ;;  %1391 = vadd.xlane.f32.xlu1 %v1390_v32 }
 0x4f3   : > { %1245 = vadd.xlane.f32.xlu0 %v1244_v37  ;;  %1449 = vadd.xlane.f32.xlu1 %v1448_v38 }
 0x4f7   : > { %1303 = vadd.xlane.f32.xlu0 %v1302_v40  ;;  %1461 = vadd.xlane.f32.xlu1 %v1460_v42  ;;  %v5455_v40 = vld [vmem:[%s5819_s17 + $0x8] sm:$0x1f] }
 0x4f8   : > { %v1600_v42 = vrot.slane %v5455_v40, %v5907_v53  ;;  %v1659_v40 = vld [vmem:[%s5844_s12 + $0xd0] sm:$0xff] }
 0x4fb   : > { %1315 = vadd.xlane.f32.xlu0 %v1314_v7  ;;  %1519 = vadd.xlane.f32.xlu1 %v1518_v44 }
 0x4ff   : > { %1373 = vadd.xlane.f32.xlu0 %v1372_v48  ;;  %1531 = vadd.xlane.f32.xlu1 %v1530_v50 }
 0x503   : > { %1385 = vadd.xlane.f32.xlu0 %v1384_v25 }
 0x507   : > { %1443 = vadd.xlane.f32.xlu0 %v1442_v52 }
 0x50b   : > { %1455 = vadd.xlane.f32.xlu0 %v1454_v55  ;;  %v1633_v55 = vld [vmem:[%s5844_s12] sm:$0xff] }
 0x50c   : > { %v4666_v60 = vcombine.high %v1633_v55, %v1641_v56 }
 0x50e   : > { %1912 = vmatprep.subr.bf16.mxu0 %v4666_v60  ;;  %v1662_v60 = vld [vmem:[%s5844_s12 + $0xe8] sm:$0xff] }
 0x50f   : > { %1513 = vadd.xlane.f32.xlu0 %v1512_v58  ;;  %v1634_v58 = vld [vmem:[%s5844_s12 + $0x8] sm:$0xff] }
 0x513   : > { %1525 = vadd.xlane.f32.xlu0 %v1524_v41  ;;  %v1642_v41 = vld [vmem:[%s5844_s12 + $0x48] sm:$0xff] }
 0x514   : > { %v4668_v0 = vcombine.high %v1634_v58, %v1642_v41 }
 0x516   : > { %1953 = vmatprep.subr.bf16.mxu1 %v4668_v0 }
 0x522   : > { %v1024_v54 = vpop.xlane.xlu0 %1023  ;;  %v1014_v61 = vpop.xlane.xlu1 %1013 }
 0x523   : > { %1016 = vst.msk [vmem:[#allocation3] sm:$0xff] %vm1015_vm10, %v1014_v61  ;;  %vm1253_vm10 = vcmask 228568   ;;  %v4667_v61 = vcombine.low %v1634_v58, %v1642_v41  ;;  %v1654_v58 = vld [vmem:[%s5844_s12 + $0xa8] sm:$0xff] }
 0x524   : > { %1026 = vst.msk [vmem:[#allocation3] sm:$0xff] %vm1025_vm11, %v1024_v54  ;;  %vm1305_vm11 = vcmask 39968   ;;  %v4665_v54 = vcombine.low %v1633_v55, %v1641_v56  ;;  %v1653_v55 = vld [vmem:[%s5844_s12 + $0xa0] sm:$0xff]  ;;  %v4692_v0 = vcombine.high %v1654_v58, %v1662_v60 }
 0x525   : > { %v1661_v56 = vld [vmem:[%s5844_s12 + $0xe0] sm:$0xff] }
 0x526   : > { %1913 = vmatpush1.bf16.msra.mxu0 %v4665_v54 }
 0x554   : > { %v1042_v35 = vpop.xlane.xlu1 %1041 }
 0x558   : > { %v1100_v63 = vpop.xlane.xlu1 %1099 }
 0x55c   : > { %v1112_v2 = vpop.xlane.xlu1 %1111 }
 0x560   : > { %v1170_v57 = vpop.xlane.xlu1 %1169 }
 0x564   : > { %v1182_v4 = vpop.xlane.xlu1 %1181 }
 0x568   : > { %v1033_v5 = vpop.xlane.xlu0 %1032  ;;  %v1240_v62 = vpop.xlane.xlu1 %1239 }
 0x569   : > { %1035 = vst.msk [vmem:[#allocation3] sm:$0xff] %vm1034_vm12, %v1033_v5  ;;  %vm1311_vm12 = vcmask 105568  }
 0x56a   : > { %1044 = vst.msk [vmem:[#allocation3] sm:$0xff] %vm1043_vm13, %v1042_v35  ;;  %vm1317_vm13 = vcmask 171168   ;;  %v1657_v35 = vld [vmem:[%s5844_s12 + $0xc0] sm:$0xff] }
 0x56c   : > { %v1094_v6 = vpop.xlane.xlu0 %1093  ;;  %v1252_v12 = vpop.xlane.xlu1 %1251 }
 0x56d   : > { %1096 = vst.msk [vmem:[#allocation3] sm:$0xff] %vm1095_vm14, %v1094_v6  ;;  %vm1323_vm14 = vcmask 236768   ;;  %v1635_v6 = vld [vmem:[%s5844_s12 + $0x10] sm:$0xff] }
 0x56e   : > { %1102 = vst.msk [vmem:[#allocation3] sm:$0xff] %vm1101_vm15, %v1100_v63  ;;  %vm1375_vm15 = vcmask 48168   ;;  %v1650_v63 = vld [vmem:[%s5844_s12 + $0x88] sm:$0xff] }
 0x570   : > { %v1106_v19 = vpop.xlane.xlu0 %1105  ;;  %v1310_v17 = vpop.xlane.xlu1 %1309 }
 0x571   : > { %1108 = vst.msk [vmem:[#allocation3] sm:$0xff] %vm1107_vm0, %v1106_v19  ;;  %vm1381_vm0 = vcmask 113768   ;;  %v1643_v19 = vld [vmem:[%s5844_s12 + $0x50] sm:$0xff] }
 0x572   : > { %1114 = vst.msk [vmem:[#allocation3] sm:$0xff] %vm1113_vm2, %v1112_v2  ;;  %vm1387_vm2 = vcmask 179368   ;;  %v4682_v2 = vcombine.high %v1649_v1, %v1657_v35 }
 0x574   : > { %v1164_v16 = vpop.xlane.xlu0 %1163  ;;  %v1322_v21 = vpop.xlane.xlu1 %1321  ;;  %1914 = vmatprep.subr.bf16.mxu0 %v4682_v2  ;;  %v1648_v2 = vld [vmem:[%s5844_s12 + $0x78] sm:$0xff] }
 0x575   : > { %1166 = vst.msk [vmem:[#allocation3] sm:$0xff] %vm1165_vm3, %v1164_v16  ;;  %vm1393_vm3 = vcmask 244968   ;;  %v4669_v16 = vcombine.low %v1635_v6, %v1643_v19 }
 0x576   : > { %1172 = vst.msk [vmem:[#allocation3] sm:$0xff] %vm1171_vm4, %v1170_v57  ;;  %vm1445_vm4 = vcmask 56368   ;;  %v1658_v57 = vld [vmem:[%s5844_s12 + $0xc8] sm:$0xff] }
 0x577   : > { %v4684_v5 = vcombine.high %v1650_v63, %v1658_v57 }
 0x578   : > { %v1176_v18 = vpop.xlane.xlu0 %1175  ;;  %v1380_v27 = vpop.xlane.xlu1 %1379 }
 0x579   : > { %1178 = vst.msk [vmem:[#allocation3] sm:$0xff] %vm1177_vm5, %v1176_v18  ;;  %vm1451_vm5 = vcmask 121968   ;;  %v1644_v18 = vld [vmem:[%s5844_s12 + $0x58] sm:$0xff] }
 0x57a   : > { %1184 = vst.msk [vmem:[#allocation3] sm:$0xff] %vm1183_vm6, %v1182_v4  ;;  %vm1457_vm6 = vcmask 187568   ;;  %v4681_v4 = vcombine.low %v1649_v1, %v1657_v35  ;;  %v1639_v1 = vld [vmem:[%s5844_s12 + $0x30] sm:$0xff] }
 0x57b   : > { %v1647_v35 = vld [vmem:[%s5844_s12 + $0x70] sm:$0xff] }
 0x57c   : > { %v1234_v20 = vpop.xlane.xlu0 %1233  ;;  %v1392_v28 = vpop.xlane.xlu1 %1391  ;;  %1915 = vmatpush1.bf16.msra.mxu0 %v4681_v4  ;;  %v4691_v4 = vcombine.low %v1654_v58, %v1662_v60  ;;  %v5310_v58 = vld [vmem:[%s5854_s20 + $0xb8] sm:$0xff]   ;;  %v5311_v60 = vld [vmem:[%s5854_s20 + $0x140] sm:$0xff]  }
 0x57d   : > { %1236 = vst.msk [vmem:[#allocation3] sm:$0xff] %vm1235_vm7, %v1234_v20  ;;  %vm1463_vm7 = vcmask 253168  }
 0x57e   : > { %1242 = vst.msk [vmem:[#allocation3] sm:$0xff] %vm1241_vm8, %v1240_v62  ;;  %vm1515_vm8 = vcmask 64568   ;;  %v4683_v62 = vcombine.low %v1650_v63, %v1658_v57  ;;  %v1640_v63 = vld [vmem:[%s5844_s12 + $0x38] sm:$0xff]  ;;  %v4689_v57 = vcombine.low %v1653_v55, %v1661_v56 }
 0x580   : > { %v1246_v26 = vpop.xlane.xlu0 %1245  ;;  %v1450_v30 = vpop.xlane.xlu1 %1449 }
 0x581   : > { %1248 = vst.msk [vmem:[#allocation3] sm:$0xff] %vm1247_vm9, %v1246_v26  ;;  %vm1521_vm9 = vcmask 130168  }
 0x582   : > { %1254 = vst.msk [vmem:[#allocation3] sm:$0xff] %vm1253_vm10, %v1252_v12  ;;  %vm1527_vm10 = vcmask 195768   ;;  %v1636_v12 = vld [vmem:[%s5844_s12 + $0x18] sm:$0xff] }
 0x583   : > { %v4671_v20 = vcombine.low %v1636_v12, %v1644_v18 }
 0x584   : > { %v1304_v3 = vpop.xlane.xlu0 %1303  ;;  %v1462_v34 = vpop.xlane.xlu1 %1461 }
 0x585   : > { %1306 = vst.msk [vmem:[#allocation3] sm:$0xff] %vm1305_vm11, %v1304_v3  ;;  %vm1533_vm11 = vcmask 261368  }
 0x586   : > { %1312 = vst.msk [vmem:[#allocation3] sm:$0xff] %vm1311_vm12, %v1310_v17  ;;  %v4670_v17 = vcombine.high %v1635_v6, %v1643_v19  ;;  %v1655_v6 = vld [vmem:[%s5844_s12 + $0xb0] sm:$0xff] }
 0x587   : > { %v1663_v19 = vld [vmem:[%s5844_s12 + $0xf0] sm:$0xff] }
 0x588   : > { %v1316_v8 = vpop.xlane.xlu0 %1315  ;;  %v1520_v9 = vpop.xlane.xlu1 %1519  ;;  %1994 = vmatprep.subr.bf16.mxu0 %v4670_v17  ;;  %v4677_v17 = vcombine.low %v1639_v1, %v1647_v35 }
 0x589   : > { %1318 = vst.msk [vmem:[#allocation3] sm:$0xff] %vm1317_vm13, %v1316_v8 }
 0x58a   : > { %1324 = vst.msk [vmem:[#allocation3] sm:$0xff] %vm1323_vm14, %v1322_v21  ;;  %v4672_v21 = vcombine.high %v1636_v12, %v1644_v18  ;;  %v1656_v12 = vld [vmem:[%s5844_s12 + $0xb8] sm:$0xff]  ;;  %v4679_v18 = vcombine.low %v1640_v63, %v1648_v2 }
 0x58c   : > { %v1374_v29 = vpop.xlane.xlu0 %1373  ;;  %v1532_v37 = vpop.xlane.xlu1 %1531 }
 0x58d   : > { %1376 = vst.msk [vmem:[#allocation3] sm:$0xff] %vm1375_vm15, %v1374_v29 }
 0x58e   : > { %1382 = vst.msk [vmem:[#allocation3] sm:$0xff] %vm1381_vm0, %v1380_v27  ;;  %vm5654_vm0 = vmmov (!%p4833_p1), 0  }
 0x590   : > { %v1386_v31 = vpop.xlane.xlu0 %1385 }
 0x591   : > { %1388 = vst.msk [vmem:[#allocation3] sm:$0xff] %vm1387_vm2, %v1386_v31 }
 0x592   : > { %1394 = vst.msk [vmem:[#allocation3] sm:$0xff] %vm1393_vm3, %v1392_v28 }
 0x594   : > { %v1444_v32 = vpop.xlane.xlu0 %1443 }
 0x595   : > { %1446 = vst.msk [vmem:[#allocation3] sm:$0xff] %vm1445_vm4, %v1444_v32  ;;  %v6203_v32 = vsub.s32 6, %v5891_v43 }
 0x596   : > { %1452 = vst.msk [vmem:[#allocation3] sm:$0xff] %vm1451_vm5, %v1450_v30 }
 0x598   : > { %v1456_v13 = vpop.xlane.xlu0 %1455 }
 0x599   : > { %1458 = vst.msk [vmem:[#allocation3] sm:$0xff] %vm1457_vm6, %v1456_v13  ;;  %v5457_v13 = vld [vmem:[%s5819_s17] sm:$0xff] }
 0x59a   : > { %1464 = vst.msk [vmem:[#allocation3] sm:$0xff] %vm1463_vm7, %v1462_v34  ;;  %v6206_v34 = vsub.s32 7, %v5891_v43 }
 0x59c   : > { %v1514_v14 = vpop.xlane.xlu0 %1513 }
 0x59d   : > { %1516 = vst.msk [vmem:[#allocation3] sm:$0xff] %vm1515_vm8, %v1514_v14 }
 0x59e   : > { %1522 = vst.msk [vmem:[#allocation3] sm:$0xff] %vm1521_vm9, %v1520_v9  ;;  %v1625_v9 = vrot.slane %v5457_v13, %v6203_v32 }
 0x5a0   : > { %v1526_v15 = vpop.xlane.xlu0 %1525 }
 0x5a1   : > { %1528 = vst.msk [vmem:[#allocation3] sm:$0xff] %vm1527_vm10, %v1526_v15 }
 0x5a2   : > { %1534 = vst.msk [vmem:[#allocation3] sm:$0xff] %vm1533_vm11, %v1532_v37  ;;  %v1630_v37 = vrot.slane %v5457_v13, %v6206_v34  ;;  %v5286_v13 = vld [vmem:[%s5854_s20 + $0x88] sm:$0xff]  }
 0x5a9   : > { %v1535_v38 = vld [vmem:[#allocation3] sm:$0xff] }
 0x5aa   : > { %v1536_v39 = vpack.c.bf16 %v1535_v38, %v1535_v38 }
 0x5ac   : > { %5114 = vmatmul.mubr.msk.bf16.vlgmr.msra.gmra.mrb[4].mxu1 %vm678_vm1, %v1536_v39  ;;  %v1651_v39 = vld [vmem:[%s5844_s12 + $0x90] sm:$0xff] }
 0x5ad   : > { %1985 = vmatprep.mubr.bf16.mxu1 %v5619_v22  ;;  %1954 = vmatpush1.bf16.msra.mxu1 %v4667_v61  ;;  %v4686_v43 = vcombine.high %v1651_v39, %v1659_v40  ;;  %v4690_v61 = vcombine.high %v1653_v55, %v1661_v56  ;;  %v5308_v55 = vld [vmem:[%s5854_s20 + $0xf8] sm:$0xff]  }
 0x5ae   : > { %1955 = vmatprep.subr.bf16.mxu1 %v4684_v5  ;;  %v4678_v5 = vcombine.high %v1639_v1, %v1647_v35  ;;  %v5309_v56 = vld [vmem:[%s5854_s20 + $0x38] sm:$0xff]  }
 0x5b1   : > { %1956 = vmatpush1.bf16.msra.mxu1 %v4683_v62  ;;  %v4680_v62 = vcombine.high %v1640_v63, %v1648_v2 }
 0x5b2   : > { %2035 = vmatprep.subr.bf16.mxu1 %v4672_v21 }
 0x67f   : > { %v1590_v59 = vpop.f32.mrb[4].mxu1 }
 0x680   : > { %v1596_v7 = vadd.f32 %v5456_v23, %v1590_v59  ;;  %v5115_v44 = vpop.f32.mrb[5].mxu1  ;;  %v1660_v59 = vld [vmem:[%s5844_s12 + $0xd8] sm:$0xff] }
 0x681   : > { %v1593_v46 = vpop.f32.mrb[6].mxu1 }
 0x682   : > { %v6184_v24 = vadd.f32 %v1600_v42, %v1596_v7  ;;  %v5116_v48 = vpop.f32.mrb[7].mxu1  ;;  %v1652_v42 = vld [vmem:[%s5844_s12 + $0x98] sm:$0xff]  ;;  %v1637_v46 = vld [vmem:[%s5844_s12 + $0x20] sm:$0xff] }
 0x683   : > { %v4688_v44 = vcombine.high %v1652_v42, %v1660_v59  ;;  %v1645_v48 = vld [vmem:[%s5844_s12 + $0x60] sm:$0xff] }
 0x684   : > { %v1602_v50 = vsel %vm678_vm1, %v6184_v24, 0.0  ;;  %v4673_v41 = vcombine.low %v1637_v46, %v1645_v48 }
 0x685   : > { %1603 = vadd.xlane.f32.xlu0 %v1602_v50  ;;  %v1638_v50 = vld [vmem:[%s5844_s12 + $0x28] sm:$0xff] }
 0x712   : > { %v1604_v51 = vpop.xlane.xlu0 %1603 }
 0x713   : > { %v1605_v25 = vmul.f32 0.03125, %v1604_v51  ;;  %v1646_v51 = vld [vmem:[%s5844_s12 + $0x68] sm:$0xff] }
 0x714   : > { %v4675_v54 = vcombine.low %v1638_v50, %v1646_v51 }
 0x715   : > { %v1606_v33 = vsub.f32 %v6184_v24, %v1605_v25  ;;  %v4685_v25 = vcombine.low %v1651_v39, %v1659_v40  ;;  %v5292_v39 = vld [vmem:[%s5854_s20 + $0xd8] sm:$0xff]  }
 0x716   : > { %v5293_v40 = vld [vmem:[%s5854_s20 + $0x18] sm:$0xff]  }
 0x717   : > { %v1607_v52 = vmul.f32 %v1606_v33, %v1606_v33 }
 0x719   : > { %v1608_v36 = vsel %vm678_vm1, %v1607_v52, 0.0  ;;  %v4674_v52 = vcombine.high %v1637_v46, %v1645_v48  ;;  %v5300_v46 = vld [vmem:[%s5854_s20 + $0xe8] sm:$0xff]  }
 0x71a   : > { %1609 = vadd.xlane.f32.xlu1 %v1608_v36  ;;  %v4676_v36 = vcombine.high %v1638_v50, %v1646_v51  ;;  %v5301_v48 = vld [vmem:[%s5854_s20 + $0x28] sm:$0xff]   ;;  %v5303_v51 = vld [vmem:[%s5854_s20 + $0x70] sm:$0xff]  }
 0x71b   : > { %v5302_v50 = vld [vmem:[%s5854_s20 + $0xa8] sm:$0xff]  }
 0x7a7   : > { %v1610_v26 = vpop.xlane.xlu1 %1609 }
 0x7a8   : > { %v1611_v27 = vmul.f32 0.032258064, %v1610_v26  ;;  %v4693_v26 = vcombine.low %v1655_v6, %v1663_v19 }
 0x7aa   : > { %5451 = vrsqrt.f32 %v1611_v27  ;;  %vm1614_vm12 = vcmp.eq.f32.partialorder %v1611_v27, inf  ;;  %v1617_v28 = vand.u32 2147483648, %v1611_v27  ;;  %vm1616_vm13 = vcmp.eq.f32.partialorder %v1611_v27, 0.0 }
 0x7b4   : > { %v5452_v3 = vpop.eup %5451 }
 0x7b5   : > { %v1613_v8 = vmul.f32 %v5452_v3, %v1611_v27  ;;  %v5279_v3 = vld [vmem:[%s5854_s20 + $0x40] sm:$0xff]  }
 0x7b7   : > { %v1615_v29 = vsel %vm1614_vm12, %v1611_v27, %v1613_v8  ;;  %v5280_v8 = vld [vmem:[%s5854_s20 + $0xc0] sm:$0xff]  }
 0x7b8   : > { %v1618_v30 = vsel %vm1616_vm13, %v1617_v28, %v1615_v29  ;;  %v5281_v28 = vld [vmem:[%s5854_s20] sm:$0xff]  }
 0x7b9   : > { %v1619_v31 = vadd.f32 1e-06, %v1618_v30  ;;  %v5282_v29 = vld [vmem:[%s5854_s20 + $0x80] sm:$0xff]   ;;  %v5283_v30 = vld [vmem:[%s5854_s20 + $0x48] sm:$0xff]  }
 0x7bb   : > { %5453 = vrcp.f32 %v1619_v31  ;;  %v5284_v31 = vld [vmem:[%s5854_s20 + $0xc8] sm:$0xff]  }
 0x7c5   : > { %v5454_v14 = vpop.eup %5453 }
 0x7c6   : > { %v1621_v15 = vmul.f32 %v5454_v14, %v1606_v33  ;;  %v4687_v33 = vcombine.low %v1652_v42, %v1660_v59  ;;  %v5288_v14 = vld [vmem:[%s5854_s20 + $0xd0] sm:$0xff]   ;;  %v5294_v42 = vld [vmem:[%s5854_s20 + $0x98] sm:$0xff]   ;;  %v5295_v59 = vld [vmem:[%s5854_s20 + $0x60] sm:$0xff]  }
 0x7c8   : > { %v1626_v38 = vmul.f32 %v1625_v9, %v1621_v15  ;;  %v5287_v9 = vld [vmem:[%s5854_s20 + $0x50] sm:$0xff]  }
 0x7c9   : > { %v5289_v15 = vld [vmem:[%s5854_s20 + $0x10] sm:$0xff]  }
 0x7ca   : > { %v1631_v23 = vadd.f32 %v1630_v37, %v1626_v38  ;;  %v5290_v37 = vld [vmem:[%s5854_s20 + $0x90] sm:$0xff]   ;;  %v5291_v38 = vld [vmem:[%s5854_s20 + $0x58] sm:$0xff]  }
 0x7cc   : > { %v6215_v7 = vpack.c.bf16 %v1631_v23, %v1631_v23  ;;  %v5296_v23 = vld [vmem:[%s5854_s20 + $0xe0] sm:$0xff]  }
 0x7ce   : > { %4697 = vmatmul.mubr.msk.bf16.vlgmr.msra.gmra.mrb[8].mxu0 %vm678_vm1, %v6215_v7  ;;  %4698 = vmatmul.mubr.msk.bf16.vlgmr.msra.gmra.mrb[8].mxu1 %vm678_vm1, %v6215_v7 }
 0x7cf   : > { %1995 = vmatpush1.bf16.msra.mxu0 %v4669_v16  ;;  %2036 = vmatpush1.bf16.msra.mxu1 %v4671_v20  ;;  %v1664_v16 = vld [vmem:[%s5844_s12 + $0xf8] sm:$0xff]  ;;  %v4694_v20 = vcombine.high %v1655_v6, %v1663_v19 }
 0x7d0   : > { %1996 = vmatprep.subr.bf16.mxu0 %v4686_v43  ;;  %2037 = vmatprep.subr.bf16.mxu1 %v4688_v44  ;;  %v4696_v21 = vcombine.high %v1656_v12, %v1664_v16  ;;  %v4695_v27 = vcombine.low %v1656_v12, %v1664_v16  ;;  %v5298_v43 = vld [vmem:[%s5854_s20 + $0xa0] sm:$0xff]   ;;  %v5299_v44 = vld [vmem:[%s5854_s20 + $0x68] sm:$0xff]  }
 0x7d1   : > { %2026 = vmatprep.mubr.bf16.mxu0 %v5619_v22  ;;  %2067 = vmatprep.mubr.bf16.mxu1 %v5619_v22 }
 0x7d3   : > { %1997 = vmatpush1.bf16.msra.mxu0 %v4685_v25  ;;  %2038 = vmatpush1.bf16.msra.mxu1 %v4687_v33  ;;  %v5304_v25 = vld [vmem:[%s5854_s20 + $0xf0] sm:$0xff]  }
 0x7d4   : > { %2076 = vmatprep.subr.bf16.mxu0 %v4674_v52  ;;  %2117 = vmatprep.subr.bf16.mxu1 %v4676_v36  ;;  %v5305_v33 = vld [vmem:[%s5854_s20 + $0x30] sm:$0xff]   ;;  %v5307_v36 = vld [vmem:[%s5854_s20 + $0x78] sm:$0xff]  }
 0x7d5   : > { %v5306_v52 = vld [vmem:[%s5854_s20 + $0xb0] sm:$0xff]  }
 0x7d6   : > { %4699 = vmatmul.mubr.msk.bf16.vlgmr.msra.gmra.mrb[12].mxu0 %vm678_vm1, %v6215_v7  ;;  %4700 = vmatmul.mubr.msk.bf16.vlgmr.msra.gmra.mrb[12].mxu1 %vm678_vm1, %v6215_v7 }
 0x7d7   : > { %2077 = vmatpush1.bf16.msra.mxu0 %v4673_v41  ;;  %2118 = vmatpush1.bf16.msra.mxu1 %v4675_v54  ;;  %v5312_v41 = vld [vmem:[%s5854_s20 + $0x1c0] sm:$0xff]  }
 0x7d8   : > { %2078 = vmatprep.subr.bf16.mxu0 %v4690_v61  ;;  %2119 = vmatprep.subr.bf16.mxu1 %v4692_v0  ;;  %v6290_v54 = vld [vmem:[%s5849_s24] sm:$0xff] }
 0x7d9   : > { %2108 = vmatprep.mubr.bf16.mxu0 %v5619_v22  ;;  %2149 = vmatprep.mubr.bf16.mxu1 %v5619_v22  ;;  %v1672_v61 = vrot.slane %v6290_v54, %v5894_v45  ;;  %v1680_v0 = vrot.slane %v6290_v54, %v5902_v49  ;;  %v1676_v1 = vrot.slane %v6290_v54, %v5898_v47 }
 0x7da   : > { %v1684_v35 = vrot.slane %v6290_v54, %v5907_v53 }
 0x7db   : > { %2079 = vmatpush1.bf16.msra.mxu0 %v4689_v57  ;;  %2120 = vmatpush1.bf16.msra.mxu1 %v4691_v4 }
 0x7dc   : > { %2158 = vmatprep.subr.bf16.mxu0 %v4678_v5  ;;  %2199 = vmatprep.subr.bf16.mxu1 %v4680_v62 }
 0x7de   : > { %4701 = vmatmul.mubr.msk.bf16.vlgmr.msra.gmra.mrb[16].mxu0 %vm678_vm1, %v6215_v7  ;;  %4702 = vmatmul.mubr.msk.bf16.vlgmr.msra.gmra.mrb[16].mxu1 %vm678_vm1, %v6215_v7 }
 0x7df   : > { %2159 = vmatpush1.bf16.msra.mxu0 %v4677_v17  ;;  %2200 = vmatpush1.bf16.msra.mxu1 %v4679_v18 }
 0x7e0   : > { %2160 = vmatprep.subr.bf16.mxu0 %v4694_v20  ;;  %2201 = vmatprep.subr.bf16.mxu1 %v4696_v21 }
 0x7e1   : > { %2190 = vmatprep.mubr.bf16.mxu0 %v5619_v22  ;;  %2231 = vmatprep.mubr.bf16.mxu1 %v5619_v22  ;;  %v5285_v22 = vld [vmem:[%s5854_s20 + $0x8] sm:$0xff]  }
 0x7e3   : > { %2161 = vmatpush1.bf16.msra.mxu0 %v4693_v26  ;;  %2202 = vmatpush1.bf16.msra.mxu1 %v4695_v27 }
 0x7e4   : > { %4906 = vmatprep.subr.bf16.mxu0 %v5279_v3  ;;  %4928 = vmatprep.subr.bf16.mxu1 %v5280_v8 }
 0x7e6   : > { %4703 = vmatmul.mubr.msk.bf16.vlgmr.msra.gmra.mrb[20].mxu0 %vm678_vm1, %v6215_v7  ;;  %4704 = vmatmul.mubr.msk.bf16.vlgmr.msra.gmra.mrb[20].mxu1 %vm678_vm1, %v6215_v7  ;;  %v5297_v7 = vld [vmem:[%s5854_s20 + $0x20] sm:$0xff]  }
 0x7e7   : > { %4907 = vmatpush3.bf16.msra.mxu0 %v5281_v28  ;;  %4929 = vmatpush3.bf16.msra.mxu1 %v5282_v29  ;;  %v1692_v28 = vrot.slane %v6290_v54, %v5925_v11  ;;  %v1700_v29 = vrot.slane %v6290_v54, %v6206_v34 }
 0x7e8   : > { %4908 = vmatprep.subr.bf16.mxu0 %v5283_v30  ;;  %4930 = vmatprep.subr.bf16.mxu1 %v5284_v31  ;;  %v5313_v30 = vld [vmem:[%s5854_s20 + $0x100] sm:$0xff]  }
 0x7e9   : > { %v5314_v31 = vld [vmem:[%s5854_s20 + $0x180] sm:$0xff]  }
 0x7eb   : > { %4909 = vmatpush3.bf16.msra.mxu0 %v5285_v22  ;;  %4931 = vmatpush3.bf16.msra.mxu1 %v5286_v13 }
 0x7ec   : > { %4910 = vmatprep.subr.bf16.mxu0 %v5287_v9  ;;  %4932 = vmatprep.subr.bf16.mxu1 %v5288_v14  ;;  %v5315_v9 = vld [vmem:[%s5854_s20 + $0x148] sm:$0xff]  }
 0x7ed   : > { %v5316_v14 = vld [vmem:[%s5854_s20 + $0x1c8] sm:$0xff]  }
 0x7ef   : > { %4911 = vmatpush3.bf16.msra.mxu0 %v5289_v15  ;;  %4933 = vmatpush3.bf16.msra.mxu1 %v5290_v37 }
 0x7f0   : > { %4912 = vmatprep.subr.bf16.mxu0 %v5291_v38  ;;  %4934 = vmatprep.subr.bf16.mxu1 %v5292_v39 }
 0x7f3   : > { %4913 = vmatpush3.bf16.msra.mxu0 %v5293_v40  ;;  %4935 = vmatpush3.bf16.msra.mxu1 %v5294_v42 }
 0x7f4   : > { %4914 = vmatprep.subr.bf16.mxu0 %v5295_v59  ;;  %4936 = vmatprep.subr.bf16.mxu1 %v5296_v23 }
 0x7f7   : > { %4915 = vmatpush3.bf16.msra.mxu0 %v5297_v7  ;;  %4937 = vmatpush3.bf16.msra.mxu1 %v5298_v43  ;;  %v5317_v7 = vld [vmem:[%s5854_s20 + $0x108] sm:$0xff]  }
 0x7f8   : > { %4916 = vmatprep.subr.bf16.mxu0 %v5299_v44  ;;  %4938 = vmatprep.subr.bf16.mxu1 %v5300_v46  ;;  %v5318_v43 = vld [vmem:[%s5854_s20 + $0x188] sm:$0xff]  }
 0x7fb   : > { %4917 = vmatpush3.bf16.msra.mxu0 %v5301_v48  ;;  %4939 = vmatpush3.bf16.msra.mxu1 %v5302_v50  ;;  %v5319_v48 = vld [vmem:[%s5854_s20 + $0x150] sm:$0xff]  }
 0x7fc   : > { %4918 = vmatprep.subr.bf16.mxu0 %v5303_v51  ;;  %4940 = vmatprep.subr.bf16.mxu1 %v5304_v25  ;;  %v5320_v50 = vld [vmem:[%s5854_s20 + $0x1d0] sm:$0xff]  }
 0x7ff   : > { %4919 = vmatpush3.bf16.msra.mxu0 %v5305_v33  ;;  %4941 = vmatpush3.bf16.msra.mxu1 %v5306_v52 }
 0x800   : > { %4920 = vmatprep.subr.bf16.mxu0 %v5307_v36  ;;  %4942 = vmatprep.subr.bf16.mxu1 %v5308_v55  ;;  %v5321_v36 = vld [vmem:[%s5854_s20 + $0x110] sm:$0xff]  }
 0x801   : > { %v5322_v55 = vld [vmem:[%s5854_s20 + $0x190] sm:$0xff]  }
 0x803   : > { %4921 = vmatpush3.bf16.msra.mxu0 %v5309_v56  ;;  %4943 = vmatpush3.bf16.msra.mxu1 %v5310_v58  ;;  %v5323_v56 = vld [vmem:[%s5854_s20 + $0x158] sm:$0xff]  }
 0x804   : > { %4950 = vmatprep.subr.bf16.mxu0 %v5311_v60  ;;  %4972 = vmatprep.subr.bf16.mxu1 %v5312_v41  ;;  %v5324_v58 = vld [vmem:[%s5854_s20 + $0x1d8] sm:$0xff]  }
 0x8a1   : > { %v1946_v63 = vpop.f32.mrb[8].mxu0  ;;  %v1987_v2 = vpop.f32.mrb[8].mxu1 }
 0x8a2   : > { %v1947_v57 = vadd.f32 %v1946_v63, %v1672_v61  ;;  %v1988_v4 = vadd.f32 %v1987_v2, %v1680_v0  ;;  %v1948_v5 = vpop.f32.mrb[9].mxu0  ;;  %v1989_v62 = vpop.f32.mrb[9].mxu1  ;;  %v5325_v63 = vld [vmem:[%s5854_s20 + $0x118] sm:$0xff]  }
 0x8a3   : > { %v1949_v6 = vadd.f32 %v1948_v5, %v1676_v1  ;;  %v1990_v19 = vadd.f32 %v1989_v62, %v1684_v35  ;;  %v1950_v12 = vpop.f32.mrb[10].mxu0  ;;  %v1991_v16 = vpop.f32.mrb[10].mxu1  ;;  %v5326_v2 = vld [vmem:[%s5854_s20 + $0x198] sm:$0xff]   ;;  %v5327_v5 = vld [vmem:[%s5854_s20 + $0x160] sm:$0xff]  }
 0x8a4   : > { %v2240_v17 = vmax.f32 %v1947_v57, 0.0  ;;  %v2242_v18 = vmax.f32 %v1988_v4, 0.0  ;;  %v1951_v20 = vpop.f32.mrb[11].mxu0  ;;  %v1992_v21 = vpop.f32.mrb[11].mxu1  ;;  %v5328_v62 = vld [vmem:[%s5854_s20 + $0x1e0] sm:$0xff]  }
 0x8a5   : > { %v2241_v26 = vmax.f32 %v1949_v6, 0.0  ;;  %v2243_v27 = vmax.f32 %v1990_v19, 0.0  ;;  %v6329_v6 = vld [vmem:[%s5849_s24 + $0x8] sm:$0xff]  ;;  %v5329_v12 = vld [vmem:[%s5854_s20 + $0x120] sm:$0xff]  }
 0x8a6   : > { %v2256_v22 = vpack.c.bf16 %v2240_v17, %v2240_v17  ;;  %v2258_v13 = vpack.c.bf16 %v2242_v18, %v2242_v18  ;;  %v1728_v19 = vrot.slane %v6329_v6, %v6203_v32  ;;  %v5330_v16 = vld [vmem:[%s5854_s20 + $0x1a0] sm:$0xff]   ;;  %v5331_v17 = vld [vmem:[%s5854_s20 + $0x168] sm:$0xff]  }
 0x8a7   : > { %v2257_v3 = vpack.c.bf16 %v2241_v26, %v2241_v26  ;;  %v2259_v8 = vpack.c.bf16 %v2243_v27, %v2243_v27  ;;  %v5332_v18 = vld [vmem:[%s5854_s20 + $0x1e8] sm:$0xff]  }
 0x8a9   : > { %v6308_v15 = vpop.f32.mrb[12].mxu0  ;;  %v6310_v37 = vpop.f32.mrb[12].mxu1  ;;  %3328 = vmatprep.mubr.bf16.mxu0 %v2257_v3  ;;  %3368 = vmatprep.mubr.bf16.mxu1 %v2259_v8 }
 0x8aa   : > { %v2030_v38 = vpop.f32.mrb[13].mxu0  ;;  %v2071_v39 = vpop.f32.mrb[13].mxu1  ;;  %3329 = vmatmul.mubr.bf16.vlgmr.msra.gmra.mrb[24].mxu0 %v2256_v22  ;;  %3369 = vmatmul.mubr.bf16.vlgmr.msra.gmra.mrb[24].mxu1 %v2258_v13  ;;  %v1696_v22 = vrot.slane %v6290_v54, %v6203_v32 }
 0x8ab   : > { %v2031_v40 = vadd.f32 %v2030_v38, %v1692_v28  ;;  %v2072_v42 = vadd.f32 %v2071_v39, %v1700_v29  ;;  %4951 = vmatpush3.bf16.msra.mxu0 %v5313_v30  ;;  %4973 = vmatpush3.bf16.msra.mxu1 %v5314_v31  ;;  %v2032_v59 = vpop.f32.mrb[14].mxu0  ;;  %v2073_v23 = vpop.f32.mrb[14].mxu1  ;;  %v5333_v29 = vld [vmem:[%s5854_s20 + $0x128] sm:$0xff]   ;;  %v1688_v31 = vrot.slane %v6290_v54, %v5922_v10  ;;  %v5336_v38 = vld [vmem:[%s5854_s20 + $0x1f0] sm:$0xff]  }
 0x8ac   : > { %v2033_v44 = vpop.f32.mrb[15].mxu0  ;;  %v2074_v46 = vpop.f32.mrb[15].mxu1  ;;  %4952 = vmatprep.subr.bf16.mxu0 %v5315_v9  ;;  %4974 = vmatprep.subr.bf16.mxu1 %v5316_v14  ;;  %v5334_v30 = vld [vmem:[%s5854_s20 + $0x1a8] sm:$0xff]   ;;  %v5335_v14 = vld [vmem:[%s5854_s20 + $0x170] sm:$0xff]   ;;  %v1708_v39 = vrot.slane %v6329_v6, %v5898_v47  ;;  %v2070_v23 = vadd.f32 %v6310_v37, %v1696_v22  ;;  %v5344_v37 = vld [vmem:[%s5854_s20 + $0x2c0] sm:$0xff]   ;;  %v1704_v22 = vrot.slane %v6329_v6, %v5894_v45 }
 0x8ad   : > { %v2245_v51 = vmax.f32 %v2031_v40, 0.0  ;;  %v2247_v25 = vmax.f32 %v2072_v42, 0.0  ;;  %v1716_v40 = vrot.slane %v6329_v6, %v5907_v53  ;;  %v5337_v42 = vld [vmem:[%s5854_s20 + $0x130] sm:$0xff]   ;;  %v2029_v59 = vadd.f32 %v6308_v15, %v1688_v31  ;;  %v5343_v15 = vld [vmem:[%s5854_s20 + $0x240] sm:$0xff]   ;;  %v5365_v31 = vld [vmem:[%s5854_s20 + $0x228] sm:$0xff]  }
 0x8ae   : > { %v5338_v54 = vld [vmem:[%s5854_s20 + $0x1b0] sm:$0xff]  }
 0x8af   : > { %v2261_v33 = vpack.c.bf16 %v2245_v51, %v2245_v51  ;;  %v2263_v52 = vpack.c.bf16 %v2247_v25, %v2247_v25  ;;  %4953 = vmatpush3.bf16.msra.mxu0 %v5317_v7  ;;  %4975 = vmatpush3.bf16.msra.mxu1 %v5318_v43  ;;  %v5339_v7 = vld [vmem:[%s5854_s20 + $0x178] sm:$0xff]   ;;  %v2244_v51 = vmax.f32 %v2029_v59, 0.0  ;;  %v2246_v25 = vmax.f32 %v2070_v23, 0.0  ;;  %v5370_v59 = vld [vmem:[%s5854_s20 + $0x2b0] sm:$0xff]  }
 0x8b0   : > { %4954 = vmatprep.subr.bf16.mxu0 %v5319_v48  ;;  %4976 = vmatprep.subr.bf16.mxu1 %v5320_v50  ;;  %v5340_v43 = vld [vmem:[%s5854_s20 + $0x1f8] sm:$0xff]  }
 0x8b1   : > { %v6320_v60 = vpop.f32.mrb[16].mxu0  ;;  %v6322_v41 = vpop.f32.mrb[16].mxu1  ;;  %3408 = vmatprep.mubr.bf16.mxu0 %v2261_v33  ;;  %3448 = vmatprep.mubr.bf16.mxu1 %v2263_v52  ;;  %v5341_v48 = vld [vmem:[%s5854_s20 + $0x138] sm:$0xff]  }
 0x8b2   : > { %v2112_v61 = vpop.f32.mrb[17].mxu0  ;;  %v2153_v0 = vpop.f32.mrb[17].mxu1  ;;  %v5342_v50 = vld [vmem:[%s5854_s20 + $0x1b8] sm:$0xff]  }
 0x8b3   : > { %4955 = vmatpush3.bf16.msra.mxu0 %v5321_v36  ;;  %4977 = vmatpush3.bf16.msra.mxu1 %v5322_v55  ;;  %v2114_v1 = vpop.f32.mrb[18].mxu0  ;;  %v2155_v35 = vpop.f32.mrb[18].mxu1  ;;  %v2113_v44 = vadd.f32 %v2112_v61, %v1708_v39  ;;  %v2154_v46 = vadd.f32 %v2153_v0, %v1716_v40  ;;  %v5345_v36 = vld [vmem:[%s5854_s20 + $0x200] sm:$0xff]   ;;  %v2260_v55 = vpack.c.bf16 %v2244_v51, %v2244_v51  ;;  %v5347_v0 = vld [vmem:[%s5854_s20 + $0x248] sm:$0xff]   ;;  %v5371_v23 = vld [vmem:[%s5854_s20 + $0x278] sm:$0xff]  }
 0x8b4   : > { %v2115_v57 = vpop.f32.mrb[19].mxu0  ;;  %v2156_v4 = vpop.f32.mrb[19].mxu1  ;;  %4956 = vmatprep.subr.bf16.mxu0 %v5323_v56  ;;  %4978 = vmatprep.subr.bf16.mxu1 %v5324_v58  ;;  %v2262_v56 = vpack.c.bf16 %v2246_v25, %v2246_v25  ;;  %v5346_v58 = vld [vmem:[%s5854_s20 + $0x280] sm:$0xff]   ;;  %v5348_v1 = vld [vmem:[%s5854_s20 + $0x2c8] sm:$0xff]   ;;  %v1724_v39 = vrot.slane %v6329_v6, %v5925_v11  ;;  %v1732_v40 = vrot.slane %v6329_v6, %v6206_v34 }
 0x8b5   : > { %v2249_v33 = vmax.f32 %v2113_v44, 0.0  ;;  %v2251_v52 = vmax.f32 %v2154_v46, 0.0  ;;  %v5351_v57 = vld [vmem:[%s5854_s20 + $0x250] sm:$0xff]   ;;  %v5375_v51 = vld [vmem:[%s5854_s20 + $0x340] sm:$0xff]  }
 0x8b6   : > { %v5352_v4 = vld [vmem:[%s5854_s20 + $0x2d0] sm:$0xff]  }
 0x8b7   : > { %4957 = vmatpush3.bf16.msra.mxu0 %v5325_v63  ;;  %4979 = vmatpush3.bf16.msra.mxu1 %v5326_v2  ;;  %v2265_v61 = vpack.c.bf16 %v2249_v33, %v2249_v33  ;;  %v2267_v35 = vpack.c.bf16 %v2251_v52, %v2251_v52  ;;  %v5349_v63 = vld [vmem:[%s5854_s20 + $0x208] sm:$0xff]  }
 0x8b8   : > { %4958 = vmatprep.subr.bf16.mxu0 %v5327_v5  ;;  %4980 = vmatprep.subr.bf16.mxu1 %v5328_v62  ;;  %v5350_v2 = vld [vmem:[%s5854_s20 + $0x288] sm:$0xff]   ;;  %v5353_v5 = vld [vmem:[%s5854_s20 + $0x210] sm:$0xff]  }
 0x8b9   : > { %v6337_v20 = vpop.f32.mrb[20].mxu0  ;;  %v2233_v21 = vpop.f32.mrb[20].mxu1  ;;  %v5354_v62 = vld [vmem:[%s5854_s20 + $0x290] sm:$0xff]  }
 0x8ba   : > { %v6339_v26 = vadd.f32 %v2233_v21, %v1728_v19  ;;  %v6341_v27 = vpop.f32.mrb[21].mxu0  ;;  %v6343_v3 = vpop.f32.mrb[21].mxu1  ;;  %v5355_v19 = vld [vmem:[%s5854_s20 + $0x258] sm:$0xff]   ;;  %v5360_v21 = vld [vmem:[%s5854_s20 + $0x2e0] sm:$0xff]  }
 0x8bb   : > { %4959 = vmatpush3.bf16.msra.mxu0 %v5329_v12  ;;  %4981 = vmatpush3.bf16.msra.mxu1 %v5330_v16  ;;  %v2196_v8 = vpop.f32.mrb[22].mxu0  ;;  %v2237_v28 = vpop.f32.mrb[22].mxu1  ;;  %v5356_v12 = vld [vmem:[%s5854_s20 + $0x2d8] sm:$0xff]   ;;  %v2195_v44 = vadd.f32 %v6341_v27, %v1724_v39  ;;  %v2236_v46 = vadd.f32 %v6343_v3, %v1732_v40  ;;  %v5377_v27 = vld [vmem:[%s5854_s20 + $0x300] sm:$0xff]  }
 0x8bc   : > { %v2197_v13 = vpop.f32.mrb[23].mxu0  ;;  %v2238_v9 = vpop.f32.mrb[23].mxu1  ;;  %4960 = vmatprep.subr.bf16.mxu0 %v5331_v17  ;;  %4982 = vmatprep.subr.bf16.mxu1 %v5332_v18  ;;  %v5357_v16 = vld [vmem:[%s5854_s20 + $0x218] sm:$0xff]   ;;  %v5359_v18 = vld [vmem:[%s5854_s20 + $0x260] sm:$0xff]  }
 0x8bd   : > { %v5358_v17 = vld [vmem:[%s5854_s20 + $0x298] sm:$0xff]   ;;  %v5361_v8 = vld [vmem:[%s5854_s20 + $0x220] sm:$0xff]   ;;  %v5366_v13 = vld [vmem:[%s5854_s20 + $0x2a8] sm:$0xff]  }
 0x8be   : > { %v5362_v28 = vld [vmem:[%s5854_s20 + $0x2a0] sm:$0xff]   ;;  %v5367_v9 = vld [vmem:[%s5854_s20 + $0x270] sm:$0xff]   ;;  %v5406_v40 = vld [vmem:[%s5854_s20 + $0x3b8] sm:$0xff]  }
 0x8bf   : > { %4961 = vmatpush3.bf16.msra.mxu0 %v5333_v29  ;;  %4983 = vmatpush3.bf16.msra.mxu1 %v5334_v30  ;;  %v5363_v29 = vld [vmem:[%s5854_s20 + $0x268] sm:$0xff]   ;;  %v5378_v3 = vld [vmem:[%s5854_s20 + $0x380] sm:$0xff]  }
 0x8c0   : > { %4962 = vmatprep.subr.bf16.mxu0 %v5335_v14  ;;  %4984 = vmatprep.subr.bf16.mxu1 %v5336_v38  ;;  %v5364_v30 = vld [vmem:[%s5854_s20 + $0x2e8] sm:$0xff]   ;;  %v1712_v14 = vrot.slane %v6329_v6, %v5902_v49  ;;  %v5368_v38 = vld [vmem:[%s5854_s20 + $0x2f0] sm:$0xff]  }
 0x8c3   : > { %4963 = vmatpush3.bf16.msra.mxu0 %v5337_v42  ;;  %4985 = vmatpush3.bf16.msra.mxu1 %v5338_v54  ;;  %v5369_v42 = vld [vmem:[%s5854_s20 + $0x230] sm:$0xff]   ;;  %v2111_v54 = vadd.f32 %v6320_v60, %v1704_v22  ;;  %v5374_v60 = vld [vmem:[%s5854_s20 + $0x2b8] sm:$0xff]  }
 0x8c4   : > { %4964 = vmatprep.subr.bf16.mxu0 %v5339_v7  ;;  %4986 = vmatprep.subr.bf16.mxu1 %v5340_v43  ;;  %v2152_v7 = vadd.f32 %v6322_v41, %v1712_v14  ;;  %v5372_v43 = vld [vmem:[%s5854_s20 + $0x2f8] sm:$0xff]   ;;  %v5376_v41 = vld [vmem:[%s5854_s20 + $0x3c0] sm:$0xff]   ;;  %v5401_v22 = vld [vmem:[%s5854_s20 + $0x330] sm:$0xff]  }
 0x8c5   : > { %v5403_v14 = vld [vmem:[%s5854_s20 + $0x378] sm:$0xff]  }
 0x8c6   : > { %v2250_v25 = vmax.f32 %v2152_v7, 0.0 }
 0x8c7   : > { %4965 = vmatpush3.bf16.msra.mxu0 %v5341_v48  ;;  %4987 = vmatpush3.bf16.msra.mxu1 %v5342_v50  ;;  %v5373_v48 = vld [vmem:[%s5854_s20 + $0x238] sm:$0xff]   ;;  %v2248_v50 = vmax.f32 %v2111_v54, 0.0 }
 0x8c8   : > { %4994 = vmatprep.subr.bf16.mxu0 %v5343_v15  ;;  %5016 = vmatprep.subr.bf16.mxu1 %v5344_v37  ;;  %v2253_v15 = vmax.f32 %v2195_v44, 0.0  ;;  %v2255_v37 = vmax.f32 %v2236_v46, 0.0  ;;  %v2266_v52 = vpack.c.bf16 %v2250_v25, %v2250_v25 }
 0x8c9   : > { %v2264_v33 = vpack.c.bf16 %v2248_v50, %v2248_v50 }
 0x8ca   : > { %3409 = vmatmul.mubr.bf16.vlgmr.msra.gmra.mrb[28].mxu0 %v2260_v55  ;;  %3449 = vmatmul.mubr.bf16.vlgmr.msra.gmra.mrb[28].mxu1 %v2262_v56  ;;  %v2269_v55 = vpack.c.bf16 %v2253_v15, %v2253_v15  ;;  %v5380_v56 = vld [vmem:[%s5854_s20 + $0x3c8] sm:$0xff]  }
 0x8cb   : > { %4995 = vmatpush3.bf16.msra.mxu0 %v5345_v36  ;;  %3488 = vmatprep.mubr.bf16.mxu0 %v2265_v61  ;;  %v5379_v36 = vld [vmem:[%s5854_s20 + $0x348] sm:$0xff]  }
 0x8cc   : > { %5017 = vmatpush3.bf16.msra.mxu1 %v5346_v58  ;;  %3528 = vmatprep.mubr.bf16.mxu1 %v2267_v35  ;;  %v2271_v58 = vpack.c.bf16 %v2255_v37, %v2255_v37  ;;  %v5381_v61 = vld [vmem:[%s5854_s20 + $0x308] sm:$0xff]   ;;  %v5384_v35 = vld [vmem:[%s5854_s20 + $0x3d0] sm:$0xff]  }
 0x8cd   : > { %4996 = vmatprep.subr.bf16.mxu0 %v5347_v0  ;;  %5018 = vmatprep.subr.bf16.mxu1 %v5348_v1  ;;  %v5382_v0 = vld [vmem:[%s5854_s20 + $0x388] sm:$0xff]   ;;  %v5383_v1 = vld [vmem:[%s5854_s20 + $0x350] sm:$0xff]  }
 0x8cf   : > { %4997 = vmatpush3.bf16.msra.mxu0 %v5349_v63  ;;  %v5385_v63 = vld [vmem:[%s5854_s20 + $0x310] sm:$0xff]  }
 0x8d0   : > { %5019 = vmatpush3.bf16.msra.mxu1 %v5350_v2  ;;  %4998 = vmatprep.subr.bf16.mxu0 %v5351_v57  ;;  %v5386_v2 = vld [vmem:[%s5854_s20 + $0x390] sm:$0xff]   ;;  %v5387_v57 = vld [vmem:[%s5854_s20 + $0x358] sm:$0xff]  }
 0x8d1   : > { %5020 = vmatprep.subr.bf16.mxu1 %v5352_v4  ;;  %v5388_v4 = vld [vmem:[%s5854_s20 + $0x3d8] sm:$0xff]  }
 0x8d3   : > { %4999 = vmatpush3.bf16.msra.mxu0 %v5353_v5  ;;  %v5389_v5 = vld [vmem:[%s5854_s20 + $0x318] sm:$0xff]  }
 0x8d4   : > { %5021 = vmatpush3.bf16.msra.mxu1 %v5354_v62  ;;  %5000 = vmatprep.subr.bf16.mxu0 %v5355_v19  ;;  %v5390_v62 = vld [vmem:[%s5854_s20 + $0x398] sm:$0xff]   ;;  %v5391_v19 = vld [vmem:[%s5854_s20 + $0x360] sm:$0xff]  }
 0x8d5   : > { %5022 = vmatprep.subr.bf16.mxu1 %v5356_v12  ;;  %v5392_v12 = vld [vmem:[%s5854_s20 + $0x3e0] sm:$0xff]  }
 0x8d7   : > { %5001 = vmatpush3.bf16.msra.mxu0 %v5357_v16  ;;  %v5393_v16 = vld [vmem:[%s5854_s20 + $0x320] sm:$0xff]  }
 0x8d8   : > { %5023 = vmatpush3.bf16.msra.mxu1 %v5358_v17  ;;  %5002 = vmatprep.subr.bf16.mxu0 %v5359_v18  ;;  %v5394_v17 = vld [vmem:[%s5854_s20 + $0x3a0] sm:$0xff]   ;;  %v5395_v18 = vld [vmem:[%s5854_s20 + $0x368] sm:$0xff]  }
 0x8d9   : > { %5024 = vmatprep.subr.bf16.mxu1 %v5360_v21  ;;  %v5396_v21 = vld [vmem:[%s5854_s20 + $0x3e8] sm:$0xff]  }
 0x8db   : > { %5003 = vmatpush3.bf16.msra.mxu0 %v5361_v8  ;;  %v5397_v8 = vld [vmem:[%s5854_s20 + $0x328] sm:$0xff]  }
 0x8dc   : > { %5025 = vmatpush3.bf16.msra.mxu1 %v5362_v28  ;;  %5004 = vmatprep.subr.bf16.mxu0 %v5363_v29  ;;  %v1720_v28 = vrot.slane %v6329_v6, %v5922_v10  ;;  %v5398_v29 = vld [vmem:[%s5854_s20 + $0x3a8] sm:$0xff]   ;;  %v5405_v6 = vld [vmem:[%s5854_s20 + $0x338] sm:$0xff]  }
 0x8dd   : > { %5026 = vmatprep.subr.bf16.mxu1 %v5364_v30  ;;  %v5399_v30 = vld [vmem:[%s5854_s20 + $0x370] sm:$0xff]  }
 0x8df   : > { %5005 = vmatpush3.bf16.msra.mxu0 %v5365_v31  ;;  %v5400_v31 = vld [vmem:[%s5854_s20 + $0x3f0] sm:$0xff]  }
 0x8e0   : > { %5027 = vmatpush3.bf16.msra.mxu1 %v5366_v13  ;;  %5006 = vmatprep.subr.bf16.mxu0 %v5367_v9  ;;  %v2193_v13 = vadd.f32 %v6337_v20, %v1720_v28  ;;  %v5402_v9 = vld [vmem:[%s5854_s20 + $0x3b0] sm:$0xff]  }
 0x8e1   : > { %5028 = vmatprep.subr.bf16.mxu1 %v5368_v38  ;;  %v5404_v38 = vld [vmem:[%s5854_s20 + $0x3f8] sm:$0xff]  }
 0x8e2   : > { %v2252_v39 = vmax.f32 %v2193_v13, 0.0 }
 0x8e3   : > { %5007 = vmatpush3.bf16.msra.mxu0 %v5369_v42  ;;  %v2254_v42 = vmax.f32 %v6339_v26, 0.0 }
 0x8e4   : > { %5029 = vmatpush3.bf16.msra.mxu1 %v5370_v59  ;;  %5008 = vmatprep.subr.bf16.mxu0 %v5371_v23  ;;  %v2268_v54 = vpack.c.bf16 %v2252_v39, %v2252_v39 }
 0x8e5   : > { %5030 = vmatprep.subr.bf16.mxu1 %v5372_v43  ;;  %v2270_v59 = vpack.c.bf16 %v2254_v42, %v2254_v42 }
 0x8e7   : > { %5009 = vmatpush3.bf16.msra.mxu0 %v5373_v48 }
 0x8e8   : > { %5031 = vmatpush3.bf16.msra.mxu1 %v5374_v60  ;;  %5038 = vmatprep.subr.bf16.mxu0 %v5375_v51 }
 0x8e9   : > { %5060 = vmatprep.subr.bf16.mxu1 %v5376_v41 }
 0x8ea   : > { %3489 = vmatmul.mubr.bf16.vlgmr.msra.gmra.mrb[32].mxu0 %v2264_v33 }
 0x8eb   : > { %3529 = vmatmul.mubr.bf16.vlgmr.msra.gmra.mrb[32].mxu1 %v2266_v52  ;;  %5039 = vmatpush3.bf16.msra.mxu0 %v5377_v27 }
 0x8ec   : > { %3568 = vmatprep.mubr.bf16.mxu0 %v2269_v55  ;;  %5061 = vmatpush3.bf16.msra.mxu1 %v5378_v3 }
 0x8ed   : > { %3608 = vmatprep.mubr.bf16.mxu1 %v2271_v58  ;;  %5040 = vmatprep.subr.bf16.mxu0 %v5379_v36 }
 0x8ee   : > { %5062 = vmatprep.subr.bf16.mxu1 %v5380_v56 }
 0x8ef   : > { %5041 = vmatpush3.bf16.msra.mxu0 %v5381_v61 }
 0x8f0   : > { %5063 = vmatpush3.bf16.msra.mxu1 %v5382_v0  ;;  %5042 = vmatprep.subr.bf16.mxu0 %v5383_v1 }
 0x8f1   : > { %5064 = vmatprep.subr.bf16.mxu1 %v5384_v35 }
 0x8f3   : > { %5043 = vmatpush3.bf16.msra.mxu0 %v5385_v63 }
 0x8f4   : > { %5065 = vmatpush3.bf16.msra.mxu1 %v5386_v2  ;;  %5044 = vmatprep.subr.bf16.mxu0 %v5387_v57 }
 0x8f5   : > { %5066 = vmatprep.subr.bf16.mxu1 %v5388_v4 }
 0x8f7   : > { %5045 = vmatpush3.bf16.msra.mxu0 %v5389_v5 }
 0x8f8   : > { %5067 = vmatpush3.bf16.msra.mxu1 %v5390_v62  ;;  %5046 = vmatprep.subr.bf16.mxu0 %v5391_v19 }
 0x8f9   : > { %5068 = vmatprep.subr.bf16.mxu1 %v5392_v12 }
 0x8fb   : > { %5047 = vmatpush3.bf16.msra.mxu0 %v5393_v16 }
 0x8fc   : > { %5069 = vmatpush3.bf16.msra.mxu1 %v5394_v17  ;;  %5048 = vmatprep.subr.bf16.mxu0 %v5395_v18 }
 0x8fd   : > { %5070 = vmatprep.subr.bf16.mxu1 %v5396_v21 }
 0x8ff   : > { %5049 = vmatpush3.bf16.msra.mxu0 %v5397_v8 }
 0x900   : > { %5071 = vmatpush3.bf16.msra.mxu1 %v5398_v29  ;;  %5050 = vmatprep.subr.bf16.mxu0 %v5399_v30 }
 0x901   : > { %5072 = vmatprep.subr.bf16.mxu1 %v5400_v31 }
 0x903   : > { %5051 = vmatpush3.bf16.msra.mxu0 %v5401_v22 }
 0x904   : > { %5073 = vmatpush3.bf16.msra.mxu1 %v5402_v9  ;;  %5052 = vmatprep.subr.bf16.mxu0 %v5403_v14  ;;  %v5458_v14 = vld [vmem:[%s5819_s17 + $0x8] sm:$0x1f] }
 0x905   : > { %5074 = vmatprep.subr.bf16.mxu1 %v5404_v38  ;;  %v3620_v38 = vrot.slane %v5458_v14, %v5922_v10  ;;  %v5501_v14 = vld [vmem:[%s6766_s11 + $0xc8] ss:$76 sps:$4 sm:$0xff] (!%p4833_p1)  }
 0x907   : > { %5053 = vmatpush3.bf16.msra.mxu0 %v5405_v6 }
 0x908   : > { %5075 = vmatpush3.bf16.msra.mxu1 %v5406_v40 }
 0x90a   : > { %3569 = vmatmul.mubr.bf16.vlgmr.msra.gmra.mrb[36].mxu0 %v2268_v54 }
 0x90b   : > { %3609 = vmatmul.mubr.bf16.vlgmr.msra.gmra.mrb[36].mxu1 %v2270_v59 }
 0x97d   : > { %v4922_v20 = vpop.f32.mrb[24].mxu0  ;;  %v4944_v23 = vpop.f32.mrb[24].mxu1 }
 0x97e   : > { %v4923_v7 = vpop.f32.mrb[25].mxu0  ;;  %v4945_v43 = vpop.f32.mrb[25].mxu1 }
 0x97f   : > { %v4924_v44 = vadd.f32 %v4923_v7, %v4922_v20  ;;  %v4946_v46 = vadd.f32 %v4945_v43, %v4944_v23  ;;  %v4925_v48 = vpop.f32.mrb[26].mxu0  ;;  %v4947_v50 = vpop.f32.mrb[26].mxu1  ;;  %v5462_v7 = vld [vmem:[%s6766_s11 + $0xc] ss:$76 sps:$4 sm:$0xff] (!%p4833_p1)  }
 0x980   : > { %v4926_v60 = vpop.f32.mrb[27].mxu0  ;;  %v4948_v51 = vpop.f32.mrb[27].mxu1  ;;  %v5461_v43 = vld [vmem:[%s6766_s11] ss:$76 sps:$4 sm:$0xff] (!%p4833_p1)   ;;  %4037 = vmatprep.subr.bf16.mxu1 (!%p4833_p1), %v5462_v7  ;;  %v5468_v48 = vld [vmem:[%s6766_s11 + $0xa4] ss:$76 sps:$4 sm:$0xff] (!%p4833_p1)  }
 0x981   : > { %v3371_v25 = vadd.f32 %v4946_v46, %v4924_v44  ;;  %v5464_v44 = vld [vmem:[%s6766_s11 + $0x8] ss:$76 sps:$4 sm:$0xff] (!%p4833_p1)   ;;  %v5467_v50 = vld [vmem:[%s6766_s11 + $0x98] ss:$76 sps:$4 sm:$0xff] (!%p4833_p1)   ;;  %v5470_v60 = vld [vmem:[%s6766_s11 + $0xa0] ss:$76 sps:$4 sm:$0xff] (!%p4833_p1)  }
 0x982   : > { %4038 = vmatpush1.bf16.msra.mxu1 (!%p4833_p1), %v5464_v44  ;;  %v5465_v46 = vld [vmem:[%s6766_s11 + $0x9c] ss:$76 sps:$4 sm:$0xff] (!%p4833_p1)   ;;  %v5473_v51 = vld [vmem:[%s6766_s11 + $0x14] ss:$76 sps:$4 sm:$0xff] (!%p4833_p1)  }
 0x983   : > { %4039 = vmatprep.subr.bf16.mxu1 (!%p4833_p1), %v5468_v48 }
 0x986   : > { %4040 = vmatpush1.bf16.msra.mxu1 (!%p4833_p1), %v5470_v60 }
 0x99d   : > { %v4966_v41 = vpop.f32.mrb[28].mxu0  ;;  %v4988_v26 = vpop.f32.mrb[28].mxu1 }
 0x99e   : > { %v4967_v15 = vpop.f32.mrb[29].mxu0  ;;  %v4989_v37 = vpop.f32.mrb[29].mxu1 }
 0x99f   : > { %v4968_v27 = vadd.f32 %v4967_v15, %v4966_v41  ;;  %v4990_v33 = vadd.f32 %v4989_v37, %v4988_v26  ;;  %v4969_v3 = vpop.f32.mrb[30].mxu0  ;;  %v4991_v52 = vpop.f32.mrb[30].mxu1  ;;  %v5476_v41 = vld [vmem:[%s6766_s11 + $0x1c] ss:$76 sps:$4 sm:$0xff] (!%p4833_p1)  }
 0x9a0   : > { %v4970_v36 = vpop.f32.mrb[31].mxu0  ;;  %v4992_v55 = vpop.f32.mrb[31].mxu1  ;;  %4119 = vmatprep.subr.bf16.mxu1 (!%p4833_p1), %v5476_v41 }
 0x9a1   : > { %v3411_v56 = vadd.f32 %v4968_v27, %v3371_v25  ;;  %v5652_v25 = vmov (!%p4833_p1), 0  }
 0x9a2   : > { %4028 = vmatprep.mubr.bf16.mxu0 (!%p4833_p1), %v5652_v25  ;;  %4069 = vmatprep.mubr.bf16.mxu1 (!%p4833_p1), %v5652_v25 }
 0x9a3   : > { %v3451_v58 = vadd.f32 %v4990_v33, %v3411_v56  ;;  %v4834_v56 = vld [vmem:[%s6767_s1] ss:$0 sm:$0xff] (!%p4833_p1) }
 0x9bd   : > { %v5010_v61 = vpop.f32.mrb[32].mxu0 }
 0x9be   : > { %v5032_v0 = vpop.f32.mrb[32].mxu1  ;;  %v5011_v1 = vpop.f32.mrb[33].mxu0 }
 0x9bf   : > { %v5012_v35 = vadd.f32 %v5011_v1, %v5010_v61  ;;  %v5033_v63 = vpop.f32.mrb[33].mxu1  ;;  %v5013_v2 = vpop.f32.mrb[34].mxu0  ;;  %v4835_v61 = vld [vmem:[%s6767_s1 + $0x1] ss:$0 sm:$0xff] (!%p4833_p1) }
 0x9c0   : > { %v5034_v57 = vadd.f32 %v5033_v63, %v5032_v0  ;;  %v5035_v4 = vpop.f32.mrb[34].mxu1  ;;  %v5014_v5 = vpop.f32.mrb[35].mxu0  ;;  %v5474_v63 = vld [vmem:[%s6766_s11 + $0x18] ss:$76 sps:$4 sm:$0xff] (!%p4833_p1)  }
 0x9c1   : > { %v3491_v62 = vadd.f32 %v5012_v35, %v3451_v58  ;;  %v5036_v19 = vpop.f32.mrb[35].mxu1  ;;  %v5471_v35 = vld [vmem:[%s6766_s11 + $0x10] ss:$76 sps:$4 sm:$0xff] (!%p4833_p1)   ;;  %v5482_v4 = vld [vmem:[%s6766_s11 + $0xb4] ss:$76 sps:$4 sm:$0xff] (!%p4833_p1)  }
 0x9c2   : > { %v5477_v5 = vld [vmem:[%s6766_s11 + $0xa8] ss:$76 sps:$4 sm:$0xff] (!%p4833_p1)   ;;  %v5485_v19 = vld [vmem:[%s6766_s11 + $0x24] ss:$76 sps:$4 sm:$0xff] (!%p4833_p1)  }
 0x9c3   : > { %v3531_v12 = vadd.f32 %v5034_v57, %v3491_v62  ;;  %v5479_v57 = vld [vmem:[%s6766_s11 + $0xac] ss:$76 sps:$4 sm:$0xff] (!%p4833_p1)   ;;  %v5480_v62 = vld [vmem:[%s6766_s11 + $0xb0] ss:$76 sps:$4 sm:$0xff] (!%p4833_p1)  }
 0x9dd   : > { %v5054_v16 = vpop.f32.mrb[36].mxu0 }
 0x9de   : > { %v5076_v17 = vpop.f32.mrb[36].mxu1  ;;  %v5055_v18 = vpop.f32.mrb[37].mxu0 }
 0x9df   : > { %v5056_v21 = vadd.f32 %v5055_v18, %v5054_v16  ;;  %v5077_v8 = vpop.f32.mrb[37].mxu1  ;;  %v5057_v28 = vpop.f32.mrb[38].mxu0  ;;  %v5483_v16 = vld [vmem:[%s6766_s11 + $0x20] ss:$76 sps:$4 sm:$0xff] (!%p4833_p1)   ;;  %v5491_v18 = vld [vmem:[%s6766_s11 + $0xbc] ss:$76 sps:$4 sm:$0xff] (!%p4833_p1)  }
 0x9e0   : > { %v5078_v29 = vadd.f32 %v5077_v8, %v5076_v17  ;;  %v5079_v30 = vpop.f32.mrb[38].mxu1  ;;  %v5058_v31 = vpop.f32.mrb[39].mxu0  ;;  %v5486_v17 = vld [vmem:[%s6766_s11 + $0x28] ss:$76 sps:$4 sm:$0xff] (!%p4833_p1)   ;;  %v5489_v8 = vld [vmem:[%s6766_s11 + $0xb8] ss:$76 sps:$4 sm:$0xff] (!%p4833_p1)  }
 0x9e1   : > { %v3571_v22 = vadd.f32 %v5056_v21, %v3531_v12  ;;  %v5080_v13 = vpop.f32.mrb[39].mxu1  ;;  %v5488_v12 = vld [vmem:[%s6766_s11 + $0x2c] ss:$76 sps:$4 sm:$0xff] (!%p4833_p1)   ;;  %v5494_v21 = vld [vmem:[%s6766_s11 + $0xc4] ss:$76 sps:$4 sm:$0xff] (!%p4833_p1)  }
 0x9e2   : > { %v5492_v28 = vld [vmem:[%s6766_s11 + $0xc0] ss:$76 sps:$4 sm:$0xff] (!%p4833_p1)   ;;  %v5500_v30 = vld [vmem:[%s6766_s11 + $0x3c] ss:$76 sps:$4 sm:$0xff] (!%p4833_p1)  }
 0x9e3   : > { %v3611_v9 = vadd.f32 %v5078_v29, %v3571_v22  ;;  %3626 = sbr.rel (%p4833_p1) target bundleno = 3115 (0xc2b), region = 84  ;;  %v5497_v29 = vld [vmem:[%s6766_s11 + $0x34] ss:$76 sps:$4 sm:$0xff] (!%p4833_p1)   ;;  %v5495_v31 = vld [vmem:[%s6766_s11 + $0x30] ss:$76 sps:$4 sm:$0xff] (!%p4833_p1)  }
 0x9e4   : > { %v5498_v22 = vld [vmem:[%s6766_s11 + $0x38] ss:$76 sps:$4 sm:$0xff] (!%p4833_p1)  }
 0x9e5   : > { %v3616_v6 = vadd.f32 %v3611_v9, %v6184_v24  ;;  %v5459_v24 = vld [vmem:[%s6766_s11 + $0x4] ss:$76 sps:$4 sm:$0xff] (!%p4833_p1)   ;;  %v5503_v13 = vld [vmem:[%s6766_s11 + $0xcc] ss:$76 sps:$4 sm:$0xff] (!%p4833_p1)   ;;  %v5506_v9 = vld [vmem:[%s6766_s11 + $0xd4] ss:$76 sps:$4 sm:$0xff] (!%p4833_p1)  }
 0x9e6   : > { %3996 = vmatprep.subr.bf16.mxu0 (!%p4833_p1), %v5459_v24 }
 0x9e7   : > { %v3621_v39 = vadd.f32 %v3620_v38, %v3616_v6  ;;  %3997 = vmatpush1.bf16.msra.mxu0 (!%p4833_p1), %v5461_v43  ;;  %v5504_v38 = vld [vmem:[%s6766_s11 + $0xd0] ss:$76 sps:$4 sm:$0xff] (!%p4833_p1)  }
 0x9e8   : > { %3998 = vmatprep.subr.bf16.mxu0 (!%p4833_p1), %v5465_v46  ;;  %v5509_v6 = vld [vmem:[%s6766_s11 + $0x44] ss:$76 sps:$4 sm:$0xff] (!%p4833_p1)  }
 0x9e9   : > { %3622 = vst.msk [vmem:[#allocation2] sm:$0xff] %vm678_vm1, %v3621_v39  ;;  %v3629_v40 = vsel (!%p4833_p1), %vm678_vm1, %v3621_v39, 0.0 }
 0x9ea   : > { %3630 = vadd.xlane.f32.xlu0 %v3629_v40  ;;  %v5510_v40 = vld [vmem:[%s6766_s11 + $0x48] ss:$76 sps:$4 sm:$0xff]  }
 0x9eb   : > { %3999 = vmatpush1.bf16.msra.mxu0 %v5467_v50 }
 0x9ec   : > { %4078 = vmatprep.subr.bf16.mxu0 %v5473_v51 }
 0xa77   : > { %v3631_v42 = vpop.xlane.xlu0 %3630 }
 0xa78   : > { %v3632_v54 = vmul.f32 0.03125, %v3631_v42  ;;  %v5653_v42 = vmov 0.0  }
 0xa7a   : > { %v3633_v59 = vsub.f32 %v3621_v39, %v3632_v54  ;;  %v5507_v39 = vld [vmem:[%s6766_s11 + $0x40] ss:$76 sps:$4 sm:$0xff]   ;;  %v5513_v54 = vld [vmem:[%s6766_s11 + $0xdc] ss:$76 sps:$4 sm:$0xff]  }
 0xa7c   : > { %v3634_v20 = vmul.f32 %v3633_v59, %v3633_v59 }
 0xa7e   : > { %v3635_v23 = vsel %vm678_vm1, %v3634_v20, 0.0  ;;  %v5514_v20 = vld [vmem:[%s6766_s11 + $0xe0] ss:$76 sps:$4 sm:$0xff]  }
 0xa7f   : > { %3636 = vadd.xlane.f32.xlu0 %v3635_v23  ;;  %v3700_v23 = vld [vmem:[%s6768_s30] sm:$0xff] }
 0xa80   : > { %v3709_v24 = vrot.slane %v3700_v23, %v5894_v45  ;;  %v3717_v7 = vrot.slane %v3700_v23, %v5902_v49  ;;  %v3713_v43 = vrot.slane %v3700_v23, %v5898_v47  ;;  %v3721_v44 = vrot.slane %v3700_v23, %v5907_v53 }
 0xb0c   : > { %v3637_v26 = vpop.xlane.xlu0 %3636 }
 0xb0d   : > { %v3638_v15 = vmul.f32 0.032258064, %v3637_v26 }
 0xb0f   : > { %5515 = vrsqrt.f32 %v3638_v15  ;;  %vm3641_vm14 = vcmp.eq.f32.partialorder %v3638_v15, inf  ;;  %v3644_v33 = vand.u32 2147483648, %v3638_v15  ;;  %vm3643_vm15 = vcmp.eq.f32.partialorder %v3638_v15, 0.0 }
 0xb19   : > { %v5516_v37 = vpop.eup %5515 }
 0xb1a   : > { %v3640_v27 = vmul.f32 %v5516_v37, %v3638_v15 }
 0xb1c   : > { %v3642_v3 = vsel %vm3641_vm14, %v3638_v15, %v3640_v27 }
 0xb1d   : > { %v3645_v52 = vsel %vm3643_vm15, %v3644_v33, %v3642_v3  ;;  %v3725_v3 = vrot.slane %v3700_v23, %v5922_v10 }
 0xb1e   : > { %v3646_v36 = vadd.f32 1e-06, %v3645_v52  ;;  %v3733_v52 = vrot.slane %v3700_v23, %v6203_v32 }
 0xb20   : > { %5517 = vrcp.f32 %v3646_v36  ;;  %v3729_v36 = vrot.slane %v3700_v23, %v5925_v11 }
 0xb2a   : > { %v5518_v55 = vpop.eup %5517 }
 0xb2b   : > { %v3648_v58 = vmul.f32 %v5518_v55, %v3633_v59  ;;  %v5511_v59 = vld [vmem:[%s6766_s11 + $0xd8] ss:$76 sps:$4 sm:$0xff]   ;;  %v3737_v55 = vrot.slane %v3700_v23, %v6206_v34 }
 0xb2d   : > { %v3653_v0 = vmul.f32 %v4834_v56, %v3648_v58 }
 0xb2f   : > { %v3658_v1 = vadd.f32 %v4835_v61, %v3653_v0 }
 0xb31   : > { %v6496_v2 = vpack.c.bf16 %v3658_v1, %v3658_v1 }
 0xb33   : > { %4874 = vmatmul.mubr.msk.bf16.vlgmr.msra.gmra.mrb[0].mxu0 %vm678_vm1, %v6496_v2  ;;  %4875 = vmatmul.mubr.msk.bf16.vlgmr.msra.gmra.mrb[0].mxu1 %vm678_vm1, %v6496_v2 }
 0xb34   : > { %4079 = vmatpush1.bf16.msra.mxu0 %v5471_v35  ;;  %4120 = vmatpush1.bf16.msra.mxu1 %v5474_v63 }
 0xb35   : > { %4080 = vmatprep.subr.bf16.mxu0 %v5479_v57  ;;  %4121 = vmatprep.subr.bf16.mxu1 %v5482_v4 }
 0xb36   : > { %4110 = vmatprep.mubr.bf16.mxu0 %v5652_v25  ;;  %4151 = vmatprep.mubr.bf16.mxu1 %v5652_v25 }
 0xb38   : > { %4081 = vmatpush1.bf16.msra.mxu0 %v5477_v5  ;;  %4122 = vmatpush1.bf16.msra.mxu1 %v5480_v62  ;;  %v3701_v5 = vld [vmem:[%s6769_s22 + $0x8] sm:$0xff] }
 0xb39   : > { %4160 = vmatprep.subr.bf16.mxu0 %v5485_v19  ;;  %4201 = vmatprep.subr.bf16.mxu1 %v5488_v12  ;;  %v3741_v12 = vrot.slane %v3701_v5, %v5894_v45 }
 0xb3b   : > { %4876 = vmatmul.mubr.msk.bf16.vlgmr.msra.gmra.mrb[4].mxu0 %vm678_vm1, %v6496_v2  ;;  %4877 = vmatmul.mubr.msk.bf16.vlgmr.msra.gmra.mrb[4].mxu1 %vm678_vm1, %v6496_v2 }
 0xb3c   : > { %4161 = vmatpush1.bf16.msra.mxu0 %v5483_v16  ;;  %4202 = vmatpush1.bf16.msra.mxu1 %v5486_v17  ;;  %v3749_v16 = vrot.slane %v3701_v5, %v5902_v49  ;;  %v3745_v17 = vrot.slane %v3701_v5, %v5898_v47 }
 0xb3d   : > { %4162 = vmatprep.subr.bf16.mxu0 %v5491_v18  ;;  %4203 = vmatprep.subr.bf16.mxu1 %v5494_v21  ;;  %v3753_v18 = vrot.slane %v3701_v5, %v5907_v53  ;;  %v3757_v53 = vrot.slane %v3701_v5, %v5922_v10  ;;  %v3702_v10 = vld [vmem:[%s6769_s22 + $0x10] sm:$0x7] }
 0xb3e   : > { %4192 = vmatprep.mubr.bf16.mxu0 %v5652_v25  ;;  %4233 = vmatprep.mubr.bf16.mxu1 %v5652_v25 }
 0xb40   : > { %4163 = vmatpush1.bf16.msra.mxu0 %v5489_v8  ;;  %4204 = vmatpush1.bf16.msra.mxu1 %v5492_v28 }
 0xb41   : > { %4242 = vmatprep.subr.bf16.mxu0 %v5497_v29  ;;  %4283 = vmatprep.subr.bf16.mxu1 %v5500_v30 }
 0xb43   : > { %4878 = vmatmul.mubr.msk.bf16.vlgmr.msra.gmra.mrb[8].mxu0 %vm678_vm1, %v6496_v2  ;;  %4879 = vmatmul.mubr.msk.bf16.vlgmr.msra.gmra.mrb[8].mxu1 %vm678_vm1, %v6496_v2 }
 0xb44   : > { %4243 = vmatpush1.bf16.msra.mxu0 %v5495_v31  ;;  %4284 = vmatpush1.bf16.msra.mxu1 %v5498_v22 }
 0xb45   : > { %4244 = vmatprep.subr.bf16.mxu0 %v5503_v13  ;;  %4285 = vmatprep.subr.bf16.mxu1 %v5506_v9 }
 0xb46   : > { %4274 = vmatprep.mubr.bf16.mxu0 %v5652_v25  ;;  %4315 = vmatprep.mubr.bf16.mxu1 %v5652_v25 }
 0xb48   : > { %4245 = vmatpush1.bf16.msra.mxu0 %v5501_v14  ;;  %4286 = vmatpush1.bf16.msra.mxu1 %v5504_v38 }
 0xb49   : > { %4324 = vmatprep.subr.bf16.mxu0 %v5509_v6  ;;  %5117 = vmatprep.subr.bf16.mxu1 %v5653_v42 }
 0xb4b   : > { %4880 = vmatmul.mubr.msk.bf16.vlgmr.msra.gmra.mrb[12].mxu0 %vm678_vm1, %v6496_v2  ;;  %4881 = vmatmul.mubr.msk.bf16.vlgmr.msra.gmra.mrb[12].mxu1 %vm678_vm1, %v6496_v2 }
 0xb4c   : > { %4325 = vmatpush1.bf16.msra.mxu0 %v5507_v39  ;;  %5118 = vmatpush3.bf16.msra.mxu1 %v5510_v40  ;;  %v3765_v39 = vrot.slane %v3701_v5, %v6203_v32  ;;  %v3761_v40 = vrot.slane %v3701_v5, %v5925_v11 }
 0xb4d   : > { %4326 = vmatprep.subr.bf16.mxu0 %v5513_v54  ;;  %5119 = vmatprep.subr.bf16.mxu1 %v5653_v42 }
 0xb4e   : > { %4356 = vmatprep.mubr.bf16.mxu0 %v5652_v25  ;;  %5121 = vmatprep.mubr.msk.bf16.mxu1 %vm5654_vm0, %v5653_v42  ;;  %v3769_v42 = vrot.slane %v3701_v5, %v6206_v34  ;;  %v3773_v34 = vrot.slane %v3702_v10, %v5894_v45 }
 0xb50   : > { %4327 = vmatpush1.bf16.msra.mxu0 %v5511_v59  ;;  %5120 = vmatpush3.bf16.msra.mxu1 %v5514_v20 }
 0xb53   : > { %4882 = vmatmul.mubr.msk.bf16.vlgmr.msra.gmra.mrb[16].mxu0 %vm678_vm1, %v6496_v2  ;;  %5122 = vmatmul.mubr.msk.bf16.vlgmr.msra.gmra.mrb[16].mxu1 %vm678_vm1, %v6496_v2 }
 0xc06   : > { %v4030_v46 = vpop.f32.mrb[0].mxu0  ;;  %v4071_v48 = vpop.f32.mrb[0].mxu1 }
 0xc07   : > { %v4031_v50 = vadd.f32 %v4030_v46, %v3709_v24  ;;  %v4072_v60 = vadd.f32 %v4071_v48, %v3717_v7  ;;  %v4032_v51 = vpop.f32.mrb[1].mxu0  ;;  %v4073_v25 = vpop.f32.mrb[1].mxu1 }
 0xc08   : > { %v4033_v41 = vadd.f32 %v4032_v51, %v3713_v43  ;;  %v4074_v26 = vadd.f32 %v4073_v25, %v3721_v44  ;;  %v4034_v15 = vpop.f32.mrb[2].mxu0  ;;  %v4075_v37 = vpop.f32.mrb[2].mxu1 }
 0xc09   : > { %4405 = vst [vmem:[%s5856_s5] sm:$0xff] %v4031_v50  ;;  %4407 = vst [vmem:[%s5856_s5 + $0x10] sm:$0xff] %v4072_v60  ;;  %v4035_v27 = vpop.f32.mrb[3].mxu0  ;;  %v4076_v33 = vpop.f32.mrb[3].mxu1  ;;  %v3781_v50 = vrot.slane %v3702_v10, %v5902_v49  ;;  %v3777_v60 = vrot.slane %v3702_v10, %v5898_v47 }
 0xc0a   : > { %4406 = vst [vmem:[%s5856_s5 + $0x8] sm:$0xff] %v4033_v41  ;;  %4408 = vst [vmem:[%s5856_s5 + $0x18] sm:$0xff] %v4074_v26 }
 0xc0e   : > { %v4112_v56 = vpop.f32.mrb[4].mxu0  ;;  %v4153_v58 = vpop.f32.mrb[4].mxu1 }
 0xc0f   : > { %v4113_v61 = vadd.f32 %v4112_v56, %v3725_v3  ;;  %v4154_v0 = vadd.f32 %v4153_v58, %v3733_v52  ;;  %v4114_v1 = vpop.f32.mrb[5].mxu0  ;;  %v4155_v35 = vpop.f32.mrb[5].mxu1 }
 0xc10   : > { %v4115_v63 = vadd.f32 %v4114_v1, %v3729_v36  ;;  %v4156_v2 = vadd.f32 %v4155_v35, %v3737_v55  ;;  %v4116_v57 = vpop.f32.mrb[6].mxu0  ;;  %v4157_v4 = vpop.f32.mrb[6].mxu1 }
 0xc11   : > { %4409 = vst [vmem:[%s5856_s5 + $0x20] sm:$0xff] %v4113_v61  ;;  %4411 = vst [vmem:[%s5856_s5 + $0x30] sm:$0xff] %v4154_v0  ;;  %v4117_v62 = vpop.f32.mrb[7].mxu0  ;;  %v4158_v19 = vpop.f32.mrb[7].mxu1 }
 0xc12   : > { %4410 = vst [vmem:[%s5856_s5 + $0x28] sm:$0xff] %v4115_v63  ;;  %4412 = vst [vmem:[%s5856_s5 + $0x38] sm:$0xff] %v4156_v2 }
 0xc16   : > { %v4194_v21 = vpop.f32.mrb[8].mxu0  ;;  %v4235_v8 = vpop.f32.mrb[8].mxu1 }
 0xc17   : > { %v4195_v28 = vadd.f32 %v4194_v21, %v3741_v12  ;;  %v4236_v29 = vadd.f32 %v4235_v8, %v3749_v16  ;;  %v4196_v30 = vpop.f32.mrb[9].mxu0  ;;  %v4237_v31 = vpop.f32.mrb[9].mxu1 }
 0xc18   : > { %v4197_v22 = vadd.f32 %v4196_v30, %v3745_v17  ;;  %v4238_v13 = vadd.f32 %v4237_v31, %v3753_v18  ;;  %v4198_v9 = vpop.f32.mrb[10].mxu0  ;;  %v4239_v14 = vpop.f32.mrb[10].mxu1 }
 0xc19   : > { %4413 = vst [vmem:[%s5856_s5 + $0x40] sm:$0xff] %v4195_v28  ;;  %4415 = vst [vmem:[%s5856_s5 + $0x50] sm:$0xff] %v4236_v29  ;;  %v4199_v38 = vpop.f32.mrb[11].mxu0  ;;  %v4240_v6 = vpop.f32.mrb[11].mxu1 }
 0xc1a   : > { %4414 = vst [vmem:[%s5856_s5 + $0x48] sm:$0xff] %v4197_v22  ;;  %4416 = vst [vmem:[%s5856_s5 + $0x58] sm:$0xff] %v4238_v13 }
 0xc1e   : > { %v4276_v54 = vpop.f32.mrb[12].mxu0  ;;  %v4317_v59 = vpop.f32.mrb[12].mxu1 }
 0xc1f   : > { %v4277_v20 = vadd.f32 %v4276_v54, %v3757_v53  ;;  %v4318_v23 = vadd.f32 %v4317_v59, %v3765_v39  ;;  %v4278_v24 = vpop.f32.mrb[13].mxu0  ;;  %v4319_v7 = vpop.f32.mrb[13].mxu1 }
 0xc20   : > { %v4279_v43 = vadd.f32 %v4278_v24, %v3761_v40  ;;  %v4320_v44 = vadd.f32 %v4319_v7, %v3769_v42  ;;  %v4280_v46 = vpop.f32.mrb[14].mxu0  ;;  %v4321_v48 = vpop.f32.mrb[14].mxu1 }
 0xc21   : > { %4417 = vst [vmem:[%s5856_s5 + $0x60] sm:$0xff] %v4277_v20  ;;  %4419 = vst [vmem:[%s5856_s5 + $0x70] sm:$0xff] %v4318_v23  ;;  %v4281_v11 = vpop.f32.mrb[15].mxu0  ;;  %v4322_v32 = vpop.f32.mrb[15].mxu1 }
 0xc22   : > { %4418 = vst [vmem:[%s5856_s5 + $0x68] sm:$0xff] %v4279_v43  ;;  %4420 = vst [vmem:[%s5856_s5 + $0x78] sm:$0xff] %v4320_v44 }
 0xc26   : > { %v4358_v51 = vpop.f32.mrb[16].mxu0  ;;  %v4399_v25 = vpop.f32.mrb[16].mxu1 }
 0xc27   : > { %v4359_v41 = vadd.f32 %v4358_v51, %v3773_v34  ;;  %v4400_v26 = vadd.f32 %v4399_v25, %v3781_v50  ;;  %v4360_v15 = vpop.f32.mrb[17].mxu0  ;;  %v5123_v37 = vpop.f32.mrb[17].mxu1 }
 0xc28   : > { %v4361_v27 = vadd.f32 %v4360_v15, %v3777_v60  ;;  %v4362_v33 = vpop.f32.mrb[18].mxu0  ;;  %v4402_v3 = vpop.f32.mrb[18].mxu1 }
 0xc29   : > { %4421 = vst [vmem:[%s5856_s5 + $0x80] sm:$0xff] %v4359_v41  ;;  %4423 = vst [vmem:[%s5856_s5 + $0x90] sm:$0xff] %v4400_v26  ;;  %v4363_v52 = vpop.f32.mrb[19].mxu0  ;;  %v5124_v36 = vpop.f32.mrb[19].mxu1 }
 0xc2a   : > { %4422 = vst [vmem:[%s5856_s5 + $0x88] sm:$0xff] %v4361_v27 }
 0xc2b PF: > { %s6770_s15 = sld [smem:[#allocation10_spill]]  ;;  %s4439_s3 = sshll.u32 %s5856_s5, 4  ;;  %s4440_s3 = int_to_ptr.vmem [resolvable:$true] %s4439_s3 }
 0xc2c   : > { %s6771_s20 = sld [smem:[#allocation8_spill]]  ;;  %s6773_s14 = sld [smem:[#allocation28_spill]] }
 0xc2d   : > { %s5519_s25 = scalar_lea.vmem %s4440_s3, 2432  ;;  %s5655_s21 = smov [#allocation4]  }
 0xc2e   : > { %p5520_p2 = scmp.ne.s32.totalorder %s4440_s3, %s5519_s25  ;;  %s5523_s27 = sshll.u32 %s5655_s21, 4  ;;  %s5524_s27 = int_to_ptr.vmem [resolvable:$false] %s5523_s27 }
 0xc2f   : > { %s5525_s29 = scalar_lea.vmem %s5524_s27, 4864  ;;  %p5526_p6 = scmp.lt.s32.totalorder %s4440_s3, %s5524_s27 }
 0xc30   : > { %p5521_p4 = pnand %p5520_p2, %p5780_p3  ;;  %p5527_p7 = scmp.lt.s32.totalorder %s5525_s29, %s5519_s25 }
 0xc31   : > { %s5126_s2 = smul.u32 2432, %s6770_s15 }
 0xc32   : > { %s6774_s17 = sand.u32 1, %s6771_s20   ;;  %p5522_p5 = pneg %p5521_p4 }
 0xc33   : > { %s6655_s16 = scalar_lea.hbm %s6773_s14, %s5126_s2  ;;  %s4425_s23 = scalar_lea.sflag [#allocation5], %s6774_s17 }
 0xc34   : > { %p5528_p8 = por %p5527_p7, %p5526_p6 }
 0xc36   : > { %p5529_p10 = pnand %p5528_p8, %p5522_p5 }
 0xc38   : > { %5532 = shalt.err (!%p5529_p10)
}
 0xc39   : > { %s5533_s5 = scalar_lea.hbm %s6655_s16, 2432  ;;  %s5537_s30 = scalar_lea.hbm %s6773_s14, 4864 }
 0xc3a   : > { %p5534_p11 = scmp.ne.s32.totalorder %s6655_s16, %s5533_s5  ;;  %p5538_p0 = scmp.lt.u32.totalorder %s6655_s16, %s6773_s14 }
 0xc3b   : > { %p5539_p1 = scmp.lt.u32.totalorder %s5537_s30, %s5533_s5  ;;  %p5541_p4 = scmp.lt.u32.totalorder %s5533_s5, %s6655_s16 }
 0xc3c   : > { %p5535_p12 = pnand %p5534_p11, %p5780_p3 }
 0xc3d   : > { %p5540_p2 = por %p5539_p1, %p5538_p0 }
 0xc3e   : > { %p5536_p13 = pneg %p5535_p12 }
 0xc3f   : > { %p5542_p5 = por %p5541_p4, %p5540_p2 }
 0xc41   : > { %p5543_p6 = pnand %p5542_p5, %p5536_p13 }
 0xc43   : > { %5546 = shalt.err (!%p5543_p6)
}
 0xc44   : > { %5127 = dma.vmem_to_hbm [thread:$0]  (%p5780_p3), %s4440_s3, 2432, %s6655_s16, %s4425_s23  }
 0xc45 PF: > { %s6775_s24 = sld [smem:[#allocation13_spill]]  ;;  %s6776_s19 = sld [smem:[#allocation7_spill]] }
 0xc4b   : > { %p5133_p7 = scmp.ge.s32.totalorder %s6775_s24, 2  ;;  %s4451_s20 = sand.u32 1, %s6776_s19  }
 0xc4c   : > { %s4452_s2 = scalar_lea.sflag [#allocation5], %s4451_s20 }
 0xc4d   : > { %p5130_p8 = pnand %p5133_p7, %p5790_p9 }
 0xc4f   : > { %5580 = dma.done.wait (!%p5130_p8), %s4452_s2, 2432  }
 0xc50   : > { %5582 = vsyncadd (!%p5130_p8), %s4452_s2, 4294964864  ;;  %s27_s20 = sadd.s32 1, %s6775_s24   ;;  %s6778_s29 = sld [smem:[#allocation8_spill]] }
 0xc51   : > { %p24_p10 = scmp.ge.s32.totalorder %s27_s20, 6   ;;  %s6779_s30 = sld [smem:[#allocation9_spill]] }
 0xc52   : > { %s6780_s15 = sld [smem:[#allocation18_spill]]  ;;  %s6781_s16 = sld [smem:[#allocation11_spill]] }
 0xc53   : > { %s6782_s17 = sld [smem:[#allocation12_spill]]  ;;  %s6783_s18 = sld [smem:[#allocation14_spill]] }
 0xc54   : > { %s6784_s19 = sld [smem:[#allocation16_spill]]  ;;  %26 = sbr.rel (!%p24_p10) target bundleno = 16 (0x10), region = 149 }
 0xc5b   :  { %4457 = vsyncpa [#allocation5], 1 }
 0xc5c   :  { %4459 = vsyncpa [#allocation5 + $0x1], 1 }

</bundles_post_ra>
